<compile_context>
chip_gen: v6e
topology: v6e:2x2x1
jax: 0.10.0
libtpu: 0.0.40
codegen_flags: <defaults>
</compile_context>

<pallas_src>
import functools

import jax
import jax.numpy as jnp
import numpy as np
from jax.experimental import pallas as pl
from jax.experimental.pallas import tpu as pltpu


def _round_up(x, m):
    return ((x + m - 1) // m) * m


def _boundary_masks(D, H, W):
    """(27, D*H*W) f32 constant: mask[k, i] = 1 iff tap k of output voxel i is in range."""
    S = D * H * W
    idx = np.arange(S)
    d = idx // (H * W)
    h = (idx // W) % H
    w = idx % W
    masks = np.zeros((27, S), np.float32)
    k = 0
    for od in (-1, 0, 1):
        for oh in (-1, 0, 1):
            for ow in (-1, 0, 1):
                valid = ((d + od >= 0) & (d + od < D) &
                         (h + oh >= 0) & (h + oh < H) &
                         (w + ow >= 0) & (w + ow < W))
                masks[k] = valid.astype(np.float32)
                k += 1
    return masks


def _prep_weight(w):
    """(O, I, 3, 3, 3) -> lane-dense (O, 27*Ipad), tap-major, channel groups padded to 8."""
    O, I = w.shape[0], w.shape[1]
    Ip = _round_up(I, 8)
    wt = jnp.transpose(w, (0, 2, 3, 4, 1)).reshape(O, 27, I)   # [o, k, i], k = kd*9+kh*3+kw
    if Ip != I:
        wt = jnp.pad(wt, ((0, 0), (0, 0), (0, Ip - I)))
    return wt.reshape(O, 27 * Ip)


def _double_conv_kernel(x_ref, m_ref, w1_ref, w2_ref, o_ref,
                        xs_ref, p_ref, *, D, H, W, Mp):
    """Fused DoubleConv for one batch element.

    x_ref : (1, Cin, S)      pooled input, spatial flattened on lanes
    m_ref : (27, S)          boundary masks (shared by both convs)
    w1_ref: (Cmid, 27*Cp1)   conv1 weights, tap-major, channel groups padded to 8
    w2_ref: (Cout, 27*Cp2)   conv2 weights
    o_ref : (1, Cout, S)
    xs_ref: (Cmaxp, S+2*Mp)  zero-haloed staging scratch
    p_ref : (Kmax, S)        shared im2col patch matrix
    """
    S = D * H * W
    HW = H * W
    Cin = x_ref.shape[1]
    Cmid = w1_ref.shape[0]

    # flat-index shift of each of the 27 taps (static ints, same order as masks)
    shifts = [od * HW + oh * W + ow
              for od in (-1, 0, 1) for oh in (-1, 0, 1) for ow in (-1, 0, 1)]

    # zero the staging buffer once: halo columns and padded channel rows stay zero.
    xs_ref[...] = jnp.zeros_like(xs_ref)

    def conv_in_lrelu(x, C, w_ref):
        Cpad = _round_up(C, 8)
        K = 27 * Cpad
        # stage activation (C, S) into the zero-haloed scratch (lane-aligned store)
        xs_ref[0:C, Mp:Mp + S] = x
        if C < Cpad:
            # keep padded channel rows clean (matching weight columns are zero too)
            xs_ref[C:Cpad, Mp:Mp + S] = jnp.zeros((Cpad - C, S), jnp.float32)
        # im2col, tap-major: P[k*Cpad + c, i] = mask_k[i] * x[c, i + shift_k]
        for k in range(27):
            s = Mp + shifts[k]
            win = xs_ref[0:Cpad, s:s + S]
            if shifts[k] != 0:                       # centre tap mask is all-ones
                win = win * m_ref[k:k + 1, :]
            p_ref[k * Cpad:(k + 1) * Cpad, :] = win
        # one MXU contraction: (Cnext, K) @ (K, S) -> (Cnext, S), f32 accumulate
        y = jnp.dot(w_ref[...], p_ref[0:K, :], preferred_element_type=jnp.float32)
        # conv bias omitted: cancelled exactly by the mean subtraction below.
        # InstanceNorm3d (affine=False, eps=1e-5): per-channel stats over lanes (XLU)
        mean = jnp.mean(y, axis=1, keepdims=True)
        yc = y - mean
        var = jnp.mean(yc * yc, axis=1, keepdims=True)
        yn = yc * jax.lax.rsqrt(var + 1e-5)
        # LeakyReLU(negative_slope=0.01)
        return jnp.where(yn >= 0.0, yn, 0.01 * yn)

    y1 = conv_in_lrelu(x_ref[0], Cin, w1_ref)
    y2 = conv_in_lrelu(y1, Cmid, w2_ref)
    o_ref[0] = y2


@jax.jit
def down_forward(x, w1, b1, w2, b2):
    """Down.forward.  x: (N, Cin, D, H, W) NCDHW -> (N, Cout, D//2, H//2, W//2)."""
    del b1, b2  # per-channel conv bias is exactly cancelled by affine-free InstanceNorm
    N, Cin, D, H, W = x.shape
    Cmid = w1.shape[0]
    Cout = w2.shape[0]
    D2, H2, W2 = D // 2, H // 2, W // 2
    S = D2 * H2 * W2

    # MaxPool3d(kernel=2, stride=2): plain-JAX glue; spatial then flattened on lanes.
    xp = x.reshape(N, Cin, D2, 2, H2, 2, W2, 2).max(axis=(3, 5, 7)).reshape(N, Cin, S)

    w1m = _prep_weight(w1)                                  # (Cmid, 27*Cp1)
    w2m = _prep_weight(w2)                                  # (Cout, 27*Cp2)
    K1 = w1m.shape[1]
    K2 = w2m.shape[1]
    Kmax = max(K1, K2)
    masks = jnp.asarray(_boundary_masks(D2, H2, W2))        # (27, S) f32 constant

    halo = H2 * W2 + W2 + 1                                 # max |tap shift|
    Mp = _round_up(halo, 128)                               # lane-aligned halo margin
    Cmaxp = max(_round_up(Cin, 8), _round_up(Cmid, 8))

    kernel = functools.partial(_double_conv_kernel, D=D2, H=H2, W=W2, Mp=Mp)

    out = pl.pallas_call(
        kernel,
        out_shape=jax.ShapeDtypeStruct((N, Cout, S), jnp.float32),
        grid=(N,),
        in_specs=[
            pl.BlockSpec((1, Cin, S), lambda n: (n, 0, 0)),
            pl.BlockSpec((27, S), lambda n: (0, 0)),
            pl.BlockSpec((Cmid, K1), lambda n: (0, 0)),
            pl.BlockSpec((Cout, K2), lambda n: (0, 0)),
        ],
        out_specs=pl.BlockSpec((1, Cout, S), lambda n: (n, 0, 0)),
        scratch_shapes=[
            pltpu.VMEM((Cmaxp, S + 2 * Mp), jnp.float32),   # halo-staged activation
            pltpu.VMEM((Kmax, S), jnp.float32),             # shared im2col patches
        ],
        compiler_params=pltpu.CompilerParams(
            dimension_semantics=("parallel",),
            vmem_limit_bytes=32 * 1024 * 1024),
    )(xp, masks, w1m, w2m)

    return out.reshape(N, Cout, D2, H2, W2)


def reference_forward(x, w1, b1, w2, b2):
    """Pure-JAX reference (mirrors the PyTorch module) for correctness check."""
    N, C, D, H, W = x.shape
    xp = x.reshape(N, C, D // 2, 2, H // 2, 2, W // 2, 2).max(axis=(3, 5, 7))

    def conv(xx, w, b):
        y = jax.lax.conv_general_dilated(
            xx, w, window_strides=(1, 1, 1),
            padding=((1, 1), (1, 1), (1, 1)),
            dimension_numbers=("NCDHW", "OIDHW", "NCDHW"))
        return y + b[None, :, None, None, None]

    def inorm_lrelu(y):
        mean = y.mean(axis=(2, 3, 4), keepdims=True)
        var = y.var(axis=(2, 3, 4), keepdims=True)   # biased, as in InstanceNorm
        yn = (y - mean) / jnp.sqrt(var + 1e-5)
        return jnp.where(yn >= 0, yn, 0.01 * yn)

    y = inorm_lrelu(conv(xp, w1, b1))
    y = inorm_lrelu(conv(y, w2, b2))
    return y


if __name__ == "__main__":
    key = jax.random.PRNGKey(0)
    k_x, k_w1, k_b1, k_w2, k_b2 = jax.random.split(key, 5)

    N, Cin, Cout = 2, 4, 8
    D = H = W = 16
    Cmid = Cout  # DoubleConv: mid_channels defaults to out_channels

    x = jax.random.normal(k_x, (N, Cin, D, H, W), dtype=jnp.float32)
    w1 = 0.1 * jax.random.normal(k_w1, (Cmid, Cin, 3, 3, 3), dtype=jnp.float32)
    b1 = 0.1 * jax.random.normal(k_b1, (Cmid,), dtype=jnp.float32)
    w2 = 0.1 * jax.random.normal(k_w2, (Cout, Cmid, 3, 3, 3), dtype=jnp.float32)
    b2 = 0.1 * jax.random.normal(k_b2, (Cout,), dtype=jnp.float32)

    out = jax.block_until_ready(down_forward(x, w1, b1, w2, b2))
    ref = reference_forward(x, w1, b1, w2, b2)

    assert out.shape == (N, Cout, D // 2, H // 2, W // 2), out.shape
    max_err = float(jnp.max(jnp.abs(out - ref)))
    assert jnp.allclose(out, ref, atol=1e-3, rtol=1e-3), max_err

    print("KERNEL_OK")
</pallas_src>

<mosaic_0001>
module attributes {stable_mosaic.version = 11 : i64} {
  func.func @_double_conv_kernel(%arg0: i32, %arg1: memref<1x4x512xf32, #tpu.memory_space<vmem>>, %arg2: memref<27x512xf32, #tpu.memory_space<vmem>>, %arg3: memref<8x216xf32, #tpu.memory_space<vmem>>, %arg4: memref<8x216xf32, #tpu.memory_space<vmem>>, %arg5: memref<1x8x512xf32, #tpu.memory_space<vmem>>, %arg6: memref<8x768xf32, #tpu.memory_space<vmem>>, %arg7: memref<216x512xf32, #tpu.memory_space<vmem>>) attributes {dimension_semantics = [#tpu.dimension_semantics<parallel>], iteration_bounds = array<i64: 2>, scalar_prefetch = 0 : i64, scratch_operands = 2 : i64, tpu.core_type = #tpu.core_type<tc>, window_params = [{transform_indices = @transform_0, window_bounds = array<i64: 1, 4, 512>}, {pipeline_mode = #tpu.pipeline_mode<synchronous>, transform_indices = @transform_1, window_bounds = array<i64: 27, 512>}, {pipeline_mode = #tpu.pipeline_mode<synchronous>, transform_indices = @transform_2, window_bounds = array<i64: 8, 216>}, {pipeline_mode = #tpu.pipeline_mode<synchronous>, transform_indices = @transform_3, window_bounds = array<i64: 8, 216>}, {transform_indices = @transform_4, window_bounds = array<i64: 1, 8, 512>}]} {
    %cst = arith.constant 0.000000e+00 : f32
    %0 = vector.broadcast %cst : f32 to vector<8x768xf32>
    %c0 = arith.constant 0 : index
    %c0_0 = arith.constant 0 : index
    %1 = vector.load %arg6[%c0, %c0_0] : memref<8x768xf32, #tpu.memory_space<vmem>>, vector<8x768xf32>
    tpu.vector_store %arg6[%c0, %c0_0], %0 {strides = array<i32>} : memref<8x768xf32, #tpu.memory_space<vmem>>, vector<8x768xf32>,
    %c0_1 = arith.constant 0 : index
    %c0_2 = arith.constant 0 : index
    %c0_3 = arith.constant 0 : index
    %2 = vector.load %arg1[%c0_1, %c0_2, %c0_3] : memref<1x4x512xf32, #tpu.memory_space<vmem>>, vector<1x4x512xf32>
    %3 = vector.shape_cast %2 : vector<1x4x512xf32> to vector<4x512xf32>
    %c0_4 = arith.constant 0 : index
    %c128 = arith.constant 128 : index
    %4 = vector.load %arg6[%c0_4, %c128] : memref<8x768xf32, #tpu.memory_space<vmem>>, vector<4x512xf32>
    tpu.vector_store %arg6[%c0_4, %c128], %3 {strides = array<i32>} : memref<8x768xf32, #tpu.memory_space<vmem>>, vector<4x512xf32>,
    %cst_5 = arith.constant 0.000000e+00 : f32
    %5 = vector.broadcast %cst_5 : f32 to vector<4x512xf32>
    %c4 = arith.constant 4 : index
    %c128_6 = arith.constant 128 : index
    %6 = vector.load %arg6[%c4, %c128_6] : memref<8x768xf32, #tpu.memory_space<vmem>>, vector<4x512xf32>
    tpu.vector_store %arg6[%c4, %c128_6], %5 {strides = array<i32>} : memref<8x768xf32, #tpu.memory_space<vmem>>, vector<4x512xf32>,
    %c0_7 = arith.constant 0 : index
    %c55 = arith.constant 55 : index
    %7 = vector.load %arg6[%c0_7, %c55] : memref<8x768xf32, #tpu.memory_space<vmem>>, vector<8x512xf32>
    %c0_8 = arith.constant 0 : index
    %c0_9 = arith.constant 0 : index
    %8 = vector.load %arg2[%c0_8, %c0_9] : memref<27x512xf32, #tpu.memory_space<vmem>>, vector<1x512xf32>
    %9 = vector.broadcast %8 : vector<1x512xf32> to vector<8x512xf32>
    %10 = arith.mulf %7, %9 : vector<8x512xf32>
    %c0_10 = arith.constant 0 : index
    %c0_11 = arith.constant 0 : index
    %11 = vector.load %arg7[%c0_10, %c0_11] : memref<216x512xf32, #tpu.memory_space<vmem>>, vector<8x512xf32>
    tpu.vector_store %arg7[%c0_10, %c0_11], %10 {strides = array<i32>} : memref<216x512xf32, #tpu.memory_space<vmem>>, vector<8x512xf32>,
    %c0_12 = arith.constant 0 : index
    %c56 = arith.constant 56 : index
    %12 = vector.load %arg6[%c0_12, %c56] : memref<8x768xf32, #tpu.memory_space<vmem>>, vector<8x512xf32>
    %c1 = arith.constant 1 : index
    %c0_13 = arith.constant 0 : index
    %13 = vector.load %arg2[%c1, %c0_13] : memref<27x512xf32, #tpu.memory_space<vmem>>, vector<1x512xf32>
    %14 = vector.broadcast %13 : vector<1x512xf32> to vector<8x512xf32>
    %15 = arith.mulf %12, %14 : vector<8x512xf32>
    %c8 = arith.constant 8 : index
    %c0_14 = arith.constant 0 : index
    %16 = vector.load %arg7[%c8, %c0_14] : memref<216x512xf32, #tpu.memory_space<vmem>>, vector<8x512xf32>
    tpu.vector_store %arg7[%c8, %c0_14], %15 {strides = array<i32>} : memref<216x512xf32, #tpu.memory_space<vmem>>, vector<8x512xf32>,
    %c0_15 = arith.constant 0 : index
    %c57 = arith.constant 57 : index
    %17 = vector.load %arg6[%c0_15, %c57] : memref<8x768xf32, #tpu.memory_space<vmem>>, vector<8x512xf32>
    %c2 = arith.constant 2 : index
    %c0_16 = arith.constant 0 : index
    %18 = vector.load %arg2[%c2, %c0_16] : memref<27x512xf32, #tpu.memory_space<vmem>>, vector<1x512xf32>
    %19 = vector.broadcast %18 : vector<1x512xf32> to vector<8x512xf32>
    %20 = arith.mulf %17, %19 : vector<8x512xf32>
    %c16 = arith.constant 16 : index
    %c0_17 = arith.constant 0 : index
    %21 = vector.load %arg7[%c16, %c0_17] : memref<216x512xf32, #tpu.memory_space<vmem>>, vector<8x512xf32>
    tpu.vector_store %arg7[%c16, %c0_17], %20 {strides = array<i32>} : memref<216x512xf32, #tpu.memory_space<vmem>>, vector<8x512xf32>,
    %c0_18 = arith.constant 0 : index
    %c63 = arith.constant 63 : index
    %22 = vector.load %arg6[%c0_18, %c63] : memref<8x768xf32, #tpu.memory_space<vmem>>, vector<8x512xf32>
    %c3 = arith.constant 3 : index
    %c0_19 = arith.constant 0 : index
    %23 = vector.load %arg2[%c3, %c0_19] : memref<27x512xf32, #tpu.memory_space<vmem>>, vector<1x512xf32>
    %24 = vector.broadcast %23 : vector<1x512xf32> to vector<8x512xf32>
    %25 = arith.mulf %22, %24 : vector<8x512xf32>
    %c24 = arith.constant 24 : index
    %c0_20 = arith.constant 0 : index
    %26 = vector.load %arg7[%c24, %c0_20] : memref<216x512xf32, #tpu.memory_space<vmem>>, vector<8x512xf32>
    tpu.vector_store %arg7[%c24, %c0_20], %25 {strides = array<i32>} : memref<216x512xf32, #tpu.memory_space<vmem>>, vector<8x512xf32>,
    %c0_21 = arith.constant 0 : index
    %c64 = arith.constant 64 : index
    %27 = vector.load %arg6[%c0_21, %c64] : memref<8x768xf32, #tpu.memory_space<vmem>>, vector<8x512xf32>
    %c4_22 = arith.constant 4 : index
    %c0_23 = arith.constant 0 : index
    %28 = vector.load %arg2[%c4_22, %c0_23] : memref<27x512xf32, #tpu.memory_space<vmem>>, vector<1x512xf32>
    %29 = vector.broadcast %28 : vector<1x512xf32> to vector<8x512xf32>
    %30 = arith.mulf %27, %29 : vector<8x512xf32>
    %c32 = arith.constant 32 : index
    %c0_24 = arith.constant 0 : index
    %31 = vector.load %arg7[%c32, %c0_24] : memref<216x512xf32, #tpu.memory_space<vmem>>, vector<8x512xf32>
    tpu.vector_store %arg7[%c32, %c0_24], %30 {strides = array<i32>} : memref<216x512xf32, #tpu.memory_space<vmem>>, vector<8x512xf32>,
    %c0_25 = arith.constant 0 : index
    %c65 = arith.constant 65 : index
    %32 = vector.load %arg6[%c0_25, %c65] : memref<8x768xf32, #tpu.memory_space<vmem>>, vector<8x512xf32>
    %c5 = arith.constant 5 : index
    %c0_26 = arith.constant 0 : index
    %33 = vector.load %arg2[%c5, %c0_26] : memref<27x512xf32, #tpu.memory_space<vmem>>, vector<1x512xf32>
    %34 = vector.broadcast %33 : vector<1x512xf32> to vector<8x512xf32>
    %35 = arith.mulf %32, %34 : vector<8x512xf32>
    %c40 = arith.constant 40 : index
    %c0_27 = arith.constant 0 : index
    %36 = vector.load %arg7[%c40, %c0_27] : memref<216x512xf32, #tpu.memory_space<vmem>>, vector<8x512xf32>
    tpu.vector_store %arg7[%c40, %c0_27], %35 {strides = array<i32>} : memref<216x512xf32, #tpu.memory_space<vmem>>, vector<8x512xf32>,
    %c0_28 = arith.constant 0 : index
    %c71 = arith.constant 71 : index
    %37 = vector.load %arg6[%c0_28, %c71] : memref<8x768xf32, #tpu.memory_space<vmem>>, vector<8x512xf32>
    %c6 = arith.constant 6 : index
    %c0_29 = arith.constant 0 : index
    %38 = vector.load %arg2[%c6, %c0_29] : memref<27x512xf32, #tpu.memory_space<vmem>>, vector<1x512xf32>
    %39 = vector.broadcast %38 : vector<1x512xf32> to vector<8x512xf32>
    %40 = arith.mulf %37, %39 : vector<8x512xf32>
    %c48 = arith.constant 48 : index
    %c0_30 = arith.constant 0 : index
    %41 = vector.load %arg7[%c48, %c0_30] : memref<216x512xf32, #tpu.memory_space<vmem>>, vector<8x512xf32>
    tpu.vector_store %arg7[%c48, %c0_30], %40 {strides = array<i32>} : memref<216x512xf32, #tpu.memory_space<vmem>>, vector<8x512xf32>,
    %c0_31 = arith.constant 0 : index
    %c72 = arith.constant 72 : index
    %42 = vector.load %arg6[%c0_31, %c72] : memref<8x768xf32, #tpu.memory_space<vmem>>, vector<8x512xf32>
    %c7 = arith.constant 7 : index
    %c0_32 = arith.constant 0 : index
    %43 = vector.load %arg2[%c7, %c0_32] : memref<27x512xf32, #tpu.memory_space<vmem>>, vector<1x512xf32>
    %44 = vector.broadcast %43 : vector<1x512xf32> to vector<8x512xf32>
    %45 = arith.mulf %42, %44 : vector<8x512xf32>
    %c56_33 = arith.constant 56 : index
    %c0_34 = arith.constant 0 : index
    %46 = vector.load %arg7[%c56_33, %c0_34] : memref<216x512xf32, #tpu.memory_space<vmem>>, vector<8x512xf32>
    tpu.vector_store %arg7[%c56_33, %c0_34], %45 {strides = array<i32>} : memref<216x512xf32, #tpu.memory_space<vmem>>, vector<8x512xf32>,
    %c0_35 = arith.constant 0 : index
    %c73 = arith.constant 73 : index
    %47 = vector.load %arg6[%c0_35, %c73] : memref<8x768xf32, #tpu.memory_space<vmem>>, vector<8x512xf32>
    %c8_36 = arith.constant 8 : index
    %c0_37 = arith.constant 0 : index
    %48 = vector.load %arg2[%c8_36, %c0_37] : memref<27x512xf32, #tpu.memory_space<vmem>>, vector<1x512xf32>
    %49 = vector.broadcast %48 : vector<1x512xf32> to vector<8x512xf32>
    %50 = arith.mulf %47, %49 : vector<8x512xf32>
    %c64_38 = arith.constant 64 : index
    %c0_39 = arith.constant 0 : index
    %51 = vector.load %arg7[%c64_38, %c0_39] : memref<216x512xf32, #tpu.memory_space<vmem>>, vector<8x512xf32>
    tpu.vector_store %arg7[%c64_38, %c0_39], %50 {strides = array<i32>} : memref<216x512xf32, #tpu.memory_space<vmem>>, vector<8x512xf32>,
    %c0_40 = arith.constant 0 : index
    %c119 = arith.constant 119 : index
    %52 = vector.load %arg6[%c0_40, %c119] : memref<8x768xf32, #tpu.memory_space<vmem>>, vector<8x512xf32>
    %c9 = arith.constant 9 : index
    %c0_41 = arith.constant 0 : index
    %53 = vector.load %arg2[%c9, %c0_41] : memref<27x512xf32, #tpu.memory_space<vmem>>, vector<1x512xf32>
    %54 = vector.broadcast %53 : vector<1x512xf32> to vector<8x512xf32>
    %55 = arith.mulf %52, %54 : vector<8x512xf32>
    %c72_42 = arith.constant 72 : index
    %c0_43 = arith.constant 0 : index
    %56 = vector.load %arg7[%c72_42, %c0_43] : memref<216x512xf32, #tpu.memory_space<vmem>>, vector<8x512xf32>
    tpu.vector_store %arg7[%c72_42, %c0_43], %55 {strides = array<i32>} : memref<216x512xf32, #tpu.memory_space<vmem>>, vector<8x512xf32>,
    %c0_44 = arith.constant 0 : index
    %c120 = arith.constant 120 : index
    %57 = vector.load %arg6[%c0_44, %c120] : memref<8x768xf32, #tpu.memory_space<vmem>>, vector<8x512xf32>
    %c10 = arith.constant 10 : index
    %c0_45 = arith.constant 0 : index
    %58 = vector.load %arg2[%c10, %c0_45] : memref<27x512xf32, #tpu.memory_space<vmem>>, vector<1x512xf32>
    %59 = vector.broadcast %58 : vector<1x512xf32> to vector<8x512xf32>
    %60 = arith.mulf %57, %59 : vector<8x512xf32>
    %c80 = arith.constant 80 : index
    %c0_46 = arith.constant 0 : index
    %61 = vector.load %arg7[%c80, %c0_46] : memref<216x512xf32, #tpu.memory_space<vmem>>, vector<8x512xf32>
    tpu.vector_store %arg7[%c80, %c0_46], %60 {strides = array<i32>} : memref<216x512xf32, #tpu.memory_space<vmem>>, vector<8x512xf32>,
    %c0_47 = arith.constant 0 : index
    %c121 = arith.constant 121 : index
    %62 = vector.load %arg6[%c0_47, %c121] : memref<8x768xf32, #tpu.memory_space<vmem>>, vector<8x512xf32>
    %c11 = arith.constant 11 : index
    %c0_48 = arith.constant 0 : index
    %63 = vector.load %arg2[%c11, %c0_48] : memref<27x512xf32, #tpu.memory_space<vmem>>, vector<1x512xf32>
    %64 = vector.broadcast %63 : vector<1x512xf32> to vector<8x512xf32>
    %65 = arith.mulf %62, %64 : vector<8x512xf32>
    %c88 = arith.constant 88 : index
    %c0_49 = arith.constant 0 : index
    %66 = vector.load %arg7[%c88, %c0_49] : memref<216x512xf32, #tpu.memory_space<vmem>>, vector<8x512xf32>
    tpu.vector_store %arg7[%c88, %c0_49], %65 {strides = array<i32>} : memref<216x512xf32, #tpu.memory_space<vmem>>, vector<8x512xf32>,
    %c0_50 = arith.constant 0 : index
    %c127 = arith.constant 127 : index
    %67 = vector.load %arg6[%c0_50, %c127] : memref<8x768xf32, #tpu.memory_space<vmem>>, vector<8x512xf32>
    %c12 = arith.constant 12 : index
    %c0_51 = arith.constant 0 : index
    %68 = vector.load %arg2[%c12, %c0_51] : memref<27x512xf32, #tpu.memory_space<vmem>>, vector<1x512xf32>
    %69 = vector.broadcast %68 : vector<1x512xf32> to vector<8x512xf32>
    %70 = arith.mulf %67, %69 : vector<8x512xf32>
    %c96 = arith.constant 96 : index
    %c0_52 = arith.constant 0 : index
    %71 = vector.load %arg7[%c96, %c0_52] : memref<216x512xf32, #tpu.memory_space<vmem>>, vector<8x512xf32>
    tpu.vector_store %arg7[%c96, %c0_52], %70 {strides = array<i32>} : memref<216x512xf32, #tpu.memory_space<vmem>>, vector<8x512xf32>,
    %c0_53 = arith.constant 0 : index
    %c128_54 = arith.constant 128 : index
    %72 = vector.load %arg6[%c0_53, %c128_54] : memref<8x768xf32, #tpu.memory_space<vmem>>, vector<8x512xf32>
    %c104 = arith.constant 104 : index
    %c0_55 = arith.constant 0 : index
    %73 = vector.load %arg7[%c104, %c0_55] : memref<216x512xf32, #tpu.memory_space<vmem>>, vector<8x512xf32>
    tpu.vector_store %arg7[%c104, %c0_55], %72 {strides = array<i32>} : memref<216x512xf32, #tpu.memory_space<vmem>>, vector<8x512xf32>,
    %c0_56 = arith.constant 0 : index
    %c129 = arith.constant 129 : index
    %74 = vector.load %arg6[%c0_56, %c129] : memref<8x768xf32, #tpu.memory_space<vmem>>, vector<8x512xf32>
    %c14 = arith.constant 14 : index
    %c0_57 = arith.constant 0 : index
    %75 = vector.load %arg2[%c14, %c0_57] : memref<27x512xf32, #tpu.memory_space<vmem>>, vector<1x512xf32>
    %76 = vector.broadcast %75 : vector<1x512xf32> to vector<8x512xf32>
    %77 = arith.mulf %74, %76 : vector<8x512xf32>
    %c112 = arith.constant 112 : index
    %c0_58 = arith.constant 0 : index
    %78 = vector.load %arg7[%c112, %c0_58] : memref<216x512xf32, #tpu.memory_space<vmem>>, vector<8x512xf32>
    tpu.vector_store %arg7[%c112, %c0_58], %77 {strides = array<i32>} : memref<216x512xf32, #tpu.memory_space<vmem>>, vector<8x512xf32>,
    %c0_59 = arith.constant 0 : index
    %c135 = arith.constant 135 : index
    %79 = vector.load %arg6[%c0_59, %c135] : memref<8x768xf32, #tpu.memory_space<vmem>>, vector<8x512xf32>
    %c15 = arith.constant 15 : index
    %c0_60 = arith.constant 0 : index
    %80 = vector.load %arg2[%c15, %c0_60] : memref<27x512xf32, #tpu.memory_space<vmem>>, vector<1x512xf32>
    %81 = vector.broadcast %80 : vector<1x512xf32> to vector<8x512xf32>
    %82 = arith.mulf %79, %81 : vector<8x512xf32>
    %c120_61 = arith.constant 120 : index
    %c0_62 = arith.constant 0 : index
    %83 = vector.load %arg7[%c120_61, %c0_62] : memref<216x512xf32, #tpu.memory_space<vmem>>, vector<8x512xf32>
    tpu.vector_store %arg7[%c120_61, %c0_62], %82 {strides = array<i32>} : memref<216x512xf32, #tpu.memory_space<vmem>>, vector<8x512xf32>,
    %c0_63 = arith.constant 0 : index
    %c136 = arith.constant 136 : index
    %84 = vector.load %arg6[%c0_63, %c136] : memref<8x768xf32, #tpu.memory_space<vmem>>, vector<8x512xf32>
    %c16_64 = arith.constant 16 : index
    %c0_65 = arith.constant 0 : index
    %85 = vector.load %arg2[%c16_64, %c0_65] : memref<27x512xf32, #tpu.memory_space<vmem>>, vector<1x512xf32>
    %86 = vector.broadcast %85 : vector<1x512xf32> to vector<8x512xf32>
    %87 = arith.mulf %84, %86 : vector<8x512xf32>
    %c128_66 = arith.constant 128 : index
    %c0_67 = arith.constant 0 : index
    %88 = vector.load %arg7[%c128_66, %c0_67] : memref<216x512xf32, #tpu.memory_space<vmem>>, vector<8x512xf32>
    tpu.vector_store %arg7[%c128_66, %c0_67], %87 {strides = array<i32>} : memref<216x512xf32, #tpu.memory_space<vmem>>, vector<8x512xf32>,
    %c0_68 = arith.constant 0 : index
    %c137 = arith.constant 137 : index
    %89 = vector.load %arg6[%c0_68, %c137] : memref<8x768xf32, #tpu.memory_space<vmem>>, vector<8x512xf32>
    %c17 = arith.constant 17 : index
    %c0_69 = arith.constant 0 : index
    %90 = vector.load %arg2[%c17, %c0_69] : memref<27x512xf32, #tpu.memory_space<vmem>>, vector<1x512xf32>
    %91 = vector.broadcast %90 : vector<1x512xf32> to vector<8x512xf32>
    %92 = arith.mulf %89, %91 : vector<8x512xf32>
    %c136_70 = arith.constant 136 : index
    %c0_71 = arith.constant 0 : index
    %93 = vector.load %arg7[%c136_70, %c0_71] : memref<216x512xf32, #tpu.memory_space<vmem>>, vector<8x512xf32>
    tpu.vector_store %arg7[%c136_70, %c0_71], %92 {strides = array<i32>} : memref<216x512xf32, #tpu.memory_space<vmem>>, vector<8x512xf32>,
    %c0_72 = arith.constant 0 : index
    %c183 = arith.constant 183 : index
    %94 = vector.load %arg6[%c0_72, %c183] : memref<8x768xf32, #tpu.memory_space<vmem>>, vector<8x512xf32>
    %c18 = arith.constant 18 : index
    %c0_73 = arith.constant 0 : index
    %95 = vector.load %arg2[%c18, %c0_73] : memref<27x512xf32, #tpu.memory_space<vmem>>, vector<1x512xf32>
    %96 = vector.broadcast %95 : vector<1x512xf32> to vector<8x512xf32>
    %97 = arith.mulf %94, %96 : vector<8x512xf32>
    %c144 = arith.constant 144 : index
    %c0_74 = arith.constant 0 : index
    %98 = vector.load %arg7[%c144, %c0_74] : memref<216x512xf32, #tpu.memory_space<vmem>>, vector<8x512xf32>
    tpu.vector_store %arg7[%c144, %c0_74], %97 {strides = array<i32>} : memref<216x512xf32, #tpu.memory_space<vmem>>, vector<8x512xf32>,
    %c0_75 = arith.constant 0 : index
    %c184 = arith.constant 184 : index
    %99 = vector.load %arg6[%c0_75, %c184] : memref<8x768xf32, #tpu.memory_space<vmem>>, vector<8x512xf32>
    %c19 = arith.constant 19 : index
    %c0_76 = arith.constant 0 : index
    %100 = vector.load %arg2[%c19, %c0_76] : memref<27x512xf32, #tpu.memory_space<vmem>>, vector<1x512xf32>
    %101 = vector.broadcast %100 : vector<1x512xf32> to vector<8x512xf32>
    %102 = arith.mulf %99, %101 : vector<8x512xf32>
    %c152 = arith.constant 152 : index
    %c0_77 = arith.constant 0 : index
    %103 = vector.load %arg7[%c152, %c0_77] : memref<216x512xf32, #tpu.memory_space<vmem>>, vector<8x512xf32>
    tpu.vector_store %arg7[%c152, %c0_77], %102 {strides = array<i32>} : memref<216x512xf32, #tpu.memory_space<vmem>>, vector<8x512xf32>,
    %c0_78 = arith.constant 0 : index
    %c185 = arith.constant 185 : index
    %104 = vector.load %arg6[%c0_78, %c185] : memref<8x768xf32, #tpu.memory_space<vmem>>, vector<8x512xf32>
    %c20 = arith.constant 20 : index
    %c0_79 = arith.constant 0 : index
    %105 = vector.load %arg2[%c20, %c0_79] : memref<27x512xf32, #tpu.memory_space<vmem>>, vector<1x512xf32>
    %106 = vector.broadcast %105 : vector<1x512xf32> to vector<8x512xf32>
    %107 = arith.mulf %104, %106 : vector<8x512xf32>
    %c160 = arith.constant 160 : index
    %c0_80 = arith.constant 0 : index
    %108 = vector.load %arg7[%c160, %c0_80] : memref<216x512xf32, #tpu.memory_space<vmem>>, vector<8x512xf32>
    tpu.vector_store %arg7[%c160, %c0_80], %107 {strides = array<i32>} : memref<216x512xf32, #tpu.memory_space<vmem>>, vector<8x512xf32>,
    %c0_81 = arith.constant 0 : index
    %c191 = arith.constant 191 : index
    %109 = vector.load %arg6[%c0_81, %c191] : memref<8x768xf32, #tpu.memory_space<vmem>>, vector<8x512xf32>
    %c21 = arith.constant 21 : index
    %c0_82 = arith.constant 0 : index
    %110 = vector.load %arg2[%c21, %c0_82] : memref<27x512xf32, #tpu.memory_space<vmem>>, vector<1x512xf32>
    %111 = vector.broadcast %110 : vector<1x512xf32> to vector<8x512xf32>
    %112 = arith.mulf %109, %111 : vector<8x512xf32>
    %c168 = arith.constant 168 : index
    %c0_83 = arith.constant 0 : index
    %113 = vector.load %arg7[%c168, %c0_83] : memref<216x512xf32, #tpu.memory_space<vmem>>, vector<8x512xf32>
    tpu.vector_store %arg7[%c168, %c0_83], %112 {strides = array<i32>} : memref<216x512xf32, #tpu.memory_space<vmem>>, vector<8x512xf32>,
    %c0_84 = arith.constant 0 : index
    %c192 = arith.constant 192 : index
    %114 = vector.load %arg6[%c0_84, %c192] : memref<8x768xf32, #tpu.memory_space<vmem>>, vector<8x512xf32>
    %c22 = arith.constant 22 : index
    %c0_85 = arith.constant 0 : index
    %115 = vector.load %arg2[%c22, %c0_85] : memref<27x512xf32, #tpu.memory_space<vmem>>, vector<1x512xf32>
    %116 = vector.broadcast %115 : vector<1x512xf32> to vector<8x512xf32>
    %117 = arith.mulf %114, %116 : vector<8x512xf32>
    %c176 = arith.constant 176 : index
    %c0_86 = arith.constant 0 : index
    %118 = vector.load %arg7[%c176, %c0_86] : memref<216x512xf32, #tpu.memory_space<vmem>>, vector<8x512xf32>
    tpu.vector_store %arg7[%c176, %c0_86], %117 {strides = array<i32>} : memref<216x512xf32, #tpu.memory_space<vmem>>, vector<8x512xf32>,
    %c0_87 = arith.constant 0 : index
    %c193 = arith.constant 193 : index
    %119 = vector.load %arg6[%c0_87, %c193] : memref<8x768xf32, #tpu.memory_space<vmem>>, vector<8x512xf32>
    %c23 = arith.constant 23 : index
    %c0_88 = arith.constant 0 : index
    %120 = vector.load %arg2[%c23, %c0_88] : memref<27x512xf32, #tpu.memory_space<vmem>>, vector<1x512xf32>
    %121 = vector.broadcast %120 : vector<1x512xf32> to vector<8x512xf32>
    %122 = arith.mulf %119, %121 : vector<8x512xf32>
    %c184_89 = arith.constant 184 : index
    %c0_90 = arith.constant 0 : index
    %123 = vector.load %arg7[%c184_89, %c0_90] : memref<216x512xf32, #tpu.memory_space<vmem>>, vector<8x512xf32>
    tpu.vector_store %arg7[%c184_89, %c0_90], %122 {strides = array<i32>} : memref<216x512xf32, #tpu.memory_space<vmem>>, vector<8x512xf32>,
    %c0_91 = arith.constant 0 : index
    %c199 = arith.constant 199 : index
    %124 = vector.load %arg6[%c0_91, %c199] : memref<8x768xf32, #tpu.memory_space<vmem>>, vector<8x512xf32>
    %c24_92 = arith.constant 24 : index
    %c0_93 = arith.constant 0 : index
    %125 = vector.load %arg2[%c24_92, %c0_93] : memref<27x512xf32, #tpu.memory_space<vmem>>, vector<1x512xf32>
    %126 = vector.broadcast %125 : vector<1x512xf32> to vector<8x512xf32>
    %127 = arith.mulf %124, %126 : vector<8x512xf32>
    %c192_94 = arith.constant 192 : index
    %c0_95 = arith.constant 0 : index
    %128 = vector.load %arg7[%c192_94, %c0_95] : memref<216x512xf32, #tpu.memory_space<vmem>>, vector<8x512xf32>
    tpu.vector_store %arg7[%c192_94, %c0_95], %127 {strides = array<i32>} : memref<216x512xf32, #tpu.memory_space<vmem>>, vector<8x512xf32>,
    %c0_96 = arith.constant 0 : index
    %c200 = arith.constant 200 : index
    %129 = vector.load %arg6[%c0_96, %c200] : memref<8x768xf32, #tpu.memory_space<vmem>>, vector<8x512xf32>
    %c25 = arith.constant 25 : index
    %c0_97 = arith.constant 0 : index
    %130 = vector.load %arg2[%c25, %c0_97] : memref<27x512xf32, #tpu.memory_space<vmem>>, vector<1x512xf32>
    %131 = vector.broadcast %130 : vector<1x512xf32> to vector<8x512xf32>
    %132 = arith.mulf %129, %131 : vector<8x512xf32>
    %c200_98 = arith.constant 200 : index
    %c0_99 = arith.constant 0 : index
    %133 = vector.load %arg7[%c200_98, %c0_99] : memref<216x512xf32, #tpu.memory_space<vmem>>, vector<8x512xf32>
    tpu.vector_store %arg7[%c200_98, %c0_99], %132 {strides = array<i32>} : memref<216x512xf32, #tpu.memory_space<vmem>>, vector<8x512xf32>,
    %c0_100 = arith.constant 0 : index
    %c201 = arith.constant 201 : index
    %134 = vector.load %arg6[%c0_100, %c201] : memref<8x768xf32, #tpu.memory_space<vmem>>, vector<8x512xf32>
    %c26 = arith.constant 26 : index
    %c0_101 = arith.constant 0 : index
    %135 = vector.load %arg2[%c26, %c0_101] : memref<27x512xf32, #tpu.memory_space<vmem>>, vector<1x512xf32>
    %136 = vector.broadcast %135 : vector<1x512xf32> to vector<8x512xf32>
    %137 = arith.mulf %134, %136 : vector<8x512xf32>
    %c208 = arith.constant 208 : index
    %c0_102 = arith.constant 0 : index
    %138 = vector.load %arg7[%c208, %c0_102] : memref<216x512xf32, #tpu.memory_space<vmem>>, vector<8x512xf32>
    tpu.vector_store %arg7[%c208, %c0_102], %137 {strides = array<i32>} : memref<216x512xf32, #tpu.memory_space<vmem>>, vector<8x512xf32>,
    %c0_103 = arith.constant 0 : index
    %c0_104 = arith.constant 0 : index
    %139 = vector.load %arg3[%c0_103, %c0_104] : memref<8x216xf32, #tpu.memory_space<vmem>>, vector<8x216xf32>
    %c0_105 = arith.constant 0 : index
    %c0_106 = arith.constant 0 : index
    %140 = vector.load %arg7[%c0_105, %c0_106] : memref<216x512xf32, #tpu.memory_space<vmem>>, vector<216x512xf32>
    %cst_107 = arith.constant dense<0.000000e+00> : vector<8x512xf32>
    %141 = tpu.matmul %139, %140, %cst_107 {dimension_numbers = #tpu.dot_dimension_numbers<[1], [0], [0], [1], [0, 0, 1, 1], [], []>} : vector<8x216xf32>, vector<216x512xf32>, vector<8x512xf32> -> vector<8x512xf32>
    %cst_108 = arith.constant dense<0.000000e+00> : vector<8xf32>
    %142 = vector.multi_reduction <add>, %141, %cst_108 [1] : vector<8x512xf32> to vector<8xf32>
    %143 = vector.shape_cast %142 : vector<8xf32> to vector<8x1xf32>
    %cst_109 = arith.constant 5.120000e+02 : f32
    %144 = vector.broadcast %cst_109 : f32 to vector<8x1xf32>
    %145 = arith.divf %143, %144 : vector<8x1xf32>
    %146 = vector.broadcast %145 : vector<8x1xf32> to vector<8x512xf32>
    %147 = arith.subf %141, %146 : vector<8x512xf32>
    %148 = arith.mulf %147, %147 : vector<8x512xf32>
    %cst_110 = arith.constant dense<0.000000e+00> : vector<8xf32>
    %149 = vector.multi_reduction <add>, %148, %cst_110 [1] : vector<8x512xf32> to vector<8xf32>
    %150 = vector.shape_cast %149 : vector<8xf32> to vector<8x1xf32>
    %cst_111 = arith.constant 5.120000e+02 : f32
    %151 = vector.broadcast %cst_111 : f32 to vector<8x1xf32>
    %152 = arith.divf %150, %151 : vector<8x1xf32>
    %cst_112 = arith.constant 9.99999974E-6 : f32
    %153 = vector.broadcast %cst_112 : f32 to vector<8x1xf32>
    %154 = arith.addf %152, %153 : vector<8x1xf32>
    %155 = math.rsqrt %154 : vector<8x1xf32>
    %156 = vector.broadcast %155 : vector<8x1xf32> to vector<8x512xf32>
    %157 = arith.mulf %147, %156 : vector<8x512xf32>
    %cst_113 = arith.constant 0.000000e+00 : f32
    %158 = vector.broadcast %cst_113 : f32 to vector<8x512xf32>
    %159 = arith.cmpf oge, %157, %158 : vector<8x512xf32>
    %cst_114 = arith.constant 0.00999999977 : f32
    %160 = vector.broadcast %cst_114 : f32 to vector<8x512xf32>
    %161 = arith.mulf %160, %157 : vector<8x512xf32>
    %162 = arith.select %159, %157, %161 : vector<8x512xi1>, vector<8x512xf32>
    %c0_115 = arith.constant 0 : index
    %c128_116 = arith.constant 128 : index
    %163 = vector.load %arg6[%c0_115, %c128_116] : memref<8x768xf32, #tpu.memory_space<vmem>>, vector<8x512xf32>
    tpu.vector_store %arg6[%c0_115, %c128_116], %162 {strides = array<i32>} : memref<8x768xf32, #tpu.memory_space<vmem>>, vector<8x512xf32>,
    %c0_117 = arith.constant 0 : index
    %c55_118 = arith.constant 55 : index
    %164 = vector.load %arg6[%c0_117, %c55_118] : memref<8x768xf32, #tpu.memory_space<vmem>>, vector<8x512xf32>
    %c0_119 = arith.constant 0 : index
    %c0_120 = arith.constant 0 : index
    %165 = vector.load %arg2[%c0_119, %c0_120] : memref<27x512xf32, #tpu.memory_space<vmem>>, vector<1x512xf32>
    %166 = vector.broadcast %165 : vector<1x512xf32> to vector<8x512xf32>
    %167 = arith.mulf %164, %166 : vector<8x512xf32>
    %c0_121 = arith.constant 0 : index
    %c0_122 = arith.constant 0 : index
    %168 = vector.load %arg7[%c0_121, %c0_122] : memref<216x512xf32, #tpu.memory_space<vmem>>, vector<8x512xf32>
    tpu.vector_store %arg7[%c0_121, %c0_122], %167 {strides = array<i32>} : memref<216x512xf32, #tpu.memory_space<vmem>>, vector<8x512xf32>,
    %c0_123 = arith.constant 0 : index
    %c56_124 = arith.constant 56 : index
    %169 = vector.load %arg6[%c0_123, %c56_124] : memref<8x768xf32, #tpu.memory_space<vmem>>, vector<8x512xf32>
    %c1_125 = arith.constant 1 : index
    %c0_126 = arith.constant 0 : index
    %170 = vector.load %arg2[%c1_125, %c0_126] : memref<27x512xf32, #tpu.memory_space<vmem>>, vector<1x512xf32>
    %171 = vector.broadcast %170 : vector<1x512xf32> to vector<8x512xf32>
    %172 = arith.mulf %169, %171 : vector<8x512xf32>
    %c8_127 = arith.constant 8 : index
    %c0_128 = arith.constant 0 : index
    %173 = vector.load %arg7[%c8_127, %c0_128] : memref<216x512xf32, #tpu.memory_space<vmem>>, vector<8x512xf32>
    tpu.vector_store %arg7[%c8_127, %c0_128], %172 {strides = array<i32>} : memref<216x512xf32, #tpu.memory_space<vmem>>, vector<8x512xf32>,
    %c0_129 = arith.constant 0 : index
    %c57_130 = arith.constant 57 : index
    %174 = vector.load %arg6[%c0_129, %c57_130] : memref<8x768xf32, #tpu.memory_space<vmem>>, vector<8x512xf32>
    %c2_131 = arith.constant 2 : index
    %c0_132 = arith.constant 0 : index
    %175 = vector.load %arg2[%c2_131, %c0_132] : memref<27x512xf32, #tpu.memory_space<vmem>>, vector<1x512xf32>
    %176 = vector.broadcast %175 : vector<1x512xf32> to vector<8x512xf32>
    %177 = arith.mulf %174, %176 : vector<8x512xf32>
    %c16_133 = arith.constant 16 : index
    %c0_134 = arith.constant 0 : index
    %178 = vector.load %arg7[%c16_133, %c0_134] : memref<216x512xf32, #tpu.memory_space<vmem>>, vector<8x512xf32>
    tpu.vector_store %arg7[%c16_133, %c0_134], %177 {strides = array<i32>} : memref<216x512xf32, #tpu.memory_space<vmem>>, vector<8x512xf32>,
    %c0_135 = arith.constant 0 : index
    %c63_136 = arith.constant 63 : index
    %179 = vector.load %arg6[%c0_135, %c63_136] : memref<8x768xf32, #tpu.memory_space<vmem>>, vector<8x512xf32>
    %c3_137 = arith.constant 3 : index
    %c0_138 = arith.constant 0 : index
    %180 = vector.load %arg2[%c3_137, %c0_138] : memref<27x512xf32, #tpu.memory_space<vmem>>, vector<1x512xf32>
    %181 = vector.broadcast %180 : vector<1x512xf32> to vector<8x512xf32>
    %182 = arith.mulf %179, %181 : vector<8x512xf32>
    %c24_139 = arith.constant 24 : index
    %c0_140 = arith.constant 0 : index
    %183 = vector.load %arg7[%c24_139, %c0_140] : memref<216x512xf32, #tpu.memory_space<vmem>>, vector<8x512xf32>
    tpu.vector_store %arg7[%c24_139, %c0_140], %182 {strides = array<i32>} : memref<216x512xf32, #tpu.memory_space<vmem>>, vector<8x512xf32>,
    %c0_141 = arith.constant 0 : index
    %c64_142 = arith.constant 64 : index
    %184 = vector.load %arg6[%c0_141, %c64_142] : memref<8x768xf32, #tpu.memory_space<vmem>>, vector<8x512xf32>
    %c4_143 = arith.constant 4 : index
    %c0_144 = arith.constant 0 : index
    %185 = vector.load %arg2[%c4_143, %c0_144] : memref<27x512xf32, #tpu.memory_space<vmem>>, vector<1x512xf32>
    %186 = vector.broadcast %185 : vector<1x512xf32> to vector<8x512xf32>
    %187 = arith.mulf %184, %186 : vector<8x512xf32>
    %c32_145 = arith.constant 32 : index
    %c0_146 = arith.constant 0 : index
    %188 = vector.load %arg7[%c32_145, %c0_146] : memref<216x512xf32, #tpu.memory_space<vmem>>, vector<8x512xf32>
    tpu.vector_store %arg7[%c32_145, %c0_146], %187 {strides = array<i32>} : memref<216x512xf32, #tpu.memory_space<vmem>>, vector<8x512xf32>,
    %c0_147 = arith.constant 0 : index
    %c65_148 = arith.constant 65 : index
    %189 = vector.load %arg6[%c0_147, %c65_148] : memref<8x768xf32, #tpu.memory_space<vmem>>, vector<8x512xf32>
    %c5_149 = arith.constant 5 : index
    %c0_150 = arith.constant 0 : index
    %190 = vector.load %arg2[%c5_149, %c0_150] : memref<27x512xf32, #tpu.memory_space<vmem>>, vector<1x512xf32>
    %191 = vector.broadcast %190 : vector<1x512xf32> to vector<8x512xf32>
    %192 = arith.mulf %189, %191 : vector<8x512xf32>
    %c40_151 = arith.constant 40 : index
    %c0_152 = arith.constant 0 : index
    %193 = vector.load %arg7[%c40_151, %c0_152] : memref<216x512xf32, #tpu.memory_space<vmem>>, vector<8x512xf32>
    tpu.vector_store %arg7[%c40_151, %c0_152], %192 {strides = array<i32>} : memref<216x512xf32, #tpu.memory_space<vmem>>, vector<8x512xf32>,
    %c0_153 = arith.constant 0 : index
    %c71_154 = arith.constant 71 : index
    %194 = vector.load %arg6[%c0_153, %c71_154] : memref<8x768xf32, #tpu.memory_space<vmem>>, vector<8x512xf32>
    %c6_155 = arith.constant 6 : index
    %c0_156 = arith.constant 0 : index
    %195 = vector.load %arg2[%c6_155, %c0_156] : memref<27x512xf32, #tpu.memory_space<vmem>>, vector<1x512xf32>
    %196 = vector.broadcast %195 : vector<1x512xf32> to vector<8x512xf32>
    %197 = arith.mulf %194, %196 : vector<8x512xf32>
    %c48_157 = arith.constant 48 : index
    %c0_158 = arith.constant 0 : index
    %198 = vector.load %arg7[%c48_157, %c0_158] : memref<216x512xf32, #tpu.memory_space<vmem>>, vector<8x512xf32>
    tpu.vector_store %arg7[%c48_157, %c0_158], %197 {strides = array<i32>} : memref<216x512xf32, #tpu.memory_space<vmem>>, vector<8x512xf32>,
    %c0_159 = arith.constant 0 : index
    %c72_160 = arith.constant 72 : index
    %199 = vector.load %arg6[%c0_159, %c72_160] : memref<8x768xf32, #tpu.memory_space<vmem>>, vector<8x512xf32>
    %c7_161 = arith.constant 7 : index
    %c0_162 = arith.constant 0 : index
    %200 = vector.load %arg2[%c7_161, %c0_162] : memref<27x512xf32, #tpu.memory_space<vmem>>, vector<1x512xf32>
    %201 = vector.broadcast %200 : vector<1x512xf32> to vector<8x512xf32>
    %202 = arith.mulf %199, %201 : vector<8x512xf32>
    %c56_163 = arith.constant 56 : index
    %c0_164 = arith.constant 0 : index
    %203 = vector.load %arg7[%c56_163, %c0_164] : memref<216x512xf32, #tpu.memory_space<vmem>>, vector<8x512xf32>
    tpu.vector_store %arg7[%c56_163, %c0_164], %202 {strides = array<i32>} : memref<216x512xf32, #tpu.memory_space<vmem>>, vector<8x512xf32>,
    %c0_165 = arith.constant 0 : index
    %c73_166 = arith.constant 73 : index
    %204 = vector.load %arg6[%c0_165, %c73_166] : memref<8x768xf32, #tpu.memory_space<vmem>>, vector<8x512xf32>
    %c8_167 = arith.constant 8 : index
    %c0_168 = arith.constant 0 : index
    %205 = vector.load %arg2[%c8_167, %c0_168] : memref<27x512xf32, #tpu.memory_space<vmem>>, vector<1x512xf32>
    %206 = vector.broadcast %205 : vector<1x512xf32> to vector<8x512xf32>
    %207 = arith.mulf %204, %206 : vector<8x512xf32>
    %c64_169 = arith.constant 64 : index
    %c0_170 = arith.constant 0 : index
    %208 = vector.load %arg7[%c64_169, %c0_170] : memref<216x512xf32, #tpu.memory_space<vmem>>, vector<8x512xf32>
    tpu.vector_store %arg7[%c64_169, %c0_170], %207 {strides = array<i32>} : memref<216x512xf32, #tpu.memory_space<vmem>>, vector<8x512xf32>,
    %c0_171 = arith.constant 0 : index
    %c119_172 = arith.constant 119 : index
    %209 = vector.load %arg6[%c0_171, %c119_172] : memref<8x768xf32, #tpu.memory_space<vmem>>, vector<8x512xf32>
    %c9_173 = arith.constant 9 : index
    %c0_174 = arith.constant 0 : index
    %210 = vector.load %arg2[%c9_173, %c0_174] : memref<27x512xf32, #tpu.memory_space<vmem>>, vector<1x512xf32>
    %211 = vector.broadcast %210 : vector<1x512xf32> to vector<8x512xf32>
    %212 = arith.mulf %209, %211 : vector<8x512xf32>
    %c72_175 = arith.constant 72 : index
    %c0_176 = arith.constant 0 : index
    %213 = vector.load %arg7[%c72_175, %c0_176] : memref<216x512xf32, #tpu.memory_space<vmem>>, vector<8x512xf32>
    tpu.vector_store %arg7[%c72_175, %c0_176], %212 {strides = array<i32>} : memref<216x512xf32, #tpu.memory_space<vmem>>, vector<8x512xf32>,
    %c0_177 = arith.constant 0 : index
    %c120_178 = arith.constant 120 : index
    %214 = vector.load %arg6[%c0_177, %c120_178] : memref<8x768xf32, #tpu.memory_space<vmem>>, vector<8x512xf32>
    %c10_179 = arith.constant 10 : index
    %c0_180 = arith.constant 0 : index
    %215 = vector.load %arg2[%c10_179, %c0_180] : memref<27x512xf32, #tpu.memory_space<vmem>>, vector<1x512xf32>
    %216 = vector.broadcast %215 : vector<1x512xf32> to vector<8x512xf32>
    %217 = arith.mulf %214, %216 : vector<8x512xf32>
    %c80_181 = arith.constant 80 : index
    %c0_182 = arith.constant 0 : index
    %218 = vector.load %arg7[%c80_181, %c0_182] : memref<216x512xf32, #tpu.memory_space<vmem>>, vector<8x512xf32>
    tpu.vector_store %arg7[%c80_181, %c0_182], %217 {strides = array<i32>} : memref<216x512xf32, #tpu.memory_space<vmem>>, vector<8x512xf32>,
    %c0_183 = arith.constant 0 : index
    %c121_184 = arith.constant 121 : index
    %219 = vector.load %arg6[%c0_183, %c121_184] : memref<8x768xf32, #tpu.memory_space<vmem>>, vector<8x512xf32>
    %c11_185 = arith.constant 11 : index
    %c0_186 = arith.constant 0 : index
    %220 = vector.load %arg2[%c11_185, %c0_186] : memref<27x512xf32, #tpu.memory_space<vmem>>, vector<1x512xf32>
    %221 = vector.broadcast %220 : vector<1x512xf32> to vector<8x512xf32>
    %222 = arith.mulf %219, %221 : vector<8x512xf32>
    %c88_187 = arith.constant 88 : index
    %c0_188 = arith.constant 0 : index
    %223 = vector.load %arg7[%c88_187, %c0_188] : memref<216x512xf32, #tpu.memory_space<vmem>>, vector<8x512xf32>
    tpu.vector_store %arg7[%c88_187, %c0_188], %222 {strides = array<i32>} : memref<216x512xf32, #tpu.memory_space<vmem>>, vector<8x512xf32>,
    %c0_189 = arith.constant 0 : index
    %c127_190 = arith.constant 127 : index
    %224 = vector.load %arg6[%c0_189, %c127_190] : memref<8x768xf32, #tpu.memory_space<vmem>>, vector<8x512xf32>
    %c12_191 = arith.constant 12 : index
    %c0_192 = arith.constant 0 : index
    %225 = vector.load %arg2[%c12_191, %c0_192] : memref<27x512xf32, #tpu.memory_space<vmem>>, vector<1x512xf32>
    %226 = vector.broadcast %225 : vector<1x512xf32> to vector<8x512xf32>
    %227 = arith.mulf %224, %226 : vector<8x512xf32>
    %c96_193 = arith.constant 96 : index
    %c0_194 = arith.constant 0 : index
    %228 = vector.load %arg7[%c96_193, %c0_194] : memref<216x512xf32, #tpu.memory_space<vmem>>, vector<8x512xf32>
    tpu.vector_store %arg7[%c96_193, %c0_194], %227 {strides = array<i32>} : memref<216x512xf32, #tpu.memory_space<vmem>>, vector<8x512xf32>,
    %c0_195 = arith.constant 0 : index
    %c128_196 = arith.constant 128 : index
    %229 = vector.load %arg6[%c0_195, %c128_196] : memref<8x768xf32, #tpu.memory_space<vmem>>, vector<8x512xf32>
    %c104_197 = arith.constant 104 : index
    %c0_198 = arith.constant 0 : index
    %230 = vector.load %arg7[%c104_197, %c0_198] : memref<216x512xf32, #tpu.memory_space<vmem>>, vector<8x512xf32>
    tpu.vector_store %arg7[%c104_197, %c0_198], %229 {strides = array<i32>} : memref<216x512xf32, #tpu.memory_space<vmem>>, vector<8x512xf32>,
    %c0_199 = arith.constant 0 : index
    %c129_200 = arith.constant 129 : index
    %231 = vector.load %arg6[%c0_199, %c129_200] : memref<8x768xf32, #tpu.memory_space<vmem>>, vector<8x512xf32>
    %c14_201 = arith.constant 14 : index
    %c0_202 = arith.constant 0 : index
    %232 = vector.load %arg2[%c14_201, %c0_202] : memref<27x512xf32, #tpu.memory_space<vmem>>, vector<1x512xf32>
    %233 = vector.broadcast %232 : vector<1x512xf32> to vector<8x512xf32>
    %234 = arith.mulf %231, %233 : vector<8x512xf32>
    %c112_203 = arith.constant 112 : index
    %c0_204 = arith.constant 0 : index
    %235 = vector.load %arg7[%c112_203, %c0_204] : memref<216x512xf32, #tpu.memory_space<vmem>>, vector<8x512xf32>
    tpu.vector_store %arg7[%c112_203, %c0_204], %234 {strides = array<i32>} : memref<216x512xf32, #tpu.memory_space<vmem>>, vector<8x512xf32>,
    %c0_205 = arith.constant 0 : index
    %c135_206 = arith.constant 135 : index
    %236 = vector.load %arg6[%c0_205, %c135_206] : memref<8x768xf32, #tpu.memory_space<vmem>>, vector<8x512xf32>
    %c15_207 = arith.constant 15 : index
    %c0_208 = arith.constant 0 : index
    %237 = vector.load %arg2[%c15_207, %c0_208] : memref<27x512xf32, #tpu.memory_space<vmem>>, vector<1x512xf32>
    %238 = vector.broadcast %237 : vector<1x512xf32> to vector<8x512xf32>
    %239 = arith.mulf %236, %238 : vector<8x512xf32>
    %c120_209 = arith.constant 120 : index
    %c0_210 = arith.constant 0 : index
    %240 = vector.load %arg7[%c120_209, %c0_210] : memref<216x512xf32, #tpu.memory_space<vmem>>, vector<8x512xf32>
    tpu.vector_store %arg7[%c120_209, %c0_210], %239 {strides = array<i32>} : memref<216x512xf32, #tpu.memory_space<vmem>>, vector<8x512xf32>,
    %c0_211 = arith.constant 0 : index
    %c136_212 = arith.constant 136 : index
    %241 = vector.load %arg6[%c0_211, %c136_212] : memref<8x768xf32, #tpu.memory_space<vmem>>, vector<8x512xf32>
    %c16_213 = arith.constant 16 : index
    %c0_214 = arith.constant 0 : index
    %242 = vector.load %arg2[%c16_213, %c0_214] : memref<27x512xf32, #tpu.memory_space<vmem>>, vector<1x512xf32>
    %243 = vector.broadcast %242 : vector<1x512xf32> to vector<8x512xf32>
    %244 = arith.mulf %241, %243 : vector<8x512xf32>
    %c128_215 = arith.constant 128 : index
    %c0_216 = arith.constant 0 : index
    %245 = vector.load %arg7[%c128_215, %c0_216] : memref<216x512xf32, #tpu.memory_space<vmem>>, vector<8x512xf32>
    tpu.vector_store %arg7[%c128_215, %c0_216], %244 {strides = array<i32>} : memref<216x512xf32, #tpu.memory_space<vmem>>, vector<8x512xf32>,
    %c0_217 = arith.constant 0 : index
    %c137_218 = arith.constant 137 : index
    %246 = vector.load %arg6[%c0_217, %c137_218] : memref<8x768xf32, #tpu.memory_space<vmem>>, vector<8x512xf32>
    %c17_219 = arith.constant 17 : index
    %c0_220 = arith.constant 0 : index
    %247 = vector.load %arg2[%c17_219, %c0_220] : memref<27x512xf32, #tpu.memory_space<vmem>>, vector<1x512xf32>
    %248 = vector.broadcast %247 : vector<1x512xf32> to vector<8x512xf32>
    %249 = arith.mulf %246, %248 : vector<8x512xf32>
    %c136_221 = arith.constant 136 : index
    %c0_222 = arith.constant 0 : index
    %250 = vector.load %arg7[%c136_221, %c0_222] : memref<216x512xf32, #tpu.memory_space<vmem>>, vector<8x512xf32>
    tpu.vector_store %arg7[%c136_221, %c0_222], %249 {strides = array<i32>} : memref<216x512xf32, #tpu.memory_space<vmem>>, vector<8x512xf32>,
    %c0_223 = arith.constant 0 : index
    %c183_224 = arith.constant 183 : index
    %251 = vector.load %arg6[%c0_223, %c183_224] : memref<8x768xf32, #tpu.memory_space<vmem>>, vector<8x512xf32>
    %c18_225 = arith.constant 18 : index
    %c0_226 = arith.constant 0 : index
    %252 = vector.load %arg2[%c18_225, %c0_226] : memref<27x512xf32, #tpu.memory_space<vmem>>, vector<1x512xf32>
    %253 = vector.broadcast %252 : vector<1x512xf32> to vector<8x512xf32>
    %254 = arith.mulf %251, %253 : vector<8x512xf32>
    %c144_227 = arith.constant 144 : index
    %c0_228 = arith.constant 0 : index
    %255 = vector.load %arg7[%c144_227, %c0_228] : memref<216x512xf32, #tpu.memory_space<vmem>>, vector<8x512xf32>
    tpu.vector_store %arg7[%c144_227, %c0_228], %254 {strides = array<i32>} : memref<216x512xf32, #tpu.memory_space<vmem>>, vector<8x512xf32>,
    %c0_229 = arith.constant 0 : index
    %c184_230 = arith.constant 184 : index
    %256 = vector.load %arg6[%c0_229, %c184_230] : memref<8x768xf32, #tpu.memory_space<vmem>>, vector<8x512xf32>
    %c19_231 = arith.constant 19 : index
    %c0_232 = arith.constant 0 : index
    %257 = vector.load %arg2[%c19_231, %c0_232] : memref<27x512xf32, #tpu.memory_space<vmem>>, vector<1x512xf32>
    %258 = vector.broadcast %257 : vector<1x512xf32> to vector<8x512xf32>
    %259 = arith.mulf %256, %258 : vector<8x512xf32>
    %c152_233 = arith.constant 152 : index
    %c0_234 = arith.constant 0 : index
    %260 = vector.load %arg7[%c152_233, %c0_234] : memref<216x512xf32, #tpu.memory_space<vmem>>, vector<8x512xf32>
    tpu.vector_store %arg7[%c152_233, %c0_234], %259 {strides = array<i32>} : memref<216x512xf32, #tpu.memory_space<vmem>>, vector<8x512xf32>,
    %c0_235 = arith.constant 0 : index
    %c185_236 = arith.constant 185 : index
    %261 = vector.load %arg6[%c0_235, %c185_236] : memref<8x768xf32, #tpu.memory_space<vmem>>, vector<8x512xf32>
    %c20_237 = arith.constant 20 : index
    %c0_238 = arith.constant 0 : index
    %262 = vector.load %arg2[%c20_237, %c0_238] : memref<27x512xf32, #tpu.memory_space<vmem>>, vector<1x512xf32>
    %263 = vector.broadcast %262 : vector<1x512xf32> to vector<8x512xf32>
    %264 = arith.mulf %261, %263 : vector<8x512xf32>
    %c160_239 = arith.constant 160 : index
    %c0_240 = arith.constant 0 : index
    %265 = vector.load %arg7[%c160_239, %c0_240] : memref<216x512xf32, #tpu.memory_space<vmem>>, vector<8x512xf32>
    tpu.vector_store %arg7[%c160_239, %c0_240], %264 {strides = array<i32>} : memref<216x512xf32, #tpu.memory_space<vmem>>, vector<8x512xf32>,
    %c0_241 = arith.constant 0 : index
    %c191_242 = arith.constant 191 : index
    %266 = vector.load %arg6[%c0_241, %c191_242] : memref<8x768xf32, #tpu.memory_space<vmem>>, vector<8x512xf32>
    %c21_243 = arith.constant 21 : index
    %c0_244 = arith.constant 0 : index
    %267 = vector.load %arg2[%c21_243, %c0_244] : memref<27x512xf32, #tpu.memory_space<vmem>>, vector<1x512xf32>
    %268 = vector.broadcast %267 : vector<1x512xf32> to vector<8x512xf32>
    %269 = arith.mulf %266, %268 : vector<8x512xf32>
    %c168_245 = arith.constant 168 : index
    %c0_246 = arith.constant 0 : index
    %270 = vector.load %arg7[%c168_245, %c0_246] : memref<216x512xf32, #tpu.memory_space<vmem>>, vector<8x512xf32>
    tpu.vector_store %arg7[%c168_245, %c0_246], %269 {strides = array<i32>} : memref<216x512xf32, #tpu.memory_space<vmem>>, vector<8x512xf32>,
    %c0_247 = arith.constant 0 : index
    %c192_248 = arith.constant 192 : index
    %271 = vector.load %arg6[%c0_247, %c192_248] : memref<8x768xf32, #tpu.memory_space<vmem>>, vector<8x512xf32>
    %c22_249 = arith.constant 22 : index
    %c0_250 = arith.constant 0 : index
    %272 = vector.load %arg2[%c22_249, %c0_250] : memref<27x512xf32, #tpu.memory_space<vmem>>, vector<1x512xf32>
    %273 = vector.broadcast %272 : vector<1x512xf32> to vector<8x512xf32>
    %274 = arith.mulf %271, %273 : vector<8x512xf32>
    %c176_251 = arith.constant 176 : index
    %c0_252 = arith.constant 0 : index
    %275 = vector.load %arg7[%c176_251, %c0_252] : memref<216x512xf32, #tpu.memory_space<vmem>>, vector<8x512xf32>
    tpu.vector_store %arg7[%c176_251, %c0_252], %274 {strides = array<i32>} : memref<216x512xf32, #tpu.memory_space<vmem>>, vector<8x512xf32>,
    %c0_253 = arith.constant 0 : index
    %c193_254 = arith.constant 193 : index
    %276 = vector.load %arg6[%c0_253, %c193_254] : memref<8x768xf32, #tpu.memory_space<vmem>>, vector<8x512xf32>
    %c23_255 = arith.constant 23 : index
    %c0_256 = arith.constant 0 : index
    %277 = vector.load %arg2[%c23_255, %c0_256] : memref<27x512xf32, #tpu.memory_space<vmem>>, vector<1x512xf32>
    %278 = vector.broadcast %277 : vector<1x512xf32> to vector<8x512xf32>
    %279 = arith.mulf %276, %278 : vector<8x512xf32>
    %c184_257 = arith.constant 184 : index
    %c0_258 = arith.constant 0 : index
    %280 = vector.load %arg7[%c184_257, %c0_258] : memref<216x512xf32, #tpu.memory_space<vmem>>, vector<8x512xf32>
    tpu.vector_store %arg7[%c184_257, %c0_258], %279 {strides = array<i32>} : memref<216x512xf32, #tpu.memory_space<vmem>>, vector<8x512xf32>,
    %c0_259 = arith.constant 0 : index
    %c199_260 = arith.constant 199 : index
    %281 = vector.load %arg6[%c0_259, %c199_260] : memref<8x768xf32, #tpu.memory_space<vmem>>, vector<8x512xf32>
    %c24_261 = arith.constant 24 : index
    %c0_262 = arith.constant 0 : index
    %282 = vector.load %arg2[%c24_261, %c0_262] : memref<27x512xf32, #tpu.memory_space<vmem>>, vector<1x512xf32>
    %283 = vector.broadcast %282 : vector<1x512xf32> to vector<8x512xf32>
    %284 = arith.mulf %281, %283 : vector<8x512xf32>
    %c192_263 = arith.constant 192 : index
    %c0_264 = arith.constant 0 : index
    %285 = vector.load %arg7[%c192_263, %c0_264] : memref<216x512xf32, #tpu.memory_space<vmem>>, vector<8x512xf32>
    tpu.vector_store %arg7[%c192_263, %c0_264], %284 {strides = array<i32>} : memref<216x512xf32, #tpu.memory_space<vmem>>, vector<8x512xf32>,
    %c0_265 = arith.constant 0 : index
    %c200_266 = arith.constant 200 : index
    %286 = vector.load %arg6[%c0_265, %c200_266] : memref<8x768xf32, #tpu.memory_space<vmem>>, vector<8x512xf32>
    %c25_267 = arith.constant 25 : index
    %c0_268 = arith.constant 0 : index
    %287 = vector.load %arg2[%c25_267, %c0_268] : memref<27x512xf32, #tpu.memory_space<vmem>>, vector<1x512xf32>
    %288 = vector.broadcast %287 : vector<1x512xf32> to vector<8x512xf32>
    %289 = arith.mulf %286, %288 : vector<8x512xf32>
    %c200_269 = arith.constant 200 : index
    %c0_270 = arith.constant 0 : index
    %290 = vector.load %arg7[%c200_269, %c0_270] : memref<216x512xf32, #tpu.memory_space<vmem>>, vector<8x512xf32>
    tpu.vector_store %arg7[%c200_269, %c0_270], %289 {strides = array<i32>} : memref<216x512xf32, #tpu.memory_space<vmem>>, vector<8x512xf32>,
    %c0_271 = arith.constant 0 : index
    %c201_272 = arith.constant 201 : index
    %291 = vector.load %arg6[%c0_271, %c201_272] : memref<8x768xf32, #tpu.memory_space<vmem>>, vector<8x512xf32>
    %c26_273 = arith.constant 26 : index
    %c0_274 = arith.constant 0 : index
    %292 = vector.load %arg2[%c26_273, %c0_274] : memref<27x512xf32, #tpu.memory_space<vmem>>, vector<1x512xf32>
    %293 = vector.broadcast %292 : vector<1x512xf32> to vector<8x512xf32>
    %294 = arith.mulf %291, %293 : vector<8x512xf32>
    %c208_275 = arith.constant 208 : index
    %c0_276 = arith.constant 0 : index
    %295 = vector.load %arg7[%c208_275, %c0_276] : memref<216x512xf32, #tpu.memory_space<vmem>>, vector<8x512xf32>
    tpu.vector_store %arg7[%c208_275, %c0_276], %294 {strides = array<i32>} : memref<216x512xf32, #tpu.memory_space<vmem>>, vector<8x512xf32>,
    %c0_277 = arith.constant 0 : index
    %c0_278 = arith.constant 0 : index
    %296 = vector.load %arg4[%c0_277, %c0_278] : memref<8x216xf32, #tpu.memory_space<vmem>>, vector<8x216xf32>
    %c0_279 = arith.constant 0 : index
    %c0_280 = arith.constant 0 : index
    %297 = vector.load %arg7[%c0_279, %c0_280] : memref<216x512xf32, #tpu.memory_space<vmem>>, vector<216x512xf32>
    %cst_281 = arith.constant dense<0.000000e+00> : vector<8x512xf32>
    %298 = tpu.matmul %296, %297, %cst_281 {dimension_numbers = #tpu.dot_dimension_numbers<[1], [0], [0], [1], [0, 0, 1, 1], [], []>} : vector<8x216xf32>, vector<216x512xf32>, vector<8x512xf32> -> vector<8x512xf32>
    %cst_282 = arith.constant dense<0.000000e+00> : vector<8xf32>
    %299 = vector.multi_reduction <add>, %298, %cst_282 [1] : vector<8x512xf32> to vector<8xf32>
    %300 = vector.shape_cast %299 : vector<8xf32> to vector<8x1xf32>
    %cst_283 = arith.constant 5.120000e+02 : f32
    %301 = vector.broadcast %cst_283 : f32 to vector<8x1xf32>
    %302 = arith.divf %300, %301 : vector<8x1xf32>
    %303 = vector.broadcast %302 : vector<8x1xf32> to vector<8x512xf32>
    %304 = arith.subf %298, %303 : vector<8x512xf32>
    %305 = arith.mulf %304, %304 : vector<8x512xf32>
    %cst_284 = arith.constant dense<0.000000e+00> : vector<8xf32>
    %306 = vector.multi_reduction <add>, %305, %cst_284 [1] : vector<8x512xf32> to vector<8xf32>
    %307 = vector.shape_cast %306 : vector<8xf32> to vector<8x1xf32>
    %cst_285 = arith.constant 5.120000e+02 : f32
    %308 = vector.broadcast %cst_285 : f32 to vector<8x1xf32>
    %309 = arith.divf %307, %308 : vector<8x1xf32>
    %cst_286 = arith.constant 9.99999974E-6 : f32
    %310 = vector.broadcast %cst_286 : f32 to vector<8x1xf32>
    %311 = arith.addf %309, %310 : vector<8x1xf32>
    %312 = math.rsqrt %311 : vector<8x1xf32>
    %313 = vector.broadcast %312 : vector<8x1xf32> to vector<8x512xf32>
    %314 = arith.mulf %304, %313 : vector<8x512xf32>
    %cst_287 = arith.constant 0.000000e+00 : f32
    %315 = vector.broadcast %cst_287 : f32 to vector<8x512xf32>
    %316 = arith.cmpf oge, %314, %315 : vector<8x512xf32>
    %cst_288 = arith.constant 0.00999999977 : f32
    %317 = vector.broadcast %cst_288 : f32 to vector<8x512xf32>
    %318 = arith.mulf %317, %314 : vector<8x512xf32>
    %319 = arith.select %316, %314, %318 : vector<8x512xi1>, vector<8x512xf32>
    %c0_289 = arith.constant 0 : index
    %c0_290 = arith.constant 0 : index
    %c0_291 = arith.constant 0 : index
    %320 = vector.load %arg5[%c0_289, %c0_290, %c0_291] : memref<1x8x512xf32, #tpu.memory_space<vmem>>, vector<1x8x512xf32>
    %321 = vector.shape_cast %320 : vector<1x8x512xf32> to vector<8x512xf32>
    %322 = vector.shape_cast %319 : vector<8x512xf32> to vector<1x8x512xf32>
    tpu.vector_store %arg5[%c0_289, %c0_290, %c0_291], %322 {strides = array<i32>} : memref<1x8x512xf32, #tpu.memory_space<vmem>>, vector<1x8x512xf32>,
    return
  }
  func.func @transform_0(%arg0: i32) -> (i32, i32, i32) {
    %c0_i32 = arith.constant 0 : i32
    %c0_i32_0 = arith.constant 0 : i32
    %c0_i32_1 = arith.constant 0 : i32
    return %arg0, %c0_i32, %c0_i32_0 : i32, i32, i32
  }
  func.func @transform_1(%arg0: i32) -> (i32, i32) {
    %c0_i32 = arith.constant 0 : i32
    %c0_i32_0 = arith.constant 0 : i32
    %c0_i32_1 = arith.constant 0 : i32
    return %c0_i32, %c0_i32_0 : i32, i32
  }
  func.func @transform_2(%arg0: i32) -> (i32, i32) {
    %c0_i32 = arith.constant 0 : i32
    %c0_i32_0 = arith.constant 0 : i32
    %c0_i32_1 = arith.constant 0 : i32
    return %c0_i32, %c0_i32_0 : i32, i32
  }
  func.func @transform_3(%arg0: i32) -> (i32, i32) {
    %c0_i32 = arith.constant 0 : i32
    %c0_i32_0 = arith.constant 0 : i32
    %c0_i32_1 = arith.constant 0 : i32
    return %c0_i32, %c0_i32_0 : i32, i32
  }
  func.func @transform_4(%arg0: i32) -> (i32, i32, i32) {
    %c0_i32 = arith.constant 0 : i32
    %c0_i32_0 = arith.constant 0 : i32
    %c0_i32_1 = arith.constant 0 : i32
    return %arg0, %c0_i32, %c0_i32_0 : i32, i32, i32
  }
}

</mosaic_0001>

<bundles_post_ra>
// kernel: down_forward.1
= control target key start
LH: loop header
LB: loop body
LE: loop exit
PB: predicated region body
PF: predicated region fallthrough
CT: control target
= control target key end

     0   :  { %s4775_s15 = smov 0   ;;  %s7375_s0 = inlined_call_operand.vmem [shape: f32[2,4,512], index: 0, kind: input, shape index: {}]   ;;  %s7376_s1 = inlined_call_operand.vmem [shape: f32[27,512], index: 1, kind: input, shape index: {}]   ;;  %s7377_s2 = inlined_call_operand.vmem [shape: f32[8,216], index: 2, kind: input, shape index: {}]   ;;  %s7378_s3 = inlined_call_operand.vmem [shape: f32[8,216], index: 3, kind: input, shape index: {}]   ;;  %s7379_s4 = inlined_call_operand.vmem [shape: f32[2,8,512], index: 4, kind: output, shape index: {}]  }
   0x1 LB: > { %s4621_s16 = sadd.s32 4294967295, %s4730_s15   ;;  %p4625_p0 = scmp.ge.s32.totalorder %s4730_s15, 1  ;;  %s4730_s15 = sphi %s4775_s15, %s14_s15  }
   0x2   : > { %p162_p1 = scmp.lt.s32.totalorder %s4730_s15, 3 }
   0x4   : > { %p163_p2 = pnand %p4625_p0, %p162_p1 }
   0x6   : > { %166 = sbr.rel (%p163_p2) target bundleno = 1984 (0x7c0), region = 36 }
   0xb   : > { %v227_v0 = vlaneseq  ;;  %v4732_v1 = vmov 0.0   ;;  %v4643_v3 = vld [vmem:[%s7376_s1 + $0x27] ss:$8 sm:$0xf]  ;;  %s4733_s21 = smov 7   ;;  %p188_p3 = scmp.lt.s32.totalorder %s4621_s16, 1 }
   0xc   : > { %199 = vst [vmem:[#allocation2 + $0x10] sm:$0xff] %v4732_v1  ;;  %198 = vst [vmem:[#allocation2 + $0x28] sm:$0xff] %v4732_v1  ;;  %v4642_v7 = vld [vmem:[%s7376_s1 + $0x26] ss:$8 sm:$0xf]  ;;  %s4734_s22 = smov 1  }
   0xd   : > { %200 = vst [vmem:[#allocation2 + $0x8] sm:$0xff] %v4732_v1  ;;  %201 = vst [vmem:[#allocation2] sm:$0xff] %v4732_v1  ;;  %v228_v2 = vshrl.u32 %v227_v0, 7  ;;  %v4641_v15 = vld [vmem:[%s7376_s1 + $0x24] ss:$8 sm:$0xf] }
   0xe   : > { %202 = vst [vmem:[#allocation2 + $0x18] sm:$0xff] %v4732_v1  ;;  %216 = vst [vmem:[#allocation2 + $0x10] sm:$0xf0] %v4732_v1  ;;  %s7558_s16 = smov (!%p188_p3, %s4621_s16), 1  ;;  %s4735_s29 = smov 127   ;;  %vm1085_vm0 = vcmask 56320  }
   0xf   : > { %217 = vst [vmem:[#allocation2 + $0x8] sm:$0xf0] %v4732_v1  ;;  %218 = vst [vmem:[#allocation2] sm:$0xf0] %v4732_v1  ;;  %v4786_v4 = vsub.s32 2, %v228_v2  ;;  %v4788_v5 = vsub.s32 0, %v228_v2 }
  0x10   : > { %219 = vst [vmem:[#allocation2 + $0x18] sm:$0xf0] %v4732_v1  ;;  %v4790_v6 = vsub.s32 1, %v228_v2  ;;  %v4807_v14 = vsub.s32 3, %v228_v2  ;;  %s4686_s25 = sshll.u32 %s7558_s16, 4  ;;  %s4736_s6 = smov 121  }
  0x11   : > { %7433 = vst [vmem:[#allocation4_spill] sm:$0xff] %v4786_v4  ;;  %7434 = vst [vmem:[#allocation5_spill] sm:$0xff] %v4788_v5  ;;  %v1271_v8 = vrot.slane %v4643_v3, %v4786_v4  ;;  %v1263_v9 = vrot.slane %v4643_v3, %v4788_v5  ;;  %v1191_v11 = vrot.slane %v4642_v7, %v4788_v5  ;;  %s192_s28 = scalar_lea.vmem %s7375_s0, %s4686_s25  ;;  %v4640_v22 = vld [vmem:[%s7376_s1 + $0x23] ss:$8 sm:$0xf]  ;;  %s4737_s9 = smov 120  }
  0x12   : > { %7435 = vst [vmem:[#allocation6_spill] sm:$0xff] %v4790_v6  ;;  %v1267_v10 = vrot.slane %v4643_v3, %v4790_v6  ;;  %v1195_v12 = vrot.slane %v4642_v7, %v4790_v6  ;;  %v1199_v13 = vrot.slane %v4642_v7, %v4786_v4  ;;  %7436 = vst [vmem:[#allocation7_spill] sm:$0xff] %v4807_v14  ;;  %v204_v18 = vld [vmem:[%s192_s28] sm:$0xff]  ;;  %v205_v19 = vld [vmem:[%s192_s28 + $0x8] sm:$0xff]  ;;  %s4738_s12 = smov 119   ;;  %s4739_s17 = smov 73  }
  0x13   : > { %1280 = vrot.lane.b32.xlu1 %v1271_v8, %s4733_s21  ;;  %1276 = vrot.lane.b32.xlu0 %v1263_v9, %s4733_s21  ;;  %v1275_v16 = vrot.slane %v4643_v3, %v4807_v14  ;;  %v1109_v17 = vrot.slane %v4641_v15, %v4788_v5  ;;  %212 = vst [vmem:[#allocation2 + $0x10] sm:$0xf] %v204_v18  ;;  %214 = vst [vmem:[#allocation2] sm:$0xf] %v205_v19  ;;  %s4740_s20 = smov 72   ;;  %s4741_s25 = smov 71  }
  0x14   : > { %v1113_v20 = vrot.slane %v4641_v15, %v4790_v6  ;;  %v1117_v21 = vrot.slane %v4641_v15, %v4786_v4  ;;  %v208_v23 = vcombine.high %v204_v18, %v204_v18  ;;  %v209_v24 = vcombine.high %v205_v19, %v205_v19  ;;  %v4639_v29 = vld [vmem:[%s7376_s1 + $0x22] ss:$8 sm:$0xf]  ;;  %v4638_v34 = vld [vmem:[%s7376_s1 + $0x21] ss:$8 sm:$0xf] }
  0x15   : > { %v1203_v25 = vrot.slane %v4642_v7, %v4807_v14  ;;  %v1035_v26 = vrot.slane %v4640_v22, %v4788_v5  ;;  %v1039_v27 = vrot.slane %v4640_v22, %v4790_v6  ;;  %v1043_v28 = vrot.slane %v4640_v22, %v4786_v4  ;;  %v4637_v39 = vld [vmem:[%s7376_s1 + $0x20] ss:$8 sm:$0xf]  ;;  %v4636_v44 = vld [vmem:[%s7376_s1 + $0x7] ss:$8 sm:$0xf] }
  0x16   : > { %213 = vst [vmem:[#allocation2 + $0x8] sm:$0xf] %v208_v23  ;;  %215 = vst [vmem:[#allocation2 + $0x18] sm:$0xf] %v209_v24  ;;  %v965_v30 = vrot.slane %v4639_v29, %v4790_v6  ;;  %v961_v31 = vrot.slane %v4639_v29, %v4788_v5  ;;  %v1121_v32 = vrot.slane %v4641_v15, %v4807_v14  ;;  %s4742_s28 = smov 65   ;;  %s4743_s7 = smov 64  }
  0x17   : > { %1278 = vrot.lane.b32.xlu0 %v1267_v10, %s4733_s21  ;;  %1204 = vrot.lane.b32.xlu1 %v1191_v11, %s4734_s22  ;;  %v969_v33 = vrot.slane %v4639_v29, %v4786_v4  ;;  %v891_v35 = vrot.slane %v4638_v34, %v4790_v6  ;;  %v887_v36 = vrot.slane %v4638_v34, %v4788_v5  ;;  %v4635_v49 = vld [vmem:[%s7376_s1 + $0x6] ss:$8 sm:$0xf]  ;;  %v4634_v54 = vld [vmem:[%s7376_s1 + $0x5] ss:$8 sm:$0xf] }
  0x18   : > { %v1047_v37 = vrot.slane %v4640_v22, %v4807_v14  ;;  %v895_v38 = vrot.slane %v4638_v34, %v4786_v4  ;;  %v819_v40 = vrot.slane %v4637_v39, %v4790_v6  ;;  %v815_v41 = vrot.slane %v4637_v39, %v4788_v5  ;;  %v4633_v59 = vld [vmem:[%s7376_s1 + $0x4] ss:$8 sm:$0xf]  ;;  %v4632_v0 = vld [vmem:[%s7376_s1 + $0x3] ss:$8 sm:$0xf] }
  0x19   : > { %v973_v42 = vrot.slane %v4639_v29, %v4807_v14  ;;  %v823_v43 = vrot.slane %v4637_v39, %v4786_v4  ;;  %v747_v45 = vrot.slane %v4636_v44, %v4790_v6  ;;  %v743_v46 = vrot.slane %v4636_v44, %v4788_v5  ;;  %s4744_s11 = smov 63   ;;  %v4631_v8 = vld [vmem:[%s7376_s1 + $0x2] ss:$8 sm:$0xf]  ;;  %s4745_s18 = smov 57  }
  0x1a   : > { %v899_v47 = vrot.slane %v4638_v34, %v4807_v14  ;;  %v751_v48 = vrot.slane %v4636_v44, %v4786_v4  ;;  %v675_v50 = vrot.slane %v4635_v49, %v4790_v6  ;;  %v671_v51 = vrot.slane %v4635_v49, %v4788_v5  ;;  %s4746_s24 = smov 56   ;;  %v225_v19 = vld [vmem:[%s7376_s1] ss:$8 sm:$0xf]  ;;  %s4747_s30 = smov 55  }
  0x1b   : > { %1206 = vrot.lane.b32.xlu0 %v1195_v12, %s4734_s22  ;;  %1208 = vrot.lane.b32.xlu1 %v1199_v13, %s4734_s22  ;;  %v827_v52 = vrot.slane %v4637_v39, %v4807_v14  ;;  %v679_v53 = vrot.slane %v4635_v49, %v4786_v4  ;;  %v603_v55 = vrot.slane %v4634_v54, %v4790_v6  ;;  %v4630_v13 = vld [vmem:[%s7376_s1 + $0x1] ss:$8 sm:$0xf]  ;;  %v4654_v24 = vld [vmem:[%s7376_s1 + $0x62] ss:$8 sm:$0xf] }
  0x1c   : > { %v599_v56 = vrot.slane %v4634_v54, %v4788_v5  ;;  %v755_v57 = vrot.slane %v4636_v44, %v4807_v14  ;;  %v607_v58 = vrot.slane %v4634_v54, %v4786_v4  ;;  %v530_v60 = vrot.slane %v4633_v59, %v4790_v6  ;;  %s4748_s10 = smov 9   ;;  %s4749_s19 = smov 8  }
  0x1d   : > { %v526_v61 = vrot.slane %v4633_v59, %v4788_v5  ;;  %v683_v62 = vrot.slane %v4635_v49, %v4807_v14  ;;  %v534_v63 = vrot.slane %v4633_v59, %v4786_v4  ;;  %v456_v1 = vrot.slane %v4632_v0, %v4790_v6  ;;  %v4651_v49 = vld [vmem:[%s7376_s1 + $0x47] ss:$8 sm:$0xf] }
  0x1e   : > { %v452_v2 = vrot.slane %v4632_v0, %v4788_v5  ;;  %v611_v3 = vrot.slane %v4634_v54, %v4807_v14  ;;  %v460_v7 = vrot.slane %v4632_v0, %v4786_v4  ;;  %v382_v9 = vrot.slane %v4631_v8, %v4790_v6 }
  0x1f   : > { %1282 = vrot.lane.b32.xlu0 %v1275_v16, %s4733_s21  ;;  %1122 = vrot.lane.b32.xlu1 %v1109_v17, %s4735_s29  ;;  %v378_v10 = vrot.slane %v4631_v8, %v4788_v5  ;;  %v538_v11 = vrot.slane %v4633_v59, %v4807_v14  ;;  %v386_v12 = vrot.slane %v4631_v8, %v4786_v4  ;;  %vm1159_vm1 = vcmask 7168  }
  0x20   : > { %v308_v15 = vrot.slane %v4630_v13, %v4790_v6  ;;  %v304_v16 = vrot.slane %v4630_v13, %v4788_v5  ;;  %v464_v17 = vrot.slane %v4632_v0, %v4807_v14  ;;  %v312_v18 = vrot.slane %v4630_v13, %v4786_v4 }
  0x21   : > { %v390_v22 = vrot.slane %v4631_v8, %v4807_v14  ;;  %v238_v23 = vrot.slane %v225_v19, %v4786_v4  ;;  %v2063_v29 = vrot.slane %v4654_v24, %v4786_v4  ;;  %vm7400_vm2 = vcmask 1039360  }
  0x22   : > { %vm7399_vm3 = vcmask 990208   ;;  %vm982_vm4 = vcmask 982016   ;;  %vm908_vm5 = vcmask 973824   ;;  %vm280_vm6 = vcmask 596992  }
  0x23   : > { %1124 = vrot.lane.b32.xlu0 %v1113_v20, %s4735_s29  ;;  %1126 = vrot.lane.b32.xlu1 %v1117_v21, %s4735_s29  ;;  %v234_v20 = vrot.slane %v225_v19, %v4790_v6  ;;  %v230_v21 = vrot.slane %v225_v19, %v4788_v5  ;;  %vm354_vm7 = vcmask 588800   ;;  %vm428_vm8 = vcmask 580608  }
  0x24   : > { %vm502_vm9 = vcmask 531456   ;;  %vm547_vm10 = vcmask 523264   ;;  %vm473_vm11 = vcmask 515072   ;;  %vm399_vm12 = vcmask 465920  }
  0x25   : > { %vm325_vm13 = vcmask 457728   ;;  %vm7423_vm14 = vcmask 449536   ;;  %vm7422_vm15 = vcmask 64512  }
  0x27   : > { %1210 = vrot.lane.b32.xlu0 %v1203_v25, %s4734_s22  ;;  %1048 = vrot.lane.b32.xlu1 %v1035_v26, %s4736_s6  ;;  %v2055_v25 = vrot.slane %v4654_v24, %v4788_v5  ;;  %v316_v26 = vrot.slane %v4630_v13, %v4807_v14  ;;  %v1851_v13 = vrot.slane %v4651_v49, %v4807_v14 }
  0x2b   : > { %1050 = vrot.lane.b32.xlu0 %v1039_v27, %s4736_s6  ;;  %1052 = vrot.lane.b32.xlu1 %v1043_v28, %s4736_s6 }
  0x2f   : > { %976 = vrot.lane.b32.xlu1 %v965_v30, %s4737_s9  ;;  %974 = vrot.lane.b32.xlu0 %v961_v31, %s4737_s9  ;;  %v2059_v30 = vrot.slane %v4654_v24, %v4790_v6  ;;  %v4653_v31 = vld [vmem:[%s7376_s1 + $0x61] ss:$8 sm:$0xf] }
  0x30   : > { %v1983_v34 = vrot.slane %v4653_v31, %v4788_v5  ;;  %v1987_v39 = vrot.slane %v4653_v31, %v4790_v6 }
  0x33   : > { %1128 = vrot.lane.b32.xlu1 %v1121_v32, %s4735_s29  ;;  %978 = vrot.lane.b32.xlu0 %v969_v33, %s4737_s9 }
  0x37   : > { %902 = vrot.lane.b32.xlu1 %v891_v35, %s4738_s12  ;;  %900 = vrot.lane.b32.xlu0 %v887_v36, %s4738_s12  ;;  %v242_v35 = vrot.slane %v225_v19, %v4807_v14 }
  0x3b   : > { %1054 = vrot.lane.b32.xlu1 %v1047_v37, %s4736_s6  ;;  %904 = vrot.lane.b32.xlu0 %v895_v38, %s4738_s12  ;;  %v1991_v38 = vrot.slane %v4653_v31, %v4786_v4 }
  0x3f   : > { %830 = vrot.lane.b32.xlu1 %v819_v40, %s4739_s17  ;;  %828 = vrot.lane.b32.xlu0 %v815_v41, %s4739_s17  ;;  %v4652_v40 = vld [vmem:[%s7376_s1 + $0x60] ss:$8 sm:$0xf] }
  0x40   : > { %v1911_v44 = vrot.slane %v4652_v40, %v4788_v5 }
  0x43   : > { %980 = vrot.lane.b32.xlu1 %v973_v42, %s4737_s9  ;;  %832 = vrot.lane.b32.xlu0 %v823_v43, %s4739_s17  ;;  %v1915_v43 = vrot.slane %v4652_v40, %v4790_v6 }
  0x47   : > { %758 = vrot.lane.b32.xlu1 %v747_v45, %s4740_s20  ;;  %756 = vrot.lane.b32.xlu0 %v743_v46, %s4740_s20 }
  0x4b   : > { %906 = vrot.lane.b32.xlu1 %v899_v47, %s4738_s12  ;;  %760 = vrot.lane.b32.xlu0 %v751_v48, %s4740_s20  ;;  %v2067_v47 = vrot.slane %v4654_v24, %v4807_v14  ;;  %v1919_v48 = vrot.slane %v4652_v40, %v4786_v4 }
  0x4f   : > { %686 = vrot.lane.b32.xlu1 %v675_v50, %s4741_s25  ;;  %684 = vrot.lane.b32.xlu0 %v671_v51, %s4741_s25 }
  0x53   : > { %834 = vrot.lane.b32.xlu1 %v827_v52, %s4739_s17  ;;  %688 = vrot.lane.b32.xlu0 %v679_v53, %s4741_s25  ;;  %v1843_v52 = vrot.slane %v4651_v49, %v4790_v6  ;;  %v1839_v53 = vrot.slane %v4651_v49, %v4788_v5 }
  0x57   : > { %614 = vrot.lane.b32.xlu1 %v603_v55, %s4742_s28  ;;  %612 = vrot.lane.b32.xlu0 %v599_v56, %s4742_s28  ;;  %v1995_v56 = vrot.slane %v4653_v31, %v4807_v14 }
  0x5b   : > { %762 = vrot.lane.b32.xlu1 %v755_v57, %s4740_s20  ;;  %616 = vrot.lane.b32.xlu0 %v607_v58, %s4742_s28  ;;  %v1847_v57 = vrot.slane %v4651_v49, %v4786_v4  ;;  %v4650_v58 = vld [vmem:[%s7376_s1 + $0x46] ss:$8 sm:$0xf] }
  0x5f   : > { %541 = vrot.lane.b32.xlu1 %v530_v60, %s4743_s7  ;;  %539 = vrot.lane.b32.xlu0 %v526_v61, %s4743_s7  ;;  %v1771_v61 = vrot.slane %v4650_v58, %v4790_v6 }
  0x63   : > { %690 = vrot.lane.b32.xlu1 %v683_v62, %s4741_s25  ;;  %543 = vrot.lane.b32.xlu0 %v534_v63, %s4743_s7  ;;  %v1767_v62 = vrot.slane %v4650_v58, %v4788_v5 }
  0x67   : > { %467 = vrot.lane.b32.xlu1 %v456_v1, %s4744_s11  ;;  %465 = vrot.lane.b32.xlu0 %v452_v2, %s4744_s11  ;;  %v1923_v1 = vrot.slane %v4652_v40, %v4807_v14  ;;  %v1775_v2 = vrot.slane %v4650_v58, %v4786_v4  ;;  %v4646_v40 = vld [vmem:[%s7376_s1 + $0x42] ss:$8 sm:$0xf] }
  0x6b   : > { %618 = vrot.lane.b32.xlu1 %v611_v3, %s4742_s28  ;;  %469 = vrot.lane.b32.xlu0 %v460_v7, %s4744_s11  ;;  %v4649_v3 = vld [vmem:[%s7376_s1 + $0x45] ss:$8 sm:$0xf] }
  0x6f   : > { %393 = vrot.lane.b32.xlu1 %v382_v9, %s4745_s18  ;;  %391 = vrot.lane.b32.xlu0 %v378_v10, %s4745_s18  ;;  %v1699_v9 = vrot.slane %v4649_v3, %v4790_v6  ;;  %v1695_v10 = vrot.slane %v4649_v3, %v4788_v5 }
  0x73   : > { %545 = vrot.lane.b32.xlu1 %v538_v11, %s4743_s7  ;;  %395 = vrot.lane.b32.xlu0 %v386_v12, %s4745_s18 }
  0x77   : > { %319 = vrot.lane.b32.xlu1 %v308_v15, %s4746_s24  ;;  %317 = vrot.lane.b32.xlu0 %v304_v16, %s4746_s24  ;;  %v1703_v15 = vrot.slane %v4649_v3, %v4786_v4  ;;  %v4648_v16 = vld [vmem:[%s7376_s1 + $0x44] ss:$8 sm:$0xf] }
  0x78   : > { %v1627_v19 = vrot.slane %v4648_v16, %v4790_v6  ;;  %v1631_v24 = vrot.slane %v4648_v16, %v4786_v4 }
  0x7b   : > { %471 = vrot.lane.b32.xlu1 %v464_v17, %s4744_s11  ;;  %321 = vrot.lane.b32.xlu0 %v312_v18, %s4746_s24 }
  0x7f   : > { %245 = vrot.lane.b32.xlu1 %v234_v20, %s4747_s30  ;;  %243 = vrot.lane.b32.xlu0 %v230_v21, %s4747_s30  ;;  %v1623_v20 = vrot.slane %v4648_v16, %v4788_v5 }
  0x83   : > { %397 = vrot.lane.b32.xlu1 %v390_v22, %s4745_s18  ;;  %247 = vrot.lane.b32.xlu0 %v238_v23, %s4747_s30  ;;  %v1779_v23 = vrot.slane %v4650_v58, %v4807_v14 }
  0x85   : > { %v4967_v27 = vpop.permute.xlu1 %1280  ;;  %v4969_v28 = vpop.permute.xlu0 %1276 }
  0x87   : > { %2068 = vrot.lane.b32.xlu1 %v2055_v25, %s4739_s17  ;;  %323 = vrot.lane.b32.xlu0 %v316_v26, %s4746_s24  ;;  %v4647_v25 = vld [vmem:[%s7376_s1 + $0x43] ss:$8 sm:$0xf] }
  0x88   : > { %v1551_v31 = vrot.slane %v4647_v25, %v4788_v5 }
  0x89   : > { %v4978_v32 = vpop.permute.xlu0 %1278  ;;  %v4980_v33 = vpop.permute.xlu1 %1204 }
  0x8b   : > { %2072 = vrot.lane.b32.xlu1 %v2063_v29, %s4739_s17  ;;  %2070 = vrot.lane.b32.xlu0 %v2059_v30, %s4739_s17  ;;  %v1555_v30 = vrot.slane %v4647_v25, %v4790_v6 }
  0x8d   : > { %v4986_v36 = vpop.permute.xlu0 %1206  ;;  %v4988_v37 = vpop.permute.xlu1 %1208 }
  0x8f   : > { %1996 = vrot.lane.b32.xlu1 %v1983_v34, %s4740_s20  ;;  %249 = vrot.lane.b32.xlu0 %v242_v35, %s4747_s30 }
  0x91   : > { %v4997_v41 = vpop.permute.xlu0 %1282  ;;  %v4999_v42 = vpop.permute.xlu1 %1122 }
  0x93   : > { %2000 = vrot.lane.b32.xlu1 %v1991_v38, %s4740_s20  ;;  %1998 = vrot.lane.b32.xlu0 %v1987_v39, %s4740_s20  ;;  %v1707_v38 = vrot.slane %v4649_v3, %v4807_v14  ;;  %v1559_v39 = vrot.slane %v4647_v25, %v4786_v4 }
  0x95   : > { %v5005_v45 = vpop.permute.xlu0 %1124  ;;  %v5007_v46 = vpop.permute.xlu1 %1126 }
  0x97   : > { %1926 = vrot.lane.b32.xlu1 %v1915_v43, %s4741_s25  ;;  %1924 = vrot.lane.b32.xlu0 %v1911_v44, %s4741_s25 }
  0x99   : > { %v5016_v50 = vpop.permute.xlu0 %1210  ;;  %v5018_v51 = vpop.permute.xlu1 %1048 }
  0x9b   : > { %2074 = vrot.lane.b32.xlu1 %v2067_v47, %s4739_s17  ;;  %1928 = vrot.lane.b32.xlu0 %v1919_v48, %s4741_s25  ;;  %v1483_v47 = vrot.slane %v4646_v40, %v4790_v6  ;;  %v1479_v48 = vrot.slane %v4646_v40, %v4788_v5 }
  0x9d   : > { %v5024_v54 = vpop.permute.xlu0 %1050  ;;  %v5026_v55 = vpop.permute.xlu1 %1052 }
  0x9f   : > { %1854 = vrot.lane.b32.xlu1 %v1843_v52, %s4742_s28  ;;  %1852 = vrot.lane.b32.xlu0 %v1839_v53, %s4742_s28  ;;  %v1635_v53 = vrot.slane %v4648_v16, %v4807_v14 }
  0xa1   : > { %v5035_v59 = vpop.permute.xlu1 %976  ;;  %v5037_v60 = vpop.permute.xlu0 %974 }
  0xa3   : > { %2002 = vrot.lane.b32.xlu1 %v1995_v56, %s4740_s20  ;;  %1856 = vrot.lane.b32.xlu0 %v1847_v57, %s4742_s28  ;;  %v1487_v56 = vrot.slane %v4646_v40, %v4786_v4  ;;  %v4645_v57 = vld [vmem:[%s7376_s1 + $0x41] ss:$8 sm:$0xf] }
  0xa5   : > { %v5043_v63 = vpop.permute.xlu1 %1128  ;;  %v5045_v0 = vpop.permute.xlu0 %978 }
  0xa7   : > { %1782 = vrot.lane.b32.xlu1 %v1771_v61, %s4743_s7  ;;  %1780 = vrot.lane.b32.xlu0 %v1767_v62, %s4743_s7  ;;  %v1411_v62 = vrot.slane %v4645_v57, %v4790_v6 }
  0xa9   : > { %v5054_v7 = vpop.permute.xlu1 %902  ;;  %v5056_v8 = vpop.permute.xlu0 %900 }
  0xab   : > { %1930 = vrot.lane.b32.xlu1 %v1923_v1, %s4741_s25  ;;  %1784 = vrot.lane.b32.xlu0 %v1775_v2, %s4743_s7  ;;  %v1407_v1 = vrot.slane %v4645_v57, %v4788_v5 }
  0xad   : > { %v5062_v11 = vpop.permute.xlu1 %1054  ;;  %v5064_v12 = vpop.permute.xlu0 %904 }
  0xaf   : > { %1710 = vrot.lane.b32.xlu1 %v1699_v9, %s4744_s11  ;;  %1708 = vrot.lane.b32.xlu0 %v1695_v10, %s4744_s11  ;;  %v1563_v9 = vrot.slane %v4647_v25, %v4807_v14  ;;  %v1415_v10 = vrot.slane %v4645_v57, %v4786_v4  ;;  %v1491_v25 = vrot.slane %v4646_v40, %v4807_v14  ;;  %v5177_v40 = vld [vmem:[#allocation2 + $0x8] sm:$0xff] }
  0xb1   : > { %v5073_v17 = vpop.permute.xlu1 %830  ;;  %v5075_v18 = vpop.permute.xlu0 %828 }
  0xb3   : > { %1858 = vrot.lane.b32.xlu1 %v1851_v13, %s4742_s28  ;;  %1712 = vrot.lane.b32.xlu0 %v1703_v15, %s4744_s11  ;;  %v4644_v13 = vld [vmem:[%s7376_s1 + $0x40] ss:$8 sm:$0xf] }
  0xb5   : > { %v5081_v21 = vpop.permute.xlu1 %980  ;;  %v5083_v22 = vpop.permute.xlu0 %832 }
  0xb7   : > { %1638 = vrot.lane.b32.xlu1 %v1627_v19, %s4745_s18  ;;  %1636 = vrot.lane.b32.xlu0 %v1623_v20, %s4745_s18  ;;  %v1339_v19 = vrot.slane %v4644_v13, %v4790_v6  ;;  %v1335_v20 = vrot.slane %v4644_v13, %v4788_v5  ;;  %v1133_v5 = vsel %vm7400_vm2, %v5007_v46, %v5043_v63 }
  0xb8   : > { %v910_v6 = vsel %vm908_vm5, %v5054_v7, %v5064_v12 }
  0xb9   : > { %v5092_v26 = vpop.permute.xlu1 %758  ;;  %v5094_v29 = vpop.permute.xlu0 %756 }
  0xbb   : > { %1786 = vrot.lane.b32.xlu1 %v1779_v23, %s4743_s7  ;;  %1640 = vrot.lane.b32.xlu0 %v1631_v24, %s4745_s18 }
  0xbd   : > { %v5100_v34 = vpop.permute.xlu1 %906  ;;  %v5102_v35 = vpop.permute.xlu0 %760 }
  0xbf   : > { %1566 = vrot.lane.b32.xlu1 %v1555_v30, %s4746_s24  ;;  %1564 = vrot.lane.b32.xlu0 %v1551_v31, %s4746_s24  ;;  %v1343_v30 = vrot.slane %v4644_v13, %v4786_v4  ;;  %v983_v4 = vsel %vm982_vm4, %v5037_v60, %v5035_v59 }
  0xc1   : > { %v5111_v43 = vpop.permute.xlu1 %686  ;;  %v5113_v44 = vpop.permute.xlu0 %684 }
  0xc3   : > { %1714 = vrot.lane.b32.xlu1 %v1707_v38, %s4744_s11  ;;  %1568 = vrot.lane.b32.xlu0 %v1559_v39, %s4746_s24  ;;  %v1347_v39 = vrot.slane %v4644_v13, %v4807_v14 }
  0xc5   : > { %v5119_v49 = vpop.permute.xlu1 %834  ;;  %v5121_v52 = vpop.permute.xlu0 %688 }
  0xc7   : > { %1494 = vrot.lane.b32.xlu1 %v1483_v47, %s4747_s30  ;;  %1492 = vrot.lane.b32.xlu0 %v1479_v48, %s4747_s30  ;;  %v1419_v47 = vrot.slane %v4645_v57, %v4807_v14  ;;  %v1214_v14 = vsel %vm1159_vm1, %v4988_v37, %v5016_v50 }
  0xc9   : > { %v5130_v58 = vpop.permute.xlu1 %614  ;;  %v5132_v61 = vpop.permute.xlu0 %612 }
  0xcb   : > { %1642 = vrot.lane.b32.xlu1 %v1635_v53, %s4745_s18  ;;  %1496 = vrot.lane.b32.xlu0 %v1487_v56, %s4747_s30  ;;  %v5179_v56 = vld [vmem:[#allocation2] sm:$0xff] }
  0xcd   : > { %v5138_v2 = vpop.permute.xlu1 %762  ;;  %v5140_v3 = vpop.permute.xlu0 %616 }
  0xcf   : > { %1422 = vrot.lane.b32.xlu1 %v1411_v62, %s4748_s10  ;;  %1420 = vrot.lane.b32.xlu0 %v1407_v1, %s4748_s10  ;;  %v1284_v62 = vsel %vm1085_vm0, %v4969_v28, %v4978_v32  ;;  %v1285_v1 = vsel %vm1085_vm0, %v4978_v32, %v4967_v27 }
  0xd0   : > { %v1293_v57 = vmul.f32 %v1284_v62, %v5177_v40 }
  0xd1   : > { %v5149_v15 = vpop.permute.xlu1 %541  ;;  %v5151_v16 = vpop.permute.xlu0 %539 }
  0xd3   : > { %1570 = vrot.lane.b32.xlu1 %v1563_v9, %s4746_s24  ;;  %1424 = vrot.lane.b32.xlu0 %v1415_v10, %s4748_s10  ;;  %v1294_v9 = vmul.f32 %v1285_v1, %v5179_v56 }
  0xd5   : > { %v5157_v23 = vpop.permute.xlu1 %690  ;;  %v5159_v24 = vpop.permute.xlu0 %543 }
  0xd7   : > { %1350 = vrot.lane.b32.xlu1 %v1339_v19, %s4749_s19  ;;  %1348 = vrot.lane.b32.xlu0 %v1335_v20, %s4749_s19  ;;  %v5195_v19 = vld [vmem:[#allocation2 + $0x10] sm:$0xff]  ;;  %v1212_v20 = vsel %vm1159_vm1, %v4980_v33, %v4986_v36 }
  0xd8   : > { %v1292_v32 = vmul.f32 %v4969_v28, %v5195_v19  ;;  %v1220_v62 = vmul.f32 %v5195_v19, %v4980_v33  ;;  %v1296_v33 = vmul.f32 0.0, %v4997_v41 }
  0xd9   : > { %v5165_v31 = vpop.permute.xlu1 %467  ;;  %v5167_v38 = vpop.permute.xlu0 %465 }
  0xdb   : > { %1498 = vrot.lane.b32.xlu1 %v1491_v25, %s4747_s30  ;;  %1352 = vrot.lane.b32.xlu0 %v1343_v30, %s4749_s19  ;;  %v1221_v25 = vmul.f32 %v5177_v40, %v1212_v20  ;;  %v1286_v20 = vsel %vm1085_vm0, %v4967_v27, %v4997_v41  ;;  %v1132_v27 = vsel %vm7400_vm2, %v5005_v45, %v5007_v46  ;;  %v991_v46 = vmul.f32 0.0, %v5037_v60 }
  0xdc   : > { %v1141_v41 = vmul.f32 %v5177_v40, %v1132_v27  ;;  %v1057_v27 = vsel %vm7399_vm3, %v5018_v51, %v5024_v54 }
  0xdd   : > { %v5173_v48 = vpop.permute.xlu1 %618  ;;  %v5175_v53 = vpop.permute.xlu0 %469 }
  0xdf   : > { %1354 = vrot.lane.b32.xlu1 %v1347_v39, %s4749_s19  ;;  %1426 = vrot.lane.b32.xlu0 %v1419_v47, %s4748_s10  ;;  %v1213_v47 = vsel %vm1159_vm1, %v4986_v36, %v4988_v37  ;;  %v1139_v37 = vmul.f32 0.0, %v4999_v42 }
  0xe0   : > { %v1222_v1 = vmul.f32 %v5179_v56, %v1213_v47  ;;  %v1131_v47 = vsel %vm7400_vm2, %v4999_v42, %v5005_v45 }
  0xe1   : > { %v5191_v10 = vpop.permute.xlu1 %393  ;;  %v5193_v13 = vpop.permute.xlu0 %391 }
  0xe3   : > { %1306 = vrot.lane.b32.xlu1 %v1294_v9, %s4736_s6  ;;  %1304 = vrot.lane.b32.xlu0 %v1293_v57, %s4736_s6  ;;  %v5221_v9 = vld [vmem:[#allocation2 + $0x18] sm:$0xff] }
  0xe4   : > { %v1295_v36 = vmul.f32 %v1286_v20, %v5221_v9  ;;  %v1223_v45 = vmul.f32 %v5221_v9, %v1214_v14 }
  0xe5   : > { %v5205_v30 = vpop.permute.xlu1 %545  ;;  %v5207_v39 = vpop.permute.xlu0 %395 }
  0xe7   : > { %1302 = vrot.lane.b32.xlu0 %v1292_v32, %s4736_s6  ;;  %1232 = vrot.lane.b32.xlu1 %v1221_v25, %s4735_s29 }
  0xe9   : > { %v5217_v28 = vpop.permute.xlu1 %319  ;;  %v5219_v57 = vpop.permute.xlu0 %317 }
  0xeb   : > { %1234 = vrot.lane.b32.xlu0 %v1222_v1, %s4735_s29  ;;  %1230 = vrot.lane.b32.xlu1 %v1220_v62, %s4735_s29  ;;  %v1140_v62 = vmul.f32 %v5195_v19, %v1131_v47 }
  0xed   : > { %v5230_v32 = vpop.permute.xlu1 %471  ;;  %v5232_v25 = vpop.permute.xlu0 %321 }
  0xef   : > { %1308 = vrot.lane.b32.xlu0 %v1295_v36, %s4736_s6  ;;  %1310 = vrot.lane.b32.xlu1 %v1296_v33, %s4736_s6  ;;  %v1224_v36 = vmul.f32 0.0, %v5016_v50  ;;  %v1058_v50 = vsel %vm7399_vm3, %v5024_v54, %v5026_v55  ;;  %v984_v54 = vsel %vm982_vm4, %v5035_v59, %v5045_v0  ;;  %v1142_v59 = vmul.f32 %v5179_v56, %v1133_v5 }
  0xf1   : > { %v5244_v1 = vpop.permute.xlu1 %245  ;;  %v5246_v20 = vpop.permute.xlu0 %243 }
  0xf3   : > { %1151 = vrot.lane.b32.xlu0 %v1140_v62, %s4734_s22  ;;  %1153 = vrot.lane.b32.xlu1 %v1141_v41, %s4734_s22  ;;  %v1066_v62 = vmul.f32 %v5195_v19, %v1057_v27 }
  0xf5   : > { %v5255_v33 = vpop.permute.xlu1 %397  ;;  %v5257_v47 = vpop.permute.xlu0 %247 }
  0xf7   : > { %1236 = vrot.lane.b32.xlu0 %v1223_v45, %s4735_s29  ;;  %1238 = vrot.lane.b32.xlu1 %v1224_v36, %s4735_s29  ;;  %v1065_v45 = vmul.f32 0.0, %v5018_v51  ;;  %v1067_v36 = vmul.f32 %v5177_v40, %v1058_v50  ;;  %v992_v51 = vmul.f32 %v5195_v19, %v983_v4  ;;  %v1143_v4 = vmul.f32 %v5221_v9, %v5043_v63 }
  0xf8   : > { %v1059_v63 = vsel %vm7399_vm3, %v5026_v55, %v5062_v11  ;;  %v917_v55 = vmul.f32 0.0, %v5056_v8 }
  0xf9   : > { %v5266_v41 = vpop.permute.xlu1 %2068  ;;  %v5268_v14 = vpop.permute.xlu0 %323  ;;  %v1068_v60 = vmul.f32 %v5179_v56, %v1059_v63  ;;  %v837_v63 = vsel %vm280_vm6, %v5073_v17, %v5083_v22 }
  0xfb   : > { %1149 = vrot.lane.b32.xlu0 %v1139_v37, %s4734_s22  ;;  %1077 = vrot.lane.b32.xlu1 %v1066_v62, %s4733_s21  ;;  %v993_v37 = vmul.f32 %v5177_v40, %v984_v54  ;;  %v909_v54 = vsel %vm908_vm5, %v5056_v8, %v5054_v7  ;;  %v1069_v7 = vmul.f32 %v5221_v9, %v5062_v11 }
  0xfc   : > { %v846_v11 = vmul.f32 %v5177_v40, %v837_v63  ;;  %v764_v63 = vsel %vm354_vm7, %v5094_v29, %v5092_v26 }
  0xfd   : > { %v5277_v42 = vpop.permute.xlu1 %2072  ;;  %v5279_v27 = vpop.permute.xlu0 %2070 }
  0xff   : > { %1075 = vrot.lane.b32.xlu1 %v1065_v45, %s4733_s21  ;;  %1079 = vrot.lane.b32.xlu0 %v1067_v36, %s4733_s21 }
 0x101   : > { %v5291_v62 = vpop.permute.xlu1 %1996  ;;  %v5293_v50 = vpop.permute.xlu0 %249 }
 0x103   : > { %1003 = vrot.lane.b32.xlu0 %v992_v51, %s4749_s19  ;;  %1005 = vrot.lane.b32.xlu1 %v993_v37, %s4749_s19  ;;  %v918_v51 = vmul.f32 %v5195_v19, %v909_v54 }
 0x105   : > { %v5303_v45 = vpop.permute.xlu1 %2000  ;;  %v5305_v36 = vpop.permute.xlu0 %1998 }
 0x107   : > { %1155 = vrot.lane.b32.xlu0 %v1142_v59, %s4734_s22  ;;  %1157 = vrot.lane.b32.xlu1 %v1143_v4, %s4734_s22  ;;  %v919_v59 = vmul.f32 %v5177_v40, %v910_v6  ;;  %v836_v6 = vsel %vm280_vm6, %v5075_v18, %v5073_v17 }
 0x108   : > { %v845_v8 = vmul.f32 %v5195_v19, %v836_v6 }
 0x109   : > { %v5314_v5 = vpop.permute.xlu1 %1926  ;;  %v5316_v37 = vpop.permute.xlu0 %1924 }
 0x10b   : > { %1001 = vrot.lane.b32.xlu0 %v991_v46, %s4749_s19  ;;  %929 = vrot.lane.b32.xlu1 %v918_v51, %s4748_s10 }
 0x10d   : > { %v5328_v4 = vpop.permute.xlu1 %2074  ;;  %v5330_v54 = vpop.permute.xlu0 %1928 }
 0x10f   : > { %1081 = vrot.lane.b32.xlu1 %v1068_v60, %s4733_s21  ;;  %931 = vrot.lane.b32.xlu0 %v919_v59, %s4748_s10 }
 0x111   : > { %v5337_v46 = vpop.permute.xlu1 %1854  ;;  %v5339_v51 = vpop.permute.xlu0 %1852 }
 0x112   : > { %7437 = vst [vmem:[#allocation8_spill] sm:$0xff] %v5339_v51  ;;  %v985_v51 = vsel %vm982_vm4, %v5045_v0, %v5081_v21  ;;  %v844_v0 = vmul.f32 0.0, %v5075_v18 }
 0x113   : > { %927 = vrot.lane.b32.xlu1 %v917_v55, %s4748_s10  ;;  %1083 = vrot.lane.b32.xlu0 %v1069_v7, %s4733_s21  ;;  %v994_v17 = vmul.f32 %v5179_v56, %v985_v51  ;;  %v995_v55 = vmul.f32 %v5221_v9, %v5081_v21  ;;  %v911_v21 = vsel %vm908_vm5, %v5064_v12, %v5100_v34  ;;  %v772_v12 = vmul.f32 0.0, %v5094_v29 }
 0x114   : > { %v920_v18 = vmul.f32 %v5179_v56, %v911_v21  ;;  %v693_v21 = vsel %vm428_vm8, %v5111_v43, %v5121_v52 }
 0x115   : > { %v5351_v60 = vpop.permute.xlu1 %2002  ;;  %v5353_v59 = vpop.permute.xlu0 %1856 }
 0x117   : > { %856 = vrot.lane.b32.xlu0 %v845_v8, %s4747_s30  ;;  %858 = vrot.lane.b32.xlu1 %v846_v11, %s4747_s30  ;;  %v773_v8 = vmul.f32 %v5195_v19, %v764_v63 }
 0x119   : > { %v5363_v7 = vpop.permute.xlu1 %1782  ;;  %v5365_v6 = vpop.permute.xlu0 %1780 }
 0x11a   : > { %7438 = vst [vmem:[#allocation9_spill] sm:$0xff] %v5365_v6  ;;  %v765_v6 = vsel %vm354_vm7, %v5092_v26, %v5102_v35  ;;  %v921_v26 = vmul.f32 %v5221_v9, %v5100_v34  ;;  %v702_v34 = vmul.f32 %v5177_v40, %v693_v21  ;;  %v620_v21 = vsel %vm502_vm9, %v5132_v61, %v5130_v58 }
 0x11b   : > { %1007 = vrot.lane.b32.xlu0 %v994_v17, %s4749_s19  ;;  %1009 = vrot.lane.b32.xlu1 %v995_v55, %s4749_s19  ;;  %v774_v17 = vmul.f32 %v5177_v40, %v765_v6  ;;  %v692_v6 = vsel %vm428_vm8, %v5113_v44, %v5111_v43 }
 0x11c   : > { %v701_v29 = vmul.f32 %v5195_v19, %v692_v6 }
 0x11d   : > { %v5374_v51 = vpop.permute.xlu1 %1930  ;;  %v5376_v11 = vpop.permute.xlu0 %1784 }
 0x11f   : > { %854 = vrot.lane.b32.xlu0 %v844_v0, %s4747_s30  ;;  %784 = vrot.lane.b32.xlu1 %v773_v8, %s4746_s24 }
 0x121   : > { %v5388_v55 = vpop.permute.xlu1 %1710  ;;  %v5390_v63 = vpop.permute.xlu0 %1708 }
 0x123   : > { %933 = vrot.lane.b32.xlu1 %v920_v18, %s4748_s10  ;;  %786 = vrot.lane.b32.xlu0 %v774_v17, %s4746_s24 }
 0x125   : > { %v5397_v0 = vpop.permute.xlu1 %1858  ;;  %v5399_v8 = vpop.permute.xlu0 %1712 }
 0x126   : > { %7439 = vst [vmem:[#allocation10_spill] sm:$0xff] %v5397_v0  ;;  %v838_v0 = vsel %vm280_vm6, %v5083_v22, %v5119_v49  ;;  %v700_v22 = vmul.f32 0.0, %v5113_v44 }
 0x127   : > { %782 = vrot.lane.b32.xlu1 %v772_v12, %s4746_s24  ;;  %935 = vrot.lane.b32.xlu0 %v921_v26, %s4748_s10  ;;  %v847_v43 = vmul.f32 %v5179_v56, %v838_v0  ;;  %v848_v12 = vmul.f32 %v5221_v9, %v5119_v49  ;;  %v766_v49 = vsel %vm354_vm7, %v5102_v35, %v5138_v2  ;;  %v628_v35 = vmul.f32 0.0, %v5132_v61 }
 0x128   : > { %v775_v44 = vmul.f32 %v5179_v56, %v766_v49  ;;  %v549_v49 = vsel %vm547_vm10, %v5149_v15, %v5159_v24 }
 0x129   : > { %v5411_v18 = vpop.permute.xlu1 %1638  ;;  %v5413_v17 = vpop.permute.xlu0 %1636 }
 0x12b   : > { %712 = vrot.lane.b32.xlu0 %v701_v29, %s4745_s18  ;;  %714 = vrot.lane.b32.xlu1 %v702_v34, %s4745_s18  ;;  %v629_v29 = vmul.f32 %v5195_v19, %v620_v21 }
 0x12d   : > { %v5423_v26 = vpop.permute.xlu1 %1786  ;;  %v5425_v6 = vpop.permute.xlu0 %1640 }
 0x12e   : > { %7440 = vst [vmem:[#allocation11_spill] sm:$0xff] %v5425_v6  ;;  %v621_v6 = vsel %vm502_vm9, %v5130_v58, %v5140_v3  ;;  %v776_v58 = vmul.f32 %v5221_v9, %v5138_v2  ;;  %v558_v2 = vmul.f32 %v5177_v40, %v549_v49  ;;  %v474_v49 = vsel %vm473_vm11, %v5167_v38, %v5165_v31 }
 0x12f   : > { %860 = vrot.lane.b32.xlu0 %v847_v43, %s4747_s30  ;;  %862 = vrot.lane.b32.xlu1 %v848_v12, %s4747_s30  ;;  %v630_v43 = vmul.f32 %v5177_v40, %v621_v6  ;;  %v548_v6 = vsel %vm547_vm10, %v5151_v16, %v5149_v15 }
 0x130   : > { %v557_v61 = vmul.f32 %v5195_v19, %v548_v6 }
 0x131   : > { %v5434_v0 = vpop.permute.xlu1 %1566  ;;  %v5436_v34 = vpop.permute.xlu0 %1564 }
 0x133   : > { %710 = vrot.lane.b32.xlu0 %v700_v22, %s4745_s18  ;;  %640 = vrot.lane.b32.xlu1 %v629_v29, %s4744_s11 }
 0x135   : > { %v5448_v12 = vpop.permute.xlu1 %1714  ;;  %v5450_v21 = vpop.permute.xlu0 %1568 }
 0x137   : > { %788 = vrot.lane.b32.xlu1 %v775_v44, %s4746_s24  ;;  %642 = vrot.lane.b32.xlu0 %v630_v43, %s4744_s11 }
 0x139   : > { %v5457_v22 = vpop.permute.xlu1 %1494  ;;  %v5459_v29 = vpop.permute.xlu0 %1492 }
 0x13a   : > { %7441 = vst [vmem:[#allocation12_spill] sm:$0xff] %v5459_v29  ;;  %v694_v29 = vsel %vm428_vm8, %v5121_v52, %v5157_v23  ;;  %v5492_v52 = vld [vmem:[#allocation2 + $0x28] sm:$0xff] }
 0x13b   : > { %638 = vrot.lane.b32.xlu1 %v628_v35, %s4744_s11  ;;  %790 = vrot.lane.b32.xlu0 %v776_v58, %s4746_s24  ;;  %v703_v15 = vmul.f32 %v5179_v56, %v694_v29  ;;  %v704_v35 = vmul.f32 %v5221_v9, %v5157_v23  ;;  %v556_v29 = vmul.f32 %v5492_v52, %v5151_v16 }
 0x13d   : > { %v5471_v44 = vpop.permute.xlu1 %1642  ;;  %v5473_v43 = vpop.permute.xlu0 %1496 }
 0x13f   : > { %568 = vrot.lane.b32.xlu0 %v557_v61, %s4743_s7  ;;  %570 = vrot.lane.b32.xlu1 %v558_v2, %s4743_s7  ;;  %v483_v61 = vmul.f32 %v5195_v19, %v474_v49 }
 0x141   : > { %v5483_v58 = vpop.permute.xlu1 %1422  ;;  %v5485_v6 = vpop.permute.xlu0 %1420 }
 0x142   : > { %7442 = vst [vmem:[#allocation13_spill] sm:$0xff] %v5485_v6  ;;  %v622_v6 = vsel %vm502_vm9, %v5140_v3, %v5173_v48  ;;  %v482_v3 = vmul.f32 %v5492_v52, %v5167_v38 }
 0x143   : > { %716 = vrot.lane.b32.xlu0 %v703_v15, %s4745_s18  ;;  %718 = vrot.lane.b32.xlu1 %v704_v35, %s4745_s18  ;;  %v475_v15 = vsel %vm473_vm11, %v5165_v31, %v5175_v53  ;;  %v631_v16 = vmul.f32 %v5179_v56, %v622_v6  ;;  %v632_v31 = vmul.f32 %v5221_v9, %v5173_v48 }
 0x144   : > { %v484_v35 = vmul.f32 %v5177_v40, %v475_v15  ;;  %v401_v15 = vsel %vm399_vm12, %v5191_v10, %v5207_v39 }
 0x145   : > { %v5497_v23 = vpop.permute.xlu1 %1570  ;;  %v5499_v2 = vpop.permute.xlu0 %1424  ;;  %v410_v48 = vmul.f32 %v5177_v40, %v401_v15 }
 0x146   : > { %7443 = vst [vmem:[#allocation14_spill] sm:$0xff] %v5497_v23 }
 0x147   : > { %566 = vrot.lane.b32.xlu0 %v556_v29, %s4743_s7  ;;  %494 = vrot.lane.b32.xlu1 %v483_v61, %s4742_s28  ;;  %v400_v61 = vsel %vm399_vm12, %v5193_v13, %v5191_v10 }
 0x148   : > { %v409_v38 = vmul.f32 %v5195_v19, %v400_v61  ;;  %v560_v61 = vmul.f32 %v5221_v9, %v5205_v30 }
 0x149   : > { %v5511_v49 = vpop.permute.xlu1 %1350  ;;  %v5513_v23 = vpop.permute.xlu0 %1348 }
 0x14b   : > { %644 = vrot.lane.b32.xlu1 %v631_v16, %s4744_s11  ;;  %496 = vrot.lane.b32.xlu0 %v484_v35, %s4742_s28 }
 0x14d   : > { %v5521_v29 = vpop.permute.xlu1 %1498  ;;  %v5523_v6 = vpop.permute.xlu0 %1352 }
 0x14e   : > { %7444 = vst [vmem:[#allocation15_spill] sm:$0xff] %v5521_v29  ;;  %7445 = vst [vmem:[#allocation16_spill] sm:$0xff] %v5523_v6  ;;  %v550_v29 = vsel %vm547_vm10, %v5159_v24, %v5205_v30  ;;  %v408_v24 = vmul.f32 %v5492_v52, %v5193_v13  ;;  %v327_v30 = vsel %vm325_vm13, %v5217_v28, %v5232_v25 }
 0x14f   : > { %492 = vrot.lane.b32.xlu1 %v482_v3, %s4742_s28  ;;  %646 = vrot.lane.b32.xlu0 %v632_v31, %s4744_s11  ;;  %v559_v10 = vmul.f32 %v5179_v56, %v550_v29  ;;  %v336_v13 = vmul.f32 %v5177_v40, %v327_v30 }
 0x151   : > { %v5535_v16 = vpop.permute.xlu1 %1354  ;;  %v5537_v35 = vpop.permute.xlu0 %1426 }
 0x152   : > { %7446 = vst [vmem:[#allocation17_spill] sm:$0xff] %v5535_v16  ;;  %7447 = vst [vmem:[#allocation18_spill] sm:$0xff] %v5537_v35  ;;  %v326_v16 = vsel %vm325_vm13, %v5219_v57, %v5217_v28 }
 0x153   : > { %420 = vrot.lane.b32.xlu0 %v409_v38, %s4741_s25  ;;  %422 = vrot.lane.b32.xlu1 %v410_v48, %s4741_s25  ;;  %v335_v48 = vmul.f32 %v5195_v19, %v326_v16 }
 0x155   : > { %v1307_v3 = vpop.permute.xlu1 %1306  ;;  %v1305_v31 = vpop.permute.xlu0 %1304 }
 0x156   : > { %v1313_v15 = vsel %vm7399_vm3, %v1305_v31, %v1307_v3 }
 0x157   : > { %2230 = vmatprep.subr.mxu0 %v1313_v15  ;;  %572 = vrot.lane.b32.xlu0 %v559_v10, %s4743_s7  ;;  %v476_v15 = vsel %vm473_vm11, %v5175_v53, %v5230_v32  ;;  %v5570_v53 = vld [vmem:[#allocation2 + $0x8] sm:$0xff] }
 0x158   : > { %574 = vrot.lane.b32.xlu1 %v560_v61, %s4743_s7  ;;  %v485_v16 = vmul.f32 %v5179_v56, %v476_v15 }
 0x159   : > { %v1303_v29 = vpop.permute.xlu0 %1302  ;;  %v1233_v38 = vpop.permute.xlu1 %1232 }
 0x15a   : > { %v1312_v35 = vsel %vm7399_vm3, %v1303_v29, %v1305_v31  ;;  %v5575_v31 = vld [vmem:[#allocation2 + $0x10] sm:$0xff] }
 0x15b   : > { %2231 = vmatpush1.msra.mxu0 %v1312_v35  ;;  %418 = vrot.lane.b32.xlu0 %v408_v24, %s4741_s25  ;;  %v486_v35 = vmul.f32 %v5221_v9, %v5230_v32  ;;  %v253_v32 = vsel %vm7423_vm14, %v5244_v1, %v5257_v47 }
 0x15c   : > { %346 = vrot.lane.b32.xlu1 %v335_v48, %s4740_s20 }
 0x15d   : > { %v1235_v10 = vpop.permute.xlu0 %1234  ;;  %v1231_v61 = vpop.permute.xlu1 %1230 }
 0x15e   : > { %v1241_v6 = vsel %vm7400_vm2, %v1233_v38, %v1235_v10  ;;  %v1240_v28 = vsel %vm7400_vm2, %v1231_v61, %v1233_v38  ;;  %v334_v38 = vmul.f32 %v5492_v52, %v5219_v57  ;;  %v262_v61 = vmul.f32 %v5177_v40, %v253_v32 }
 0x15f   : > { %2232 = vmatprep.subr.mxu0 %v1241_v6  ;;  %348 = vrot.lane.b32.xlu0 %v336_v13, %s4740_s20  ;;  %v252_v6 = vsel %vm7423_vm14, %v5246_v20, %v5244_v1 }
 0x160   : > { %498 = vrot.lane.b32.xlu1 %v485_v16, %s4742_s28  ;;  %2233 = vmatpush1.msra.mxu0 %v1240_v28  ;;  %v261_v57 = vmul.f32 %v5195_v19, %v252_v6  ;;  %v5608_v6 = vld [vmem:[#allocation2 + $0x18] sm:$0xff] }
 0x161   : > { %v1309_v24 = vpop.permute.xlu0 %1308  ;;  %v1311_v29 = vpop.permute.xlu1 %1310  ;;  %2234 = vmatprep.subr.mxu0 %v5570_v53 }
 0x162   : > { %v1315_v48 = vsel %vm7399_vm3, %v1309_v24, %v1311_v29  ;;  %v1314_v30 = vsel %vm7399_vm3, %v1307_v3, %v1309_v24  ;;  %2235 = vmatpush1.msra.mxu0 %v5575_v31  ;;  %v402_v3 = vsel %vm399_vm12, %v5207_v39, %v5255_v33  ;;  %v412_v24 = vmul.f32 %v5221_v9, %v5255_v33  ;;  %v5613_v33 = vld [vmem:[#allocation2] sm:$0xff] }
 0x163   : > { %2301 = vmatprep.subr.mxu1 %v1315_v48  ;;  %500 = vrot.lane.b32.xlu0 %v486_v35, %s4742_s28  ;;  %v411_v1 = vmul.f32 %v5179_v56, %v402_v3  ;;  %v260_v48 = vmul.f32 %v5492_v52, %v5246_v20  ;;  %v338_v20 = vmul.f32 %v5221_v9, %v5268_v14  ;;  %vm7421_vm3 = vcmask 72704  }
 0x164   : > { %344 = vrot.lane.b32.xlu1 %v334_v38, %s4740_s20  ;;  %2302 = vmatpush1.msra.mxu1 %v1314_v30  ;;  %v328_v38 = vsel %vm325_vm13, %v5232_v25, %v5268_v14 }
 0x165   : > { %v1152_v15 = vpop.permute.xlu0 %1151  ;;  %v1154_v13 = vpop.permute.xlu1 %1153 }
 0x166   : > { %v1161_v16 = vsel %vm1159_vm1, %v1152_v15, %v1154_v13 }
 0x167   : > { %2236 = vmatprep.subr.mxu0 %v1161_v16  ;;  %272 = vrot.lane.b32.xlu0 %v261_v57, %s4739_s17  ;;  %v2076_v57 = vsel %vm280_vm6, %v5266_v41, %v5279_v27 }
 0x168   : > { %274 = vrot.lane.b32.xlu1 %v262_v61, %s4739_s17  ;;  %v2085_v16 = vmul.f32 %v2076_v57, %v5177_v40 }
 0x169   : > { %v1237_v28 = vpop.permute.xlu0 %1236  ;;  %v1239_v35 = vpop.permute.xlu1 %1238 }
 0x16a   : > { %v1243_v29 = vsel %vm7400_vm2, %v1237_v28, %v1239_v35  ;;  %v1242_v39 = vsel %vm7400_vm2, %v1235_v10, %v1237_v28  ;;  %v337_v10 = vmul.f32 %v5179_v56, %v328_v38  ;;  %vm7420_vm2 = vcmask 719872  }
 0x16b   : > { %2303 = vmatprep.subr.mxu1 %v1243_v29  ;;  %424 = vrot.lane.b32.xlu0 %v411_v1, %s4741_s25  ;;  %v254_v29 = vsel %vm7423_vm14, %v5257_v47, %v5293_v50 }
 0x16c   : > { %426 = vrot.lane.b32.xlu1 %v412_v24, %s4741_s25  ;;  %2304 = vmatpush1.msra.mxu1 %v1242_v39  ;;  %v263_v38 = vmul.f32 %v5179_v56, %v254_v29 }
 0x16d   : > { %v1150_v30 = vpop.permute.xlu0 %1149  ;;  %v1078_v32 = vpop.permute.xlu1 %1077  ;;  %2305 = vmatprep.subr.mxu1 %v5608_v6 }
 0x16e   : > { %v1160_v25 = vsel %vm1159_vm1, %v1150_v30, %v1152_v15  ;;  %2306 = vmatpush1.msra.mxu1 %v5613_v33  ;;  %v2077_v15 = vsel %vm280_vm6, %v5279_v27, %v5277_v42  ;;  %v2084_v27 = vmul.f32 %v5266_v41, %v5195_v19  ;;  %v2004_v41 = vsel %vm354_vm7, %v5291_v62, %v5305_v36 }
 0x16f   : > { %2237 = vmatpush1.msra.mxu0 %v1160_v25  ;;  %270 = vrot.lane.b32.xlu0 %v260_v48, %s4739_s17  ;;  %v2086_v14 = vmul.f32 %v2077_v15, %v5179_v56  ;;  %v2005_v25 = vsel %vm354_vm7, %v5305_v36, %v5303_v45  ;;  %v2012_v36 = vmul.f32 %v5291_v62, %v5195_v19 }
 0x170   : > { %350 = vrot.lane.b32.xlu1 %v337_v10, %s4740_s20 }
 0x171   : > { %v1076_v3 = vpop.permute.xlu1 %1075  ;;  %v1080_v61 = vpop.permute.xlu0 %1079 }
 0x172   : > { %v1087_v1 = vsel %vm1085_vm0, %v1078_v32, %v1080_v61  ;;  %v1086_v28 = vsel %vm1085_vm0, %v1076_v3, %v1078_v32  ;;  %v264_v32 = vmul.f32 %v5221_v9, %v5293_v50  ;;  %v2013_v50 = vmul.f32 %v2004_v41, %v5177_v40 }
 0x173   : > { %2238 = vmatprep.subr.mxu0 %v1087_v1  ;;  %352 = vrot.lane.b32.xlu0 %v338_v20, %s4740_s20  ;;  %v2014_v3 = vmul.f32 %v2005_v25, %v5179_v56  ;;  %v1940_v41 = vmul.f32 %v5316_v37, %v5195_v19  ;;  %v7448_v25 = vld [vmem:[#allocation8_spill] sm:$0xff] }
 0x174   : > { %2096 = vrot.lane.b32.xlu1 %v2085_v16, %s4747_s30  ;;  %2239 = vmatpush1.msra.mxu0 %v1086_v28 }
 0x175   : > { %v1004_v35 = vpop.permute.xlu0 %1003  ;;  %v5635_v24 = vpop.permute.xlu1 %1005 }
 0x176   : > { %v1013_v39 = vsel %vm7422_vm15, %v1004_v35, %v5635_v24 }
 0x177   : > { %2240 = vmatprep.subr.mxu0 %v1013_v39  ;;  %2098 = vrot.lane.b32.xlu0 %v2086_v14, %s4747_s30 }
 0x178   : > { %2094 = vrot.lane.b32.xlu1 %v2084_v27, %s4747_s30  ;;  %v1933_v27 = vsel %vm428_vm8, %v5314_v5, %v5330_v54 }
 0x179   : > { %v1156_v48 = vpop.permute.xlu0 %1155  ;;  %v1158_v30 = vpop.permute.xlu1 %1157 }
 0x17a   : > { %v1163_v47 = vsel %vm1159_vm1, %v1156_v48, %v1158_v30  ;;  %v1162_v10 = vsel %vm1159_vm1, %v1154_v13, %v1156_v48  ;;  %v1932_v13 = vsel %vm428_vm8, %v5316_v37, %v5314_v5 }
 0x17b   : > { %2307 = vmatprep.subr.mxu1 %v1163_v47  ;;  %276 = vrot.lane.b32.xlu0 %v263_v38, %s4739_s17  ;;  %v1941_v28 = vmul.f32 %v1932_v13, %v5177_v40  ;;  %v1942_v38 = vmul.f32 %v1933_v27, %v5179_v56  ;;  %v2088_v47 = vmul.f32 %v5492_v52, %v5328_v4 }
 0x17c   : > { %278 = vrot.lane.b32.xlu1 %v264_v32, %s4739_s17  ;;  %2308 = vmatpush1.msra.mxu1 %v1162_v10 }
 0x17d   : > { %v1002_v57 = vpop.permute.xlu0 %1001  ;;  %v930_v20 = vpop.permute.xlu1 %929 }
 0x17e   : > { %v1012_v15 = vsel %vm7422_vm15, %v1002_v57, %v1004_v35  ;;  %v2078_v35 = vsel %vm280_vm6, %v5277_v42, %v5328_v4 }
 0x17f   : > { %2241 = vmatpush1.msra.mxu0 %v1012_v15  ;;  %2024 = vrot.lane.b32.xlu0 %v2013_v50, %s4746_s24  ;;  %v2087_v39 = vmul.f32 %v2078_v35, %v5221_v9  ;;  %v1860_v50 = vsel %vm502_vm9, %v7448_v25, %v5337_v46 }
 0x180   : > { %2026 = vrot.lane.b32.xlu1 %v2014_v3, %s4746_s24  ;;  %v1869_v4 = vmul.f32 %v1860_v50, %v5177_v40  ;;  %v1944_v50 = vmul.f32 %v5492_v52, %v5374_v51 }
 0x181   : > { %v1082_v16 = vpop.permute.xlu1 %1081  ;;  %v5669_v1 = vpop.permute.xlu0 %931 }
 0x182   : > { %v939_v14 = vsel %vm7421_vm3, %v930_v20, %v5669_v1  ;;  %v1088_v42 = vsel %vm1085_vm0, %v1080_v61, %v1082_v16  ;;  %v1861_v61 = vsel %vm502_vm9, %v5337_v46, %v5353_v59  ;;  %v2006_v46 = vsel %vm354_vm7, %v5303_v45, %v5351_v60 }
 0x183   : > { %2242 = vmatprep.subr.mxu0 %v939_v14  ;;  %2022 = vrot.lane.b32.xlu0 %v2012_v36, %s4746_s24 }
 0x184   : > { %1952 = vrot.lane.b32.xlu1 %v1941_v28, %s4745_s18  ;;  %v2016_v28 = vmul.f32 %v5492_v52, %v5351_v60 }
 0x185   : > { %v928_v62 = vpop.permute.xlu1 %927  ;;  %v1084_v29 = vpop.permute.xlu0 %1083 }
 0x186   : > { %v938_v48 = vsel %vm7421_vm3, %v928_v62, %v930_v20  ;;  %v1089_v30 = vsel %vm1085_vm0, %v1082_v16, %v1084_v29  ;;  %v1870_v20 = vmul.f32 %v1861_v61, %v5179_v56  ;;  %v2015_v16 = vmul.f32 %v2006_v46, %v5221_v9  ;;  %v7450_v46 = vld [vmem:[#allocation10_spill] sm:$0xff] }
 0x187   : > { %2243 = vmatpush1.msra.mxu0 %v938_v48  ;;  %2309 = vmatprep.subr.mxu1 %v1089_v30  ;;  %v1868_v62 = vmul.f32 %v7448_v25, %v5195_v19 }
 0x188   : > { %1954 = vrot.lane.b32.xlu0 %v1942_v38, %s4745_s18  ;;  %2100 = vrot.lane.b32.xlu1 %v2087_v39, %s4747_s30  ;;  %v1934_v39 = vsel %vm428_vm8, %v5330_v54, %v5374_v51  ;;  %v1789_v38 = vsel %vm547_vm10, %v5363_v7, %v5376_v11 }
 0x189   : > { %2310 = vmatpush1.msra.mxu1 %v1088_v42  ;;  %v857_v5 = vpop.permute.xlu0 %856  ;;  %v5689_v32 = vpop.permute.xlu1 %858  ;;  %v1943_v42 = vmul.f32 %v1934_v39, %v5221_v9 }
 0x18a   : > { %v865_v10 = vsel %vm7423_vm14, %v857_v5, %v5689_v32 }
 0x18b   : > { %2244 = vmatprep.subr.mxu0 %v865_v10 }
 0x18c   : > { %2102 = vrot.lane.b32.xlu0 %v2088_v47, %s4747_s30  ;;  %1950 = vrot.lane.b32.xlu1 %v1940_v41, %s4745_s18 }
 0x18d   : > { %v1008_v37 = vpop.permute.xlu0 %1007  ;;  %v1010_v57 = vpop.permute.xlu1 %1009 }
 0x18e   : > { %v1015_v3 = vsel %vm7422_vm15, %v1008_v37, %v1010_v57  ;;  %v1014_v15 = vsel %vm7422_vm15, %v5635_v24, %v1008_v37  ;;  %v7449_v24 = vld [vmem:[#allocation9_spill] sm:$0xff]  ;;  %v1716_v37 = vsel %vm473_vm11, %v5390_v63, %v5388_v55 }
 0x18f   : > { %2311 = vmatprep.subr.mxu1 %v1015_v3  ;;  %v1788_v35 = vsel %vm547_vm10, %v7449_v24, %v5363_v7  ;;  %v1796_v25 = vmul.f32 %v7449_v24, %v5195_v19  ;;  %v1725_v51 = vmul.f32 %v1716_v37, %v5177_v40 }
 0x190   : > { %1880 = vrot.lane.b32.xlu0 %v1869_v4, %s4744_s11  ;;  %1882 = vrot.lane.b32.xlu1 %v1870_v20, %s4744_s11  ;;  %v1797_v29 = vmul.f32 %v1788_v35, %v5177_v40  ;;  %v1724_v35 = vmul.f32 %v5390_v63, %v5195_v19 }
 0x191   : > { %2312 = vmatpush1.msra.mxu1 %v1014_v15  ;;  %v855_v13 = vpop.permute.xlu0 %854  ;;  %v785_v36 = vpop.permute.xlu1 %784 }
 0x192   : > { %v864_v14 = vsel %vm7423_vm14, %v855_v13, %v857_v5  ;;  %v1798_v5 = vmul.f32 %v1789_v38, %v5179_v56 }
 0x193   : > { %2245 = vmatpush1.msra.mxu0 %v864_v14 }
 0x194   : > { %2028 = vrot.lane.b32.xlu0 %v2015_v16, %s4746_s24  ;;  %2030 = vrot.lane.b32.xlu1 %v2016_v28, %s4746_s24  ;;  %v1872_v28 = vmul.f32 %v5492_v52, %v7450_v46 }
 0x195   : > { %v934_v45 = vpop.permute.xlu1 %933  ;;  %v5724_v27 = vpop.permute.xlu0 %786 }
 0x196   : > { %v793_v60 = vsel %vm325_vm13, %v785_v36, %v5724_v27  ;;  %v940_v54 = vsel %vm7421_vm3, %v5669_v1, %v934_v45  ;;  %v1717_v1 = vsel %vm473_vm11, %v5388_v55, %v5399_v8  ;;  %v1862_v55 = vsel %vm502_vm9, %v5353_v59, %v7450_v46 }
 0x197   : > { %2246 = vmatprep.subr.mxu0 %v793_v60  ;;  %v1726_v20 = vmul.f32 %v1717_v1, %v5179_v56  ;;  %v1871_v16 = vmul.f32 %v1862_v55, %v5221_v9  ;;  %v7451_v60 = vld [vmem:[#allocation11_spill] sm:$0xff]  ;;  %v1501_v46 = vsel %vm7423_vm14, %v5457_v22, %v5473_v43 }
 0x198   : > { %1878 = vrot.lane.b32.xlu0 %v1868_v62, %s4744_s11  ;;  %1808 = vrot.lane.b32.xlu1 %v1797_v29, %s4743_s7  ;;  %v1790_v29 = vsel %vm547_vm10, %v5376_v11, %v5423_v26  ;;  %v1645_v39 = vsel %vm399_vm12, %v5411_v18, %v7451_v60 }
 0x199   : > { %v783_v48 = vpop.permute.xlu1 %782  ;;  %v936_v30 = vpop.permute.xlu0 %935  ;;  %v1654_v63 = vmul.f32 %v1645_v39, %v5179_v56  ;;  %v1652_v56 = vmul.f32 %v5413_v17, %v5575_v31 }
 0x19a   : > { %v792_v41 = vsel %vm325_vm13, %v783_v48, %v785_v36  ;;  %v941_v47 = vsel %vm7421_vm3, %v934_v45, %v936_v30 }
 0x19b   : > { %2247 = vmatpush1.msra.mxu0 %v792_v41  ;;  %2313 = vmatprep.subr.mxu1 %v941_v47  ;;  %v1572_v47 = vsel %vm325_vm13, %v5436_v34, %v5434_v0 }
 0x19c   : > { %1810 = vrot.lane.b32.xlu0 %v1798_v5, %s4743_s7  ;;  %1956 = vrot.lane.b32.xlu1 %v1943_v42, %s4745_s18  ;;  %v1800_v5 = vmul.f32 %v5492_v52, %v5423_v26  ;;  %v1581_v26 = vmul.f32 %v1572_v47, %v5570_v53 }
 0x19d   : > { %2314 = vmatpush1.msra.mxu1 %v940_v54  ;;  %v713_v7 = vpop.permute.xlu0 %712  ;;  %v5747_v10 = vpop.permute.xlu1 %714 }
 0x19e   : > { %v721_v61 = vsel %vm399_vm12, %v713_v7, %v5747_v10 }
 0x19f   : > { %2248 = vmatprep.subr.mxu0 %v721_v61 }
 0x1a0   : > { %1958 = vrot.lane.b32.xlu0 %v1944_v50, %s4745_s18  ;;  %1806 = vrot.lane.b32.xlu1 %v1796_v25, %s4743_s7 }
 0x1a1   : > { %v861_v57 = vpop.permute.xlu0 %860  ;;  %v863_v4 = vpop.permute.xlu1 %862 }
 0x1a2   : > { %v867_v3 = vsel %vm7423_vm14, %v861_v57, %v863_v4  ;;  %v866_v15 = vsel %vm7423_vm14, %v5689_v32, %v861_v57  ;;  %v1644_v32 = vsel %vm399_vm12, %v5413_v17, %v5411_v18  ;;  %v1728_v57 = vmul.f32 %v5492_v52, %v5448_v12 }
 0x1a3   : > { %2315 = vmatprep.subr.mxu1 %v867_v3  ;;  %v1653_v45 = vmul.f32 %v1644_v32, %v5177_v40  ;;  %v1799_v40 = vmul.f32 %v1790_v29, %v5221_v9 }
 0x1a4   : > { %1736 = vrot.lane.b32.xlu0 %v1725_v51, %s4742_s28  ;;  %1738 = vrot.lane.b32.xlu1 %v1726_v20, %s4742_s28 }
 0x1a5   : > { %2316 = vmatpush1.msra.mxu1 %v866_v15  ;;  %v711_v13 = vpop.permute.xlu0 %710  ;;  %v641_v36 = vpop.permute.xlu1 %640  ;;  %v1646_v15 = vsel %vm399_vm12, %v7451_v60, %v5471_v44 }
 0x1a6   : > { %v720_v14 = vsel %vm399_vm12, %v711_v13, %v713_v7  ;;  %v1655_v13 = vmul.f32 %v1646_v15, %v5608_v6  ;;  %v7458_v15 = vld [vmem:[#allocation17_spill] sm:$0xff] }
 0x1a7   : > { %2249 = vmatpush1.msra.mxu0 %v720_v14 }
 0x1a8   : > { %1884 = vrot.lane.b32.xlu0 %v1871_v16, %s4744_s11  ;;  %1886 = vrot.lane.b32.xlu1 %v1872_v28, %s4744_s11 }
 0x1a9   : > { %v789_v59 = vpop.permute.xlu1 %788  ;;  %v5782_v24 = vpop.permute.xlu0 %642 }
 0x1aa   : > { %v649_v62 = vsel %vm473_vm11, %v641_v36, %v5782_v24  ;;  %v794_v11 = vsel %vm325_vm13, %v5724_v27, %v789_v59  ;;  %v1573_v27 = vsel %vm325_vm13, %v5434_v0, %v5450_v21  ;;  %v1718_v0 = vsel %vm473_vm11, %v5399_v8, %v5448_v12 }
 0x1ab   : > { %2250 = vmatprep.subr.mxu0 %v649_v62  ;;  %v1582_v7 = vmul.f32 %v1573_v27, %v5613_v33  ;;  %v1727_v1 = vmul.f32 %v1718_v0, %v5221_v9  ;;  %v1580_v9 = vmul.f32 %v5575_v31, %v5436_v34  ;;  %v7453_v62 = vld [vmem:[#allocation13_spill] sm:$0xff] }
 0x1ac   : > { %1734 = vrot.lane.b32.xlu0 %v1724_v35, %s4742_s28  ;;  %1664 = vrot.lane.b32.xlu1 %v1653_v45, %s4741_s25  ;;  %v1656_v35 = vmul.f32 %v5492_v52, %v5471_v44  ;;  %v1428_v29 = vsel %vm7421_vm3, %v7453_v62, %v5483_v58 }
 0x1ad   : > { %v639_v38 = vpop.permute.xlu1 %638  ;;  %v791_v19 = vpop.permute.xlu0 %790  ;;  %v1437_v39 = vmul.f32 %v5570_v53, %v1428_v29 }
 0x1ae   : > { %v648_v48 = vsel %vm473_vm11, %v639_v38, %v641_v36  ;;  %v795_v30 = vsel %vm325_vm13, %v789_v59, %v791_v19  ;;  %v1510_v36 = vmul.f32 %v5613_v33, %v1501_v46  ;;  %v7454_v19 = vld [vmem:[#allocation14_spill] sm:$0xff] }
 0x1af   : > { %2251 = vmatpush1.msra.mxu0 %v648_v48  ;;  %2317 = vmatprep.subr.mxu1 %v795_v30 }
 0x1b0   : > { %1666 = vrot.lane.b32.xlu0 %v1654_v63, %s4741_s25  ;;  %1812 = vrot.lane.b32.xlu1 %v1799_v40, %s4743_s7  ;;  %v1574_v40 = vsel %vm325_vm13, %v5450_v21, %v7454_v19  ;;  %v1356_v21 = vsel %vm7422_vm15, %v5513_v23, %v5511_v49 }
 0x1b1   : > { %2318 = vmatpush1.msra.mxu1 %v794_v11  ;;  %v569_v18 = vpop.permute.xlu0 %568  ;;  %v5805_v42 = vpop.permute.xlu1 %570  ;;  %v1583_v30 = vmul.f32 %v5608_v6, %v1574_v40  ;;  %v1365_v27 = vmul.f32 %v5570_v53, %v1356_v21 }
 0x1b2   : > { %v577_v41 = vsel %vm547_vm10, %v569_v18, %v5805_v42 }
 0x1b3   : > { %2252 = vmatprep.subr.mxu0 %v577_v41 }
 0x1b4   : > { %1814 = vrot.lane.b32.xlu0 %v1800_v5, %s4743_s7  ;;  %1662 = vrot.lane.b32.xlu1 %v1652_v56, %s4741_s25  ;;  %v1436_v5 = vmul.f32 %v5575_v31, %v7453_v62 }
 0x1b5   : > { %v717_v17 = vpop.permute.xlu0 %716  ;;  %v719_v54 = vpop.permute.xlu1 %718 }
 0x1b6   : > { %v723_v25 = vsel %vm399_vm12, %v717_v17, %v719_v54  ;;  %v722_v50 = vsel %vm399_vm12, %v5747_v10, %v717_v17  ;;  %v7452_v10 = vld [vmem:[#allocation12_spill] sm:$0xff] }
 0x1b7   : > { %2319 = vmatprep.subr.mxu1 %v723_v25  ;;  %v1500_v51 = vsel %vm7423_vm14, %v7452_v10, %v5457_v22  ;;  %v1508_v59 = vmul.f32 %v5575_v31, %v7452_v10  ;;  %v7455_v17 = vld [vmem:[#allocation16_spill] sm:$0xff]  ;;  %v7457_v10 = vld [vmem:[#allocation18_spill] sm:$0xff] }
 0x1b8   : > { %1592 = vrot.lane.b32.xlu0 %v1581_v26, %s4740_s20  ;;  %1594 = vrot.lane.b32.xlu1 %v1582_v7, %s4740_s20  ;;  %v1509_v3 = vmul.f32 %v5570_v53, %v1500_v51  ;;  %v1357_v54 = vsel %vm7422_vm15, %v5511_v49, %v7455_v17  ;;  %v2117_v26 = vld [vmem:[%s7377_s2 + $0x8] sm:$0xff]  ;;  %v1430_v51 = vsel %vm7421_vm3, %v5499_v2, %v7457_v10 }
 0x1b9   : > { %2320 = vmatpush1.msra.mxu1 %v722_v50  ;;  %v567_v61 = vpop.permute.xlu0 %566  ;;  %v495_v37 = vpop.permute.xlu1 %494  ;;  %v7456_v7 = vld [vmem:[#allocation15_spill] sm:$0xff]  ;;  %4655 = vmatprep.mubr.msk.f32.mxu0 %vm7420_vm2, %v2117_v26  ;;  %v1366_v49 = vmul.f32 %v5613_v33, %v1357_v54 }
 0x1ba   : > { %v576_v4 = vsel %vm547_vm10, %v567_v61, %v569_v18  ;;  %v1502_v25 = vsel %vm7423_vm14, %v5473_v43, %v7456_v7  ;;  %4656 = vmatprep.mubr.msk.f32.mxu1 %vm7420_vm2, %v2117_v26 }
 0x1bb   : > { %2253 = vmatpush1.msra.mxu0 %v576_v4  ;;  %v1511_v61 = vmul.f32 %v5608_v6, %v1502_v25  ;;  %v1364_v4 = vmul.f32 %v5575_v31, %v5513_v23  ;;  %v1358_v23 = vsel %vm7422_vm15, %v7455_v17, %v7458_v15 }
 0x1bc   : > { %1740 = vrot.lane.b32.xlu0 %v1727_v1, %s4742_s28  ;;  %1742 = vrot.lane.b32.xlu1 %v1728_v57, %s4742_s28 }
 0x1bd   : > { %v645_v8 = vpop.permute.xlu1 %644  ;;  %v5840_v20 = vpop.permute.xlu0 %496 }
 0x1be   : > { %v504_v12 = vsel %vm502_vm9, %v495_v37, %v5840_v20  ;;  %v650_v22 = vsel %vm473_vm11, %v5782_v24, %v645_v8  ;;  %v1429_v24 = vsel %vm7421_vm3, %v5483_v58, %v5499_v2  ;;  %v1440_v2 = vmul.f32 %v5492_v52, %v7457_v10 }
 0x1bf   : > { %2254 = vmatprep.subr.mxu0 %v504_v12  ;;  %v1438_v63 = vmul.f32 %v5613_v33, %v1429_v24  ;;  %v1512_v33 = vmul.f32 %v5492_v52, %v7456_v7 }
 0x1c0   : > { %1590 = vrot.lane.b32.xlu0 %v1580_v9, %s4740_s20  ;;  %1520 = vrot.lane.b32.xlu1 %v1509_v3, %s4739_s17  ;;  %v1439_v9 = vmul.f32 %v5608_v6, %v1430_v51 }
 0x1c1   : > { %v493_v55 = vpop.permute.xlu1 %492  ;;  %v647_v34 = vpop.permute.xlu0 %646 }
 0x1c2   : > { %v503_v16 = vsel %vm502_vm9, %v493_v55, %v495_v37  ;;  %v651_v28 = vsel %vm473_vm11, %v645_v8, %v647_v34  ;;  %v1367_v55 = vmul.f32 %v5608_v6, %v1358_v23 }
 0x1c3   : > { %2255 = vmatpush1.msra.mxu0 %v503_v16  ;;  %2321 = vmatprep.subr.mxu1 %v651_v28  ;;  %v1368_v16 = vmul.f32 %v5492_v52, %v7458_v15 }
 0x1c4   : > { %1522 = vrot.lane.b32.xlu0 %v1510_v36, %s4739_s17  ;;  %1668 = vrot.lane.b32.xlu1 %v1655_v13, %s4741_s25  ;;  %v5949_v36 = vld [vmem:[%s7376_s1 + $0x27] ss:$8 sm:$0xf] }
 0x1c5   : > { %2322 = vmatpush1.msra.mxu1 %v650_v22  ;;  %v421_v14 = vpop.permute.xlu0 %420  ;;  %v5863_v32 = vpop.permute.xlu1 %422  ;;  %v7459_v22 = vld [vmem:[#allocation6_spill] sm:$0xff] }
 0x1c6   : > { %v430_v45 = vsel %vm428_vm8, %v421_v14, %v5863_v32  ;;  %v3431_v6 = vrot.slane %v5949_v36, %v7459_v22 }
 0x1c7   : > { %2256 = vmatprep.subr.mxu0 %v430_v45  ;;  %v7460_v45 = vld [vmem:[#allocation5_spill] sm:$0xff] }
 0x1c8   : > { %1670 = vrot.lane.b32.xlu0 %v1656_v35, %s4741_s25  ;;  %1518 = vrot.lane.b32.xlu1 %v1508_v59, %s4739_s17  ;;  %v5961_v59 = vld [vmem:[%s7376_s1 + $0x26] ss:$8 sm:$0xf] }
 0x1c9   : > { %v573_v60 = vpop.permute.xlu0 %572  ;;  %v3356_v62 = vrot.slane %v5961_v59, %v7460_v45 }
 0x1ca   : > { %v575_v44 = vpop.permute.xlu1 %574  ;;  %v578_v38 = vsel %vm547_vm10, %v5805_v42, %v573_v60  ;;  %v1584_v42 = vmul.f32 %v5492_v52, %v7454_v19 }
 0x1cb   : > { %v579_v48 = vsel %vm547_vm10, %v573_v60, %v575_v44  ;;  %v7461_v44 = vld [vmem:[#allocation4_spill] sm:$0xff] }
 0x1cc   : > { %2323 = vmatprep.subr.mxu1 %v579_v48  ;;  %1448 = vrot.lane.b32.xlu0 %v1437_v39, %s4738_s12 }
 0x1cd   : > { %1450 = vrot.lane.b32.xlu1 %v1438_v63, %s4738_s12  ;;  %2324 = vmatpush1.msra.mxu1 %v578_v38  ;;  %v419_v58 = vpop.permute.xlu0 %418  ;;  %v3364_v38 = vrot.slane %v5961_v59, %v7461_v44  ;;  %v5976_v63 = vld [vmem:[%s7376_s1 + $0x24] ss:$8 sm:$0xf] }
 0x1ce   : > { %v347_v11 = vpop.permute.xlu1 %346  ;;  %v429_v18 = vsel %vm428_vm8, %v419_v58, %v421_v14  ;;  %v3285_v21 = vrot.slane %v5976_v63, %v7461_v44 }
 0x1cf   : > { %2257 = vmatpush1.msra.mxu0 %v429_v18 }
 0x1d0   : > { %1596 = vrot.lane.b32.xlu0 %v1583_v30, %s4740_s20  ;;  %v3277_v30 = vrot.slane %v5976_v63, %v7460_v45 }
 0x1d1   : > { %1598 = vrot.lane.b32.xlu1 %v1584_v42, %s4740_s20  ;;  %v349_v56 = vpop.permute.xlu0 %348 }
 0x1d2   : > { %v499_v41 = vpop.permute.xlu1 %498  ;;  %v356_v47 = vsel %vm354_vm7, %v347_v11, %v349_v56 }
 0x1d3   : > { %2258 = vmatprep.subr.mxu0 %v356_v47  ;;  %v505_v43 = vsel %vm502_vm9, %v5840_v20, %v499_v41 }
 0x1d4   : > { %1446 = vrot.lane.b32.xlu0 %v1436_v5, %s4738_s12 }
 0x1d5   : > { %1376 = vrot.lane.b32.xlu1 %v1365_v27, %s4737_s9  ;;  %v501_v53 = vpop.permute.xlu0 %500 }
 0x1d6   : > { %v345_v50 = vpop.permute.xlu1 %344  ;;  %v506_v0 = vsel %vm502_vm9, %v499_v41, %v501_v53 }
 0x1d7   : > { %v355_v37 = vsel %vm354_vm7, %v345_v50, %v347_v11  ;;  %2325 = vmatprep.subr.mxu1 %v506_v0 }
 0x1d8   : > { %1378 = vrot.lane.b32.xlu0 %v1366_v49, %s4737_s9  ;;  %2259 = vmatpush1.msra.mxu0 %v355_v37 }
 0x1d9   : > { %1524 = vrot.lane.b32.xlu1 %v1511_v61, %s4739_s17  ;;  %2326 = vmatpush1.msra.mxu1 %v505_v43  ;;  %v273_v1 = vpop.permute.xlu0 %272 }
 0x1da   : > { %v275_v57 = vpop.permute.xlu1 %274 }
 0x1db   : > { %v282_v8 = vsel %vm280_vm6, %v273_v1, %v275_v57 }
 0x1dc   : > { %1526 = vrot.lane.b32.xlu0 %v1512_v33, %s4739_s17  ;;  %2260 = vmatprep.subr.mxu0 %v282_v8 }
 0x1dd   : > { %1374 = vrot.lane.b32.xlu1 %v1364_v4, %s4737_s9  ;;  %v425_v20 = vpop.permute.xlu0 %424 }
 0x1de   : > { %v427_v3 = vpop.permute.xlu1 %426  ;;  %v431_v12 = vsel %vm428_vm8, %v5863_v32, %v425_v20 }
 0x1df   : > { %v432_v31 = vsel %vm428_vm8, %v425_v20, %v427_v3 }
 0x1e0   : > { %1452 = vrot.lane.b32.xlu0 %v1439_v9, %s4738_s12  ;;  %2327 = vmatprep.subr.mxu1 %v432_v31 }
 0x1e1   : > { %1454 = vrot.lane.b32.xlu1 %v1440_v2, %s4738_s12  ;;  %2328 = vmatpush1.msra.mxu1 %v431_v12  ;;  %v271_v46 = vpop.permute.xlu0 %270 }
 0x1e2   : > { %v351_v34 = vpop.permute.xlu1 %350  ;;  %v281_v13 = vsel %vm280_vm6, %v271_v46, %v273_v1 }
 0x1e3   : > { %2261 = vmatpush1.msra.mxu0 %v281_v13  ;;  %v357_v52 = vsel %vm354_vm7, %v349_v56, %v351_v34 }
 0x1e4   : > { %1380 = vrot.lane.b32.xlu0 %v1367_v55, %s4737_s9 }
 0x1e5   : > { %1382 = vrot.lane.b32.xlu1 %v1368_v16, %s4737_s9  ;;  %v353_v28 = vpop.permute.xlu0 %352 }
 0x1e6   : > { %v2097_v14 = vpop.permute.xlu1 %2096  ;;  %v358_v32 = vsel %vm354_vm7, %v351_v34, %v353_v28 }
 0x1e7   : > { %2329 = vmatprep.subr.mxu1 %v358_v32 }
 0x1e8   : > { %2330 = vmatpush1.msra.mxu1 %v357_v52 }
 0x1e9   : > { %v2099_v35 = vpop.permute.xlu0 %2098  ;;  %3442 = vrot.lane.b32.xlu1 %v3431_v6, %s4733_s21 }
 0x1ea   : > { %v2095_v29 = vpop.permute.xlu1 %2094  ;;  %v2105_v24 = vsel %vm7423_vm14, %v2097_v14, %v2099_v35 }
 0x1eb   : > { %2272 = vmatprep.subr.mxu0 %v2105_v24  ;;  %v2104_v60 = vsel %vm7423_vm14, %v2095_v29, %v2097_v14 }
 0x1ec   : > { %2273 = vmatpush2.msra.mxu0 %v2104_v60 }
 0x1ed   : > { %v277_v39 = vpop.permute.xlu0 %276  ;;  %3369 = vrot.lane.b32.xlu1 %v3356_v62, %s4734_s22 }
 0x1ee   : > { %v279_v19 = vpop.permute.xlu1 %278  ;;  %v283_v40 = vsel %vm280_vm6, %v275_v57, %v277_v39 }
 0x1ef   : > { %v284_v48 = vsel %vm280_vm6, %v277_v39, %v279_v19 }
 0x1f0   : > { %2331 = vmatprep.subr.mxu1 %v284_v48 }
 0x1f1   : > { %2332 = vmatpush1.msra.mxu1 %v283_v40  ;;  %v2025_v58 = vpop.permute.xlu0 %2024  ;;  %3373 = vrot.lane.b32.xlu1 %v3364_v38, %s4734_s22 }
 0x1f2   : > { %v2027_v11 = vpop.permute.xlu1 %2026 }
 0x1f3   : > { %v2033_v18 = vsel %vm325_vm13, %v2025_v58, %v2027_v11 }
 0x1f4   : > { %2274 = vmatprep.subr.mxu0 %v2033_v18 }
 0x1f5   : > { %v2023_v42 = vpop.permute.xlu0 %2022  ;;  %3290 = vrot.lane.b32.xlu1 %v3277_v30, %s4735_s29 }
 0x1f6   : > { %v1953_v56 = vpop.permute.xlu1 %1952  ;;  %v2032_v5 = vsel %vm325_vm13, %v2023_v42, %v2025_v58 }
 0x1f7   : > { %2275 = vmatpush2.msra.mxu0 %v2032_v5 }
 0x1f9   : > { %3294 = vrot.lane.b32.xlu1 %v3285_v21, %s4735_s29 }
 0x1fa   : > { %v1955_v41 = vpop.permute.xlu0 %1954  ;;  %v2101_v47 = vpop.permute.xlu1 %2100 }
 0x1fb   : > { %v1961_v27 = vsel %vm399_vm12, %v1953_v56, %v1955_v41  ;;  %v2106_v25 = vsel %vm7423_vm14, %v2099_v35, %v2101_v47 }
 0x1fc   : > { %2276 = vmatprep.subr.mxu0 %v1961_v27 }
 0x1fe   : > { %v2103_v17 = vpop.permute.xlu0 %2102  ;;  %v1951_v54 = vpop.permute.xlu1 %1950 }
 0x1ff   : > { %v1960_v26 = vsel %vm399_vm12, %v1951_v54, %v1953_v56  ;;  %v2107_v7 = vsel %vm7423_vm14, %v2101_v47, %v2103_v17 }
 0x200   : > { %2277 = vmatpush2.msra.mxu0 %v1960_v26  ;;  %2343 = vmatprep.subr.mxu1 %v2107_v7 }
 0x201   : > { %2344 = vmatpush2.msra.mxu1 %v2106_v25 }
 0x202   : > { %v1881_v53 = vpop.permute.xlu0 %1880  ;;  %v1883_v49 = vpop.permute.xlu1 %1882 }
 0x203   : > { %v1889_v50 = vsel %vm473_vm11, %v1881_v53, %v1883_v49 }
 0x204   : > { %2278 = vmatprep.subr.mxu0 %v1889_v50 }
 0x206   : > { %v2029_v0 = vpop.permute.xlu0 %2028  ;;  %v2031_v61 = vpop.permute.xlu1 %2030 }
 0x207   : > { %v2035_v37 = vsel %vm325_vm13, %v2029_v0, %v2031_v61  ;;  %v2034_v43 = vsel %vm325_vm13, %v2027_v11, %v2029_v0 }
 0x208   : > { %2345 = vmatprep.subr.mxu1 %v2035_v37 }
 0x209   : > { %2346 = vmatpush2.msra.mxu1 %v2034_v43 }
 0x20a   : > { %v1879_v1 = vpop.permute.xlu0 %1878  ;;  %v1809_v33 = vpop.permute.xlu1 %1808 }
 0x20b   : > { %v1888_v57 = vsel %vm473_vm11, %v1879_v1, %v1881_v53 }
 0x20c   : > { %2279 = vmatpush2.msra.mxu0 %v1888_v57 }
 0x20e   : > { %v1811_v4 = vpop.permute.xlu0 %1810  ;;  %v1957_v10 = vpop.permute.xlu1 %1956 }
 0x20f   : > { %v1817_v51 = vsel %vm547_vm10, %v1809_v33, %v1811_v4  ;;  %v1962_v12 = vsel %vm399_vm12, %v1955_v41, %v1957_v10 }
 0x210   : > { %2280 = vmatprep.subr.mxu0 %v1817_v51  ;;  %v2116_v51 = vld [vmem:[%s7377_s2] sm:$0xff] }
 0x212   : > { %v1959_v8 = vpop.permute.xlu0 %1958  ;;  %v1807_v20 = vpop.permute.xlu1 %1806 }
 0x213   : > { %v1816_v9 = vsel %vm547_vm10, %v1807_v20, %v1809_v33  ;;  %v1963_v3 = vsel %vm399_vm12, %v1957_v10, %v1959_v8 }
 0x214   : > { %2281 = vmatpush2.msra.mxu0 %v1816_v9  ;;  %2347 = vmatprep.subr.mxu1 %v1963_v3 }
 0x215   : > { %2348 = vmatpush2.msra.mxu1 %v1962_v12 }
 0x216   : > { %v1737_v15 = vpop.permute.xlu0 %1736  ;;  %v1739_v23 = vpop.permute.xlu1 %1738 }
 0x217   : > { %v1745_v2 = vsel %vm502_vm9, %v1737_v15, %v1739_v23 }
 0x218   : > { %2282 = vmatprep.subr.mxu0 %v1745_v2 }
 0x21a   : > { %v1885_v31 = vpop.permute.xlu0 %1884  ;;  %v1887_v46 = vpop.permute.xlu1 %1886 }
 0x21b   : > { %v1891_v55 = vsel %vm473_vm11, %v1885_v31, %v1887_v46  ;;  %v1890_v34 = vsel %vm473_vm11, %v1883_v49, %v1885_v31 }
 0x21c   : > { %2349 = vmatprep.subr.mxu1 %v1891_v55  ;;  %v6034_v55 = vld [vmem:[%s7376_s1 + $0x23] ss:$8 sm:$0xf] }
 0x21d   : > { %2350 = vmatpush2.msra.mxu1 %v1890_v34  ;;  %v3206_v34 = vrot.slane %v6034_v55, %v7460_v45 }
 0x21e   : > { %v1735_v13 = vpop.permute.xlu0 %1734  ;;  %v1665_v16 = vpop.permute.xlu1 %1664 }
 0x21f   : > { %v1744_v28 = vsel %vm502_vm9, %v1735_v13, %v1737_v15  ;;  %3219 = vrot.lane.b32.xlu1 %v3206_v34, %s4736_s6  ;;  %v3214_v13 = vrot.slane %v6034_v55, %v7461_v44 }
 0x220   : > { %2283 = vmatpush2.msra.mxu0 %v1744_v28 }
 0x222   : > { %v1667_v6 = vpop.permute.xlu0 %1666  ;;  %v1813_v14 = vpop.permute.xlu1 %1812 }
 0x223   : > { %v1673_v32 = vsel %vm428_vm8, %v1665_v16, %v1667_v6  ;;  %v1818_v24 = vsel %vm547_vm10, %v1811_v4, %v1813_v14  ;;  %3223 = vrot.lane.b32.xlu1 %v3214_v13, %s4736_s6 }
 0x224   : > { %2284 = vmatprep.subr.mxu0 %v1673_v32  ;;  %v6055_v32 = vld [vmem:[%s7376_s1 + $0x21] ss:$8 sm:$0xf] }
 0x226   : > { %v1815_v52 = vpop.permute.xlu0 %1814  ;;  %v1663_v35 = vpop.permute.xlu1 %1662 }
 0x227   : > { %v1672_v62 = vsel %vm428_vm8, %v1663_v35, %v1665_v16  ;;  %v1819_v29 = vsel %vm547_vm10, %v1813_v14, %v1815_v52  ;;  %v6045_v16 = vld [vmem:[%s7376_s1 + $0x22] ss:$8 sm:$0xf]  ;;  %v3068_v52 = vrot.slane %v6055_v32, %v7459_v22 }
 0x228   : > { %2285 = vmatpush2.msra.mxu0 %v1672_v62  ;;  %2351 = vmatprep.subr.mxu1 %v1819_v29  ;;  %v3139_v28 = vrot.slane %v6045_v16, %v7459_v22  ;;  %v6067_v62 = vld [vmem:[%s7376_s1 + $0x20] ss:$8 sm:$0xf] }
 0x229   : > { %2352 = vmatpush2.msra.mxu1 %v1818_v24  ;;  %v2997_v29 = vrot.slane %v6067_v62, %v7459_v22  ;;  %v3001_v34 = vrot.slane %v6067_v62, %v7461_v44 }
 0x22a   : > { %v1593_v60 = vpop.permute.xlu0 %1592  ;;  %v1595_v39 = vpop.permute.xlu1 %1594  ;;  %3150 = vrot.lane.b32.xlu1 %v3139_v28, %s4737_s9 }
 0x22b   : > { %v1601_v38 = vsel %vm354_vm7, %v1593_v60, %v1595_v39 }
 0x22c   : > { %2286 = vmatprep.subr.mxu0 %v1601_v38 }
 0x22e   : > { %v1741_v19 = vpop.permute.xlu0 %1740  ;;  %v1743_v40 = vpop.permute.xlu1 %1742 }
 0x22f   : > { %v1747_v48 = vsel %vm502_vm9, %v1741_v19, %v1743_v40  ;;  %v1746_v58 = vsel %vm502_vm9, %v1739_v23, %v1741_v19  ;;  %v6089_v19 = vld [vmem:[%s7376_s1 + $0x6] ss:$8 sm:$0xf] }
 0x230   : > { %2353 = vmatprep.subr.mxu1 %v1747_v48  ;;  %v2855_v40 = vrot.slane %v6089_v19, %v7459_v22  ;;  %v2851_v28 = vrot.slane %v6089_v19, %v7460_v45 }
 0x231   : > { %2354 = vmatpush2.msra.mxu1 %v1746_v58  ;;  %v6100_v58 = vld [vmem:[%s7376_s1 + $0x5] ss:$8 sm:$0xf] }
 0x232   : > { %v1591_v30 = vpop.permute.xlu0 %1590  ;;  %v1521_v11 = vpop.permute.xlu1 %1520 }
 0x233   : > { %v1600_v18 = vsel %vm354_vm7, %v1591_v30, %v1593_v60  ;;  %v6078_v60 = vld [vmem:[%s7376_s1 + $0x7] ss:$8 sm:$0xf]  ;;  %v2784_v30 = vrot.slane %v6100_v58, %v7459_v22 }
 0x234   : > { %2287 = vmatpush2.msra.mxu0 %v1600_v18  ;;  %v6111_v18 = vld [vmem:[%s7376_s1 + $0x4] ss:$8 sm:$0xf]  ;;  %v2922_v13 = vrot.slane %v6078_v60, %v7460_v45 }
 0x236   : > { %v1523_v42 = vpop.permute.xlu0 %1522  ;;  %v1669_v21 = vpop.permute.xlu1 %1668 }
 0x237   : > { %v1529_v56 = vsel %vm280_vm6, %v1521_v11, %v1523_v42  ;;  %v1674_v17 = vsel %vm428_vm8, %v1667_v6, %v1669_v21  ;;  %v7462_v6 = vld [vmem:[#allocation7_spill] sm:$0xff] }
 0x238   : > { %2288 = vmatprep.subr.mxu0 %v1529_v56  ;;  %v3289_v14 = vrot.slane %v5976_v63, %v7462_v6  ;;  %v3218_v35 = vrot.slane %v6034_v55, %v7462_v6  ;;  %v3147_v24 = vrot.slane %v6045_v16, %v7462_v6  ;;  %v3076_v38 = vrot.slane %v6055_v32, %v7462_v6  ;;  %v6122_v56 = vld [vmem:[%s7376_s1 + $0x3] ss:$8 sm:$0xf] }
 0x239   : > { %v3005_v48 = vrot.slane %v6067_v62, %v7462_v6 }
 0x23a   : > { %v1671_v5 = vpop.permute.xlu0 %1670  ;;  %v1519_v41 = vpop.permute.xlu1 %1518  ;;  %3296 = vrot.lane.b32.xlu1 %v3289_v14, %s4735_s29  ;;  %v2859_v14 = vrot.slane %v6089_v19, %v7461_v44 }
 0x23b   : > { %v1528_v47 = vsel %vm280_vm6, %v1519_v41, %v1521_v11  ;;  %v1675_v27 = vsel %vm428_vm8, %v1669_v21, %v1671_v5  ;;  %v2934_v11 = vrot.slane %v6078_v60, %v7462_v6  ;;  %v2863_v21 = vrot.slane %v6089_v19, %v7462_v6 }
 0x23c   : > { %2289 = vmatpush2.msra.mxu0 %v1528_v47  ;;  %2355 = vmatprep.subr.mxu1 %v1675_v27  ;;  %v2642_v5 = vrot.slane %v6122_v56, %v7459_v22  ;;  %v2792_v41 = vrot.slane %v6100_v58, %v7462_v6  ;;  %v6133_v47 = vld [vmem:[%s7376_s1 + $0x2] ss:$8 sm:$0xf] }
 0x23d   : > { %2356 = vmatpush2.msra.mxu1 %v1674_v17  ;;  %v2571_v27 = vrot.slane %v6133_v47, %v7459_v22  ;;  %v2721_v17 = vrot.slane %v6111_v18, %v7462_v6  ;;  %v2567_v19 = vrot.slane %v6133_v47, %v7460_v45 }
 0x23e   : > { %v1449_v54 = vpop.permute.xlu0 %1448  ;;  %3079 = vrot.lane.b32.xlu1 %v3068_v52, %s4738_s12  ;;  %v2788_v52 = vrot.slane %v6100_v58, %v7461_v44 }
 0x23f   : > { %v1451_v26 = vpop.permute.xlu1 %1450 }
 0x240   : > { %v1457_v7 = vsel %vm908_vm5, %v1449_v54, %v1451_v26 }
 0x241   : > { %2290 = vmatprep.subr.mxu0 %v1457_v7  ;;  %v2650_v7 = vrot.slane %v6122_v56, %v7462_v6 }
 0x242   : > { %v1597_v25 = vpop.permute.xlu0 %1596  ;;  %3225 = vrot.lane.b32.xlu1 %v3218_v35, %s4736_s6 }
 0x243   : > { %v1599_v53 = vpop.permute.xlu1 %1598  ;;  %v1602_v49 = vsel %vm354_vm7, %v1595_v39, %v1597_v25  ;;  %v2926_v39 = vrot.slane %v6078_v60, %v7459_v22 }
 0x244   : > { %v1603_v50 = vsel %vm354_vm7, %v1597_v25, %v1599_v53  ;;  %v6155_v25 = vld [vmem:[%s7376_s1] ss:$8 sm:$0xf] }
 0x245   : > { %2357 = vmatprep.subr.mxu1 %v1603_v50  ;;  %v2429_v53 = vrot.slane %v6155_v25, %v7459_v22  ;;  %v6166_v50 = vld [vmem:[%s7376_s1 + $0x62] ss:$8 sm:$0xf] }
 0x246   : > { %2358 = vmatpush2.msra.mxu1 %v1602_v49  ;;  %v1447_v0 = vpop.permute.xlu0 %1446  ;;  %3008 = vrot.lane.b32.xlu1 %v2997_v29, %s4739_s17  ;;  %v2579_v49 = vrot.slane %v6133_v47, %v7462_v6  ;;  %v2717_v29 = vrot.slane %v6111_v18, %v7461_v44 }
 0x247   : > { %v1377_v61 = vpop.permute.xlu1 %1376  ;;  %v1456_v37 = vsel %vm908_vm5, %v1447_v0, %v1449_v54  ;;  %v6144_v54 = vld [vmem:[%s7376_s1 + $0x1] ss:$8 sm:$0xf]  ;;  %v4208_v0 = vrot.slane %v6166_v50, %v7460_v45 }
 0x248   : > { %2291 = vmatpush2.msra.mxu0 %v1456_v37  ;;  %v6177_v37 = vld [vmem:[%s7376_s1 + $0x61] ss:$8 sm:$0xf] }
 0x24a   : > { %v1379_v43 = vpop.permute.xlu0 %1378  ;;  %3154 = vrot.lane.b32.xlu1 %v3147_v24, %s4737_s9 }
 0x24b   : > { %v1525_v1 = vpop.permute.xlu1 %1524  ;;  %v1385_v33 = vsel %vm982_vm4, %v1377_v61, %v1379_v43 }
 0x24c   : > { %2292 = vmatprep.subr.mxu0 %v1385_v33  ;;  %v1530_v20 = vsel %vm280_vm6, %v1523_v42, %v1525_v1  ;;  %v2713_v42 = vrot.slane %v6111_v18, %v7459_v22 }
 0x24e   : > { %v1527_v57 = vpop.permute.xlu0 %1526  ;;  %2937 = vrot.lane.b32.xlu1 %v2926_v39, %s4740_s20 }
 0x24f   : > { %v1375_v4 = vpop.permute.xlu1 %1374  ;;  %v1531_v10 = vsel %vm280_vm6, %v1525_v1, %v1527_v57  ;;  %v4145_v1 = vrot.slane %v6177_v37, %v7461_v44 }
 0x250   : > { %v1384_v8 = vsel %vm982_vm4, %v1375_v4, %v1377_v61  ;;  %2359 = vmatprep.subr.mxu1 %v1531_v10  ;;  %v4216_v61 = vrot.slane %v6166_v50, %v7461_v44 }
 0x251   : > { %2293 = vmatpush2.msra.mxu0 %v1384_v8  ;;  %2360 = vmatpush2.msra.mxu1 %v1530_v20 }
 0x252   : > { %v1453_v9 = vpop.permute.xlu0 %1452  ;;  %2295 = vmatmul.mubr.f32.vlgmr.msra.gmra.mxu0 %v2116_v51  ;;  %3083 = vrot.lane.b32.xlu1 %v3076_v38, %s4738_s12  ;;  %v2646_v38 = vrot.slane %v6122_v56, %v7461_v44 }
 0x253   : > { %v1455_v3 = vpop.permute.xlu1 %1454  ;;  %v1458_v12 = vsel %vm908_vm5, %v1451_v26, %v1453_v9  ;;  %v2500_v26 = vrot.slane %v6144_v54, %v7459_v22 }
 0x254   : > { %v1459_v15 = vsel %vm908_vm5, %v1453_v9, %v1455_v3  ;;  %v3427_v9 = vrot.slane %v5949_v36, %v7460_v45  ;;  %v3435_v3 = vrot.slane %v5949_v36, %v7461_v44 }
 0x255   : > { %2361 = vmatprep.subr.mxu1 %v1459_v15  ;;  %v3439_v15 = vrot.slane %v5949_v36, %v7462_v6  ;;  %v3135_v36 = vrot.slane %v6045_v16, %v7460_v45 }
 0x256   : > { %2362 = vmatpush2.msra.mxu1 %v1458_v12  ;;  %v1381_v23 = vpop.permute.xlu0 %1380  ;;  %2866 = vrot.lane.b32.xlu1 %v2855_v40, %s4741_s25  ;;  %v3360_v12 = vrot.slane %v5961_v59, %v7459_v22 }
 0x257   : > { %v1383_v2 = vpop.permute.xlu1 %1382  ;;  %v1386_v31 = vsel %vm982_vm4, %v1379_v43, %v1381_v23  ;;  %v4137_v43 = vrot.slane %v6177_v37, %v7460_v45 }
 0x258   : > { %v1387_v46 = vsel %vm982_vm4, %v1381_v23, %v1383_v2  ;;  %v3281_v23 = vrot.slane %v5976_v63, %v7459_v22  ;;  %v3368_v2 = vrot.slane %v5961_v59, %v7462_v6  ;;  %v3143_v63 = vrot.slane %v6045_v16, %v7461_v44 }
 0x259   : > { %2363 = vmatprep.subr.mxu1 %v1387_v46  ;;  %v3064_v59 = vrot.slane %v6055_v32, %v7460_v45  ;;  %v3072_v46 = vrot.slane %v6055_v32, %v7461_v44  ;;  %v2930_v16 = vrot.slane %v6078_v60, %v7461_v44  ;;  %v2780_v32 = vrot.slane %v6100_v58, %v7460_v45 }
 0x25a   : > { %2364 = vmatpush2.msra.mxu1 %v1386_v31  ;;  %3012 = vrot.lane.b32.xlu1 %v3005_v48, %s4739_s17  ;;  %v3210_v31 = vrot.slane %v6034_v55, %v7459_v22  ;;  %v2993_v55 = vrot.slane %v6067_v62, %v7460_v45  ;;  %v2709_v62 = vrot.slane %v6111_v18, %v7460_v45 }
 0x25b   : > { %2366 = vmatmul.mubr.f32.vlgmr.msra.gmra.mxu1 %v2116_v51  ;;  %v6253_v35 = vpop.permute.xlu1 %3442  ;;  %v2638_v60 = vrot.slane %v6122_v56, %v7460_v45  ;;  %v2575_v48 = vrot.slane %v6133_v47, %v7461_v44  ;;  %v2433_v56 = vrot.slane %v6155_v25, %v7461_v44 }
 0x25e   : > { %2795 = vrot.lane.b32.xlu1 %v2784_v30, %s4742_s28  ;;  %v2496_v30 = vrot.slane %v6144_v54, %v7460_v45 }
 0x25f   : > { %v6261_v24 = vpop.permute.xlu1 %3369 }
 0x262   : > { %2941 = vrot.lane.b32.xlu1 %v2934_v11, %s4740_s20  ;;  %v2504_v11 = vrot.slane %v6144_v54, %v7461_v44 }
 0x263   : > { %v6266_v39 = vpop.permute.xlu1 %3373 }
 0x266   : > { %2724 = vrot.lane.b32.xlu1 %v2713_v42, %s4743_s7  ;;  %v2425_v42 = vrot.slane %v6155_v25, %v7460_v45 }
 0x267   : > { %v6274_v40 = vpop.permute.xlu1 %3290 }
 0x26a   : > { %2870 = vrot.lane.b32.xlu1 %v2863_v21, %s4741_s25 }
 0x26b   : > { %v6279_v58 = vpop.permute.xlu1 %3294 }
 0x26e   : > { %2653 = vrot.lane.b32.xlu1 %v2642_v5, %s4744_s11  ;;  %v2508_v5 = vrot.slane %v6144_v54, %v7462_v6 }
 0x272   : > { %2799 = vrot.lane.b32.xlu1 %v2792_v41, %s4742_s28 }
 0x276   : > { %2582 = vrot.lane.b32.xlu1 %v2571_v27, %s4745_s18 }
 0x27a   : > { %2728 = vrot.lane.b32.xlu1 %v2721_v17, %s4743_s7  ;;  %v4212_v17 = vrot.slane %v6166_v50, %v7459_v22 }
 0x27e   : > { %2511 = vrot.lane.b32.xlu1 %v2500_v26, %s4746_s24 }
 0x282   : > { %2657 = vrot.lane.b32.xlu1 %v2650_v7, %s4744_s11 }
 0x286   : > { %2440 = vrot.lane.b32.xlu1 %v2429_v53, %s4747_s30 }
 0x28a   : > { %2586 = vrot.lane.b32.xlu1 %v2579_v49, %s4745_s18 }
 0x28e   : > { %4221 = vrot.lane.b32.xlu1 %v4208_v0, %s4739_s17  ;;  %v2437_v0 = vrot.slane %v6155_v25, %v7462_v6  ;;  %v4141_v25 = vrot.slane %v6177_v37, %v7459_v22 }
 0x291   : > { %v6287_v18 = vpop.permute.xlu1 %3219 }
 0x292   : > { %4225 = vrot.lane.b32.xlu1 %v4216_v61, %s4739_s17 }
 0x295   : > { %v6292_v21 = vpop.permute.xlu1 %3223 }
 0x296   : > { %4150 = vrot.lane.b32.xlu1 %v4137_v43, %s4740_s20 }
 0x29a   : > { %4154 = vrot.lane.b32.xlu1 %v4145_v1, %s4740_s20 }
 0x29c   : > { %v6300_v41 = vpop.permute.xlu1 %3150 }
 0x2ac   : > { %v6314_v49 = vpop.permute.xlu1 %3296 }
 0x312   : > { %v6185_v33 = vpop.f32.mrf.mxu0 }
 0x314   : > { %v6187_v57 = vpop.f32.mrf.mxu0 }
 0x315   : > { %v2372_v4 = vadd.f32 %v6187_v57, %v6185_v33 }
 0x31b   : > { %v6191_v10 = vpop.f32.mrf.mxu1 }
 0x31c   : > { %v2373_v51 = vadd.f32 %v2372_v4, %v6191_v10 }
 0x31d   : > { %v6194_v8 = vpop.f32.mrf.mxu1 }
 0x31e   : > { %v2374_v20 = vadd.f32 %v2373_v51, %v6194_v8 }
 0x320   : > { %2375 = vadd.xlane.f32.xlu0 %v2374_v20  ;;  %v4679_v20 = vld [vmem:[%s7376_s1 + $0x60] ss:$8 sm:$0xf] }
 0x336   : > { %3440 = vrot.lane.b32.xlu0 %v3427_v9, %s4733_s21 }
 0x33a   : > { %3444 = vrot.lane.b32.xlu0 %v3435_v3, %s4733_s21 }
 0x33e   : > { %3371 = vrot.lane.b32.xlu0 %v3360_v12, %s4734_s22  ;;  %v4066_v12 = vrot.slane %v4679_v20, %v7460_v45 }
 0x342   : > { %3446 = vrot.lane.b32.xlu0 %v3439_v15, %s4733_s21 }
 0x346   : > { %3292 = vrot.lane.b32.xlu0 %v3281_v23, %s4735_s29 }
 0x34a   : > { %3375 = vrot.lane.b32.xlu0 %v3368_v2, %s4734_s22  ;;  %v4074_v2 = vrot.slane %v4679_v20, %v7461_v44 }
 0x34e   : > { %3221 = vrot.lane.b32.xlu0 %v3210_v31, %s4736_s6  ;;  %v4678_v31 = vld [vmem:[%s7376_s1 + $0x47] ss:$8 sm:$0xf] }
 0x352   : > { %3148 = vrot.lane.b32.xlu0 %v3135_v36, %s4737_s9 }
 0x356   : > { %3152 = vrot.lane.b32.xlu0 %v3143_v63, %s4737_s9 }
 0x35a   : > { %3077 = vrot.lane.b32.xlu0 %v3064_v59, %s4738_s12  ;;  %v3995_v59 = vrot.slane %v4678_v31, %v7460_v45 }
 0x35e   : > { %3081 = vrot.lane.b32.xlu0 %v3072_v46, %s4738_s12 }
 0x362   : > { %3006 = vrot.lane.b32.xlu0 %v2993_v55, %s4739_s17  ;;  %v4003_v55 = vrot.slane %v4678_v31, %v7461_v44 }
 0x366   : > { %3010 = vrot.lane.b32.xlu0 %v3001_v34, %s4739_s17 }
 0x36a   : > { %2935 = vrot.lane.b32.xlu0 %v2922_v13, %s4740_s20  ;;  %v4070_v13 = vrot.slane %v4679_v20, %v7459_v22 }
 0x36e   : > { %2939 = vrot.lane.b32.xlu0 %v2930_v16, %s4740_s20  ;;  %v4677_v16 = vld [vmem:[%s7376_s1 + $0x46] ss:$8 sm:$0xf] }
 0x372   : > { %2864 = vrot.lane.b32.xlu0 %v2851_v28, %s4741_s25 }
 0x376   : > { %2868 = vrot.lane.b32.xlu0 %v2859_v14, %s4741_s25  ;;  %v3924_v14 = vrot.slane %v4677_v16, %v7460_v45 }
 0x37a   : > { %2793 = vrot.lane.b32.xlu0 %v2780_v32, %s4742_s28  ;;  %v4220_v32 = vrot.slane %v6166_v50, %v7462_v6 }
 0x37e   : > { %2797 = vrot.lane.b32.xlu0 %v2788_v52, %s4742_s28 }
 0x382   : > { %2722 = vrot.lane.b32.xlu0 %v2709_v62, %s4743_s7 }
 0x386   : > { %2726 = vrot.lane.b32.xlu0 %v2717_v29, %s4743_s7  ;;  %v3932_v29 = vrot.slane %v4677_v16, %v7461_v44 }
 0x38a   : > { %2651 = vrot.lane.b32.xlu0 %v2638_v60, %s4744_s11  ;;  %v3999_v60 = vrot.slane %v4678_v31, %v7459_v22 }
 0x38e   : > { %2655 = vrot.lane.b32.xlu0 %v2646_v38, %s4744_s11  ;;  %v4676_v38 = vld [vmem:[%s7376_s1 + $0x45] ss:$8 sm:$0xf] }
 0x38f   : > { %v3853_v50 = vrot.slane %v4676_v38, %v7460_v45 }
 0x392   : > { %2580 = vrot.lane.b32.xlu0 %v2567_v19, %s4745_s18 }
 0x396   : > { %2584 = vrot.lane.b32.xlu0 %v2575_v48, %s4745_s18 }
 0x39a   : > { %2509 = vrot.lane.b32.xlu0 %v2496_v30, %s4746_s24  ;;  %v4149_v30 = vrot.slane %v6177_v37, %v7462_v6 }
 0x39e   : > { %2513 = vrot.lane.b32.xlu0 %v2504_v11, %s4746_s24 }
 0x3a2   : > { %2438 = vrot.lane.b32.xlu0 %v2425_v42, %s4747_s30  ;;  %v3861_v42 = vrot.slane %v4676_v38, %v7461_v44 }
 0x3a6   : > { %2442 = vrot.lane.b32.xlu0 %v2433_v56, %s4747_s30  ;;  %v3928_v56 = vrot.slane %v4677_v16, %v7459_v22 }
 0x3a9   : > { %v2376_v47 = vpop.xlane.xlu0 %2375 }
 0x3aa   : > { %v2378_v27 = vmul.f32 0.001953125, %v2376_v47  ;;  %2515 = vrot.lane.b32.xlu0 %v2508_v5, %s4746_s24  ;;  %v4675_v5 = vld [vmem:[%s7376_s1 + $0x44] ss:$8 sm:$0xf] }
 0x3ab   : > { %v3782_v37 = vrot.slane %v4675_v5, %v7460_v45 }
 0x3ac   : > { %v6306_v26 = vsub.f32 %v6185_v33, %v2378_v27  ;;  %v6309_v7 = vsub.f32 %v6187_v57, %v2378_v27  ;;  %v6312_v53 = vsub.f32 %v6191_v10, %v2378_v27  ;;  %v6322_v61 = vsub.f32 %v6194_v8, %v2378_v27  ;;  %v6337_v8 = vpop.permute.xlu1 %3079 }
 0x3ad   : > { %v6316_v54 = vpop.permute.xlu0 %3440 }
 0x3ae   : > { %4223 = vrot.lane.b32.xlu0 %v4212_v17, %s4739_s17  ;;  %v2383_v43 = vmul.f32 %v6306_v26, %v6306_v26  ;;  %v2384_v1 = vmul.f32 %v6309_v7, %v6309_v7  ;;  %v2385_v33 = vmul.f32 %v6312_v53, %v6312_v53  ;;  %v2386_v10 = vmul.f32 %v6322_v61, %v6322_v61 }
 0x3af   : > { %v4078_v17 = vrot.slane %v4679_v20, %v7462_v6 }
 0x3b0   : > { %v2387_v57 = vadd.f32 %v2384_v1, %v2383_v43  ;;  %v6346_v15 = vpop.permute.xlu1 %3225  ;;  %v3790_v43 = vrot.slane %v4675_v5, %v7461_v44 }
 0x3b1   : > { %v6330_v4 = vpop.permute.xlu0 %3444 }
 0x3b2   : > { %2444 = vrot.lane.b32.xlu0 %v2437_v0, %s4747_s30  ;;  %v2388_v51 = vadd.f32 %v2387_v57, %v2385_v33  ;;  %v3857_v33 = vrot.slane %v4676_v38, %v7459_v22  ;;  %v4674_v57 = vld [vmem:[%s7376_s1 + $0x43] ss:$8 sm:$0xf] }
 0x3b4   : > { %v2389_v9 = vadd.f32 %v2388_v51, %v2386_v10  ;;  %v6355_v36 = vpop.permute.xlu1 %3008  ;;  %v3711_v10 = vrot.slane %v4674_v57, %v7460_v45  ;;  %v4007_v51 = vrot.slane %v4678_v31, %v7462_v6 }
 0x3b5   : > { %v6342_v3 = vpop.permute.xlu0 %3371 }
 0x3b6   : > { %4152 = vrot.lane.b32.xlu0 %v4141_v25, %s4740_s20  ;;  %2390 = vadd.xlane.f32.xlu1 %v2389_v9 }
 0x3b8   : > { %v6365_v34 = vpop.permute.xlu1 %3154 }
 0x3b9   : > { %v6348_v23 = vpop.permute.xlu0 %3446 }
 0x3ba   : > { %4079 = vrot.lane.b32.xlu0 %v4066_v12, %s4741_s25  ;;  %v3719_v12 = vrot.slane %v4674_v57, %v7461_v44 }
 0x3bc   : > { %v6378_v52 = vpop.permute.xlu1 %2937 }
 0x3bd   : > { %v6357_v63 = vpop.permute.xlu0 %3292 }
 0x3be   : > { %4083 = vrot.lane.b32.xlu0 %v4074_v2, %s4741_s25  ;;  %v3786_v2 = vrot.slane %v4675_v5, %v7459_v22 }
 0x3c0   : > { %v6393_v48 = vpop.permute.xlu1 %3083 }
 0x3c1   : > { %v6361_v46 = vpop.permute.xlu0 %3375 }
 0x3c2   : > { %4008 = vrot.lane.b32.xlu0 %v3995_v59, %s4742_s28  ;;  %v4673_v59 = vld [vmem:[%s7376_s1 + $0x42] ss:$8 sm:$0xf] }
 0x3c3   : > { %v3640_v31 = vrot.slane %v4673_v59, %v7460_v45 }
 0x3c4   : > { %v6407_v47 = vpop.permute.xlu1 %2866 }
 0x3c5   : > { %v6371_v28 = vpop.permute.xlu0 %3221 }
 0x3c6   : > { %4012 = vrot.lane.b32.xlu0 %v4003_v55, %s4742_s28 }
 0x3c7   : > { %4081 = vrot.lane.b32.xlu1 %v4070_v13, %s4741_s25 }
 0x3c8   : > { %v6419_v1 = vpop.permute.xlu1 %3012 }
 0x3c9   : > { %v6380_v62 = vpop.permute.xlu0 %3148 }
 0x3ca   : > { %3937 = vrot.lane.b32.xlu0 %v3924_v14, %s4743_s7  ;;  %v3936_v14 = vrot.slane %v4677_v16, %v7462_v6 }
 0x3cb   : > { %4227 = vrot.lane.b32.xlu1 %v4220_v32, %s4739_s17 }
 0x3cc   : > { %v6432_v20 = vpop.permute.xlu1 %2795 }
 0x3cd   : > { %v6389_v19 = vpop.permute.xlu0 %3152 }
 0x3ce   : > { %3941 = vrot.lane.b32.xlu0 %v3932_v29, %s4743_s7  ;;  %v3648_v29 = vrot.slane %v4673_v59, %v7461_v44 }
 0x3cf   : > { %4010 = vrot.lane.b32.xlu1 %v3999_v60, %s4742_s28  ;;  %v3715_v60 = vrot.slane %v4674_v57, %v7459_v22 }
 0x3d0   : > { %v6447_v13 = vpop.permute.xlu1 %2941 }
 0x3d1   : > { %v6398_v11 = vpop.permute.xlu0 %3077 }
 0x3d2   : > { %3866 = vrot.lane.b32.xlu0 %v3853_v50, %s4744_s11  ;;  %v4672_v50 = vld [vmem:[%s7376_s1 + $0x41] ss:$8 sm:$0xf] }
 0x3d3   : > { %4156 = vrot.lane.b32.xlu1 %v4149_v30, %s4740_s20  ;;  %v3569_v16 = vrot.slane %v4672_v50, %v7460_v45 }
 0x3d4   : > { %v6460_v30 = vpop.permute.xlu1 %2724 }
 0x3d5   : > { %v6409_v27 = vpop.permute.xlu0 %3081 }
 0x3d6   : > { %3870 = vrot.lane.b32.xlu0 %v3861_v42, %s4744_s11 }
 0x3d7   : > { %3939 = vrot.lane.b32.xlu1 %v3928_v56, %s4743_s7  ;;  %v3865_v56 = vrot.slane %v4676_v38, %v7462_v6 }
 0x3d9   : > { %v6415_v0 = vpop.permute.xlu0 %3006 }
 0x3da   : > { %3795 = vrot.lane.b32.xlu0 %v3782_v37, %s4745_s18 }
 0x3db   : > { %4085 = vrot.lane.b32.xlu1 %v4078_v17, %s4741_s25  ;;  %v3577_v17 = vrot.slane %v4672_v50, %v7461_v44 }
 0x3dd   : > { %v6426_v25 = vpop.permute.xlu0 %3010 }
 0x3de   : > { %3799 = vrot.lane.b32.xlu0 %v3790_v43, %s4745_s18  ;;  %v6472_v43 = vpop.permute.xlu1 %2870 }
 0x3df   : > { %3868 = vrot.lane.b32.xlu1 %v3857_v33, %s4744_s11  ;;  %v3644_v33 = vrot.slane %v4673_v59, %v7459_v22 }
 0x3e1   : > { %v6434_v9 = vpop.permute.xlu0 %2935 }
 0x3e2   : > { %3724 = vrot.lane.b32.xlu0 %v3711_v10, %s4746_s24  ;;  %v4671_v10 = vld [vmem:[%s7376_s1 + $0x40] ss:$8 sm:$0xf] }
 0x3e3   : > { %4014 = vrot.lane.b32.xlu1 %v4007_v51, %s4742_s28  ;;  %v3498_v38 = vrot.slane %v4671_v10, %v7460_v45  ;;  %v3581_v45 = vrot.slane %v4672_v50, %v7462_v6 }
 0x3e5   : > { %v6443_v55 = vpop.permute.xlu0 %2939 }
 0x3e6   : > { %3728 = vrot.lane.b32.xlu0 %v3719_v12, %s4746_s24  ;;  %v3794_v12 = vrot.slane %v4675_v5, %v7462_v6  ;;  %v3723_v5 = vrot.slane %v4674_v57, %v7462_v6  ;;  %v3652_v57 = vrot.slane %v4673_v59, %v7462_v6 }
 0x3e7   : > { %3797 = vrot.lane.b32.xlu1 %v3786_v2, %s4745_s18  ;;  %v6485_v2 = vpop.permute.xlu1 %2653 }
 0x3e9   : > { %v6451_v32 = vpop.permute.xlu0 %2864 }
 0x3ea   : > { %3653 = vrot.lane.b32.xlu0 %v3640_v31, %s4747_s30 }
 0x3eb   : > { %3943 = vrot.lane.b32.xlu1 %v3936_v14, %s4743_s7  ;;  %v3506_v14 = vrot.slane %v4671_v10, %v7461_v44  ;;  %v3502_v44 = vrot.slane %v4671_v10, %v7459_v22 }
 0x3ed   : > { %v6462_v42 = vpop.permute.xlu0 %2868 }
 0x3ee   : > { %3657 = vrot.lane.b32.xlu0 %v3648_v29, %s4747_s30  ;;  %v3573_v29 = vrot.slane %v4672_v50, %v7459_v22 }
 0x3ef   : > { %3726 = vrot.lane.b32.xlu1 %v3715_v60, %s4746_s24 }
 0x3f1   : > { %v6468_v37 = vpop.permute.xlu0 %2793 }
 0x3f2   : > { %3582 = vrot.lane.b32.xlu0 %v3569_v16, %s4748_s10  ;;  %v6497_v16 = vpop.permute.xlu1 %2799 }
 0x3f3   : > { %3872 = vrot.lane.b32.xlu1 %v3865_v56, %s4744_s11  ;;  %v6504_v56 = vld [vmem:[#allocation2 + $0x28] sm:$0xff] }
 0x3f4   : > { %v3022_v22 = vmul.f32 %v6504_v56, %v6415_v0 }
 0x3f5   : > { %v6479_v51 = vpop.permute.xlu0 %2797 }
 0x3f6   : > { %3586 = vrot.lane.b32.xlu0 %v3577_v17, %s4748_s10  ;;  %v3306_v17 = vmul.f32 %v6504_v56, %v6274_v40  ;;  %v6510_v50 = vpop.permute.xlu1 %2582 }
 0x3f7   : > { %3655 = vrot.lane.b32.xlu1 %v3644_v33, %s4747_s30 }
 0x3f9   : > { %v6487_v31 = vpop.permute.xlu0 %2722 }
 0x3fa   : > { %3511 = vrot.lane.b32.xlu0 %v3498_v38, %s4749_s19  ;;  %v3164_v38 = vmul.f32 %v6504_v56, %v6380_v62 }
 0x3fb   : > { %3801 = vrot.lane.b32.xlu1 %v3794_v12, %s4745_s18 }
 0x3fd   : > { %v6493_v60 = vpop.permute.xlu0 %2726 }
 0x3fe   : > { %3515 = vrot.lane.b32.xlu0 %v3506_v14, %s4749_s19  ;;  %v6522_v14 = vpop.permute.xlu1 %2728 }
 0x3ff   : > { %3584 = vrot.lane.b32.xlu1 %v3573_v29, %s4748_s10  ;;  %7464 = vst [vmem:[#allocation9_spill] sm:$0xff] %v6522_v14  ;;  %v3510_v29 = vrot.slane %v4671_v10, %v7462_v6  ;;  %v3389_v6 = vmul.f32 %v6504_v56, %v6361_v46 }
 0x401   : > { %v6508_v33 = vpop.permute.xlu0 %2651 }
 0x402   : > { %3588 = vrot.lane.b32.xlu0 %v3581_v45, %s4748_s10  ;;  %v2880_v45 = vmul.f32 %v6504_v56, %v6451_v32 }
 0x403   : > { %3730 = vrot.lane.b32.xlu1 %v3723_v5, %s4746_s24  ;;  %v3460_v5 = vmul.f32 %v6504_v56, %v6348_v23 }
 0x405   : > { %v6519_v12 = vpop.permute.xlu0 %2655 }
 0x406   : > { %3316 = vrot.lane.b32.xlu0 %v3306_v17, %s4734_s22  ;;  %7463 = vst [vmem:[#allocation8_spill] sm:$0xff] %v6519_v12 }
 0x407   : > { %3513 = vrot.lane.b32.xlu1 %v3502_v44, %s4749_s19  ;;  %v6534_v44 = vpop.permute.xlu1 %2511 }
 0x408   : > { %7466 = vst [vmem:[#allocation11_spill] sm:$0xff] %v6534_v44 }
 0x409   : > { %v6530_v59 = vpop.permute.xlu0 %2580 }
 0x40a   : > { %3174 = vrot.lane.b32.xlu0 %v3164_v38, %s4749_s19  ;;  %7465 = vst [vmem:[#allocation10_spill] sm:$0xff] %v6530_v59  ;;  %v3235_v38 = vmul.f32 %v6504_v56, %v6287_v18 }
 0x40b   : > { %3659 = vrot.lane.b32.xlu1 %v3652_v57, %s4747_s30  ;;  %v6542_v17 = vpop.permute.xlu1 %2657 }
 0x40c   : > { %7467 = vst [vmem:[#allocation12_spill] sm:$0xff] %v6542_v17 }
 0x40d   : > { %v6540_v10 = vpop.permute.xlu0 %2584 }
 0x40e   : > { %3032 = vrot.lane.b32.xlu0 %v3022_v22, %s4747_s30  ;;  %v3093_v22 = vmul.f32 %v6504_v56, %v6398_v11 }
 0x40f   : > { %3517 = vrot.lane.b32.xlu1 %v3510_v29, %s4749_s19  ;;  %v6552_v29 = vpop.permute.xlu1 %2440 }
 0x410   : > { %7469 = vst [vmem:[#allocation14_spill] sm:$0xff] %v6552_v29 }
 0x411   : > { %v6548_v57 = vpop.permute.xlu0 %2509 }
 0x412   : > { %2890 = vrot.lane.b32.xlu0 %v2880_v45, %s4745_s18  ;;  %7468 = vst [vmem:[#allocation13_spill] sm:$0xff] %v6548_v57  ;;  %v2951_v45 = vmul.f32 %v6504_v56, %v6434_v9 }
 0x413   : > { %3474 = vrot.lane.b32.xlu1 %v3460_v5, %s4736_s6  ;;  %v6561_v17 = vpop.permute.xlu1 %2586 }
 0x414   : > { %7471 = vst [vmem:[#allocation15_spill] sm:$0xff] %v6561_v17 }
 0x415   : > { %v6557_v5 = vpop.permute.xlu0 %2513 }
 0x416   : > { %7470 = vst [vmem:[#allocation16_spill] sm:$0xff] %v6557_v5 }
 0x417   : > { %3403 = vrot.lane.b32.xlu1 %v3389_v6, %s4735_s29  ;;  %v2809_v6 = vmul.f32 %v6504_v56, %v6468_v37  ;;  %v6567_v59 = vpop.permute.xlu1 %4221 }
 0x418   : > { %7473 = vst [vmem:[#allocation17_spill] sm:$0xff] %v6567_v59 }
 0x41b   : > { %3245 = vrot.lane.b32.xlu1 %v3235_v38, %s4733_s21  ;;  %v6565_v38 = vpop.permute.xlu0 %2438  ;;  %v6571_v57 = vpop.permute.xlu1 %4225 }
 0x41c   : > { %7472 = vst [vmem:[#allocation18_spill] sm:$0xff] %v6565_v38  ;;  %7475 = vst [vmem:[#allocation5_spill] sm:$0xff] %v6571_v57 }
 0x41f   : > { %3103 = vrot.lane.b32.xlu1 %v3093_v22, %s4748_s10  ;;  %v6569_v29 = vpop.permute.xlu0 %2442  ;;  %v6575_v5 = vpop.permute.xlu1 %4150 }
 0x420   : > { %7474 = vst [vmem:[#allocation6_spill] sm:$0xff] %v6569_v29  ;;  %7477 = vst [vmem:[#allocation7_spill] sm:$0xff] %v6575_v5 }
 0x423   : > { %2961 = vrot.lane.b32.xlu1 %v2951_v45, %s4746_s24  ;;  %v6573_v22 = vpop.permute.xlu0 %2515  ;;  %v6579_v14 = vpop.permute.xlu1 %4154 }
 0x424   : > { %7476 = vst [vmem:[#allocation4_spill] sm:$0xff] %v6573_v22  ;;  %7479 = vst [vmem:[#allocation20_spill] sm:$0xff] %v6579_v14 }
 0x427   : > { %2819 = vrot.lane.b32.xlu1 %v2809_v6, %s4744_s11  ;;  %v6577_v44 = vpop.permute.xlu0 %4223 }
 0x428   : > { %7478 = vst [vmem:[#allocation19_spill] sm:$0xff] %v6577_v44 }
 0x42b   : > { %v6581_v45 = vpop.permute.xlu0 %2444 }
 0x42c   : > { %7480 = vst [vmem:[#allocation21_spill] sm:$0xff] %v6581_v45 }
 0x42f   : > { %v6585_v59 = vpop.permute.xlu0 %4152 }
 0x430   : > { %7482 = vst [vmem:[#allocation23_spill] sm:$0xff] %v6585_v59 }
 0x433   : > { %v6591_v22 = vpop.permute.xlu0 %4079 }
 0x434   : > { %7485 = vst [vmem:[#allocation26_spill] sm:$0xff] %v6591_v22 }
 0x437   : > { %v6595_v14 = vpop.permute.xlu0 %4083 }
 0x438   : > { %7487 = vst [vmem:[#allocation28_spill] sm:$0xff] %v6595_v14 }
 0x43f   : > { %v2391_v17 = vpop.xlane.xlu1 %2390 }
 0x440   : > { %v2392_v6 = vmul.f32 0.001953125, %v2391_v17 }
 0x442   : > { %v2393_v12 = vadd.f32 1e-05, %v2392_v6 }
 0x443   : > { %v6583_v38 = vpop.permute.xlu1 %4081 }
 0x444   : > { %7481 = vst [vmem:[#allocation22_spill] sm:$0xff] %v6583_v38  ;;  %4716 = vrsqrt.f32 %v2393_v12 }
 0x447   : > { %v6587_v29 = vpop.permute.xlu1 %4227 }
 0x448   : > { %7483 = vst [vmem:[#allocation24_spill] sm:$0xff] %v6587_v29 }
 0x44b   : > { %v6589_v57 = vpop.permute.xlu1 %4010 }
 0x44c   : > { %7484 = vst [vmem:[#allocation25_spill] sm:$0xff] %v6589_v57 }
 0x44f   : > { %v6593_v5 = vpop.permute.xlu1 %4156 }
 0x450   : > { %7486 = vst [vmem:[#allocation27_spill] sm:$0xff] %v6593_v5 }
 0x451   : > { %v4717_v44 = vpop.eup %4716 }
 0x452   : > { %v2395_v45 = vmul.f32 %v4717_v44, %v6306_v26  ;;  %v2396_v17 = vmul.f32 %v4717_v44, %v6309_v7  ;;  %v2397_v6 = vmul.f32 %v4717_v44, %v6312_v53  ;;  %v2398_v12 = vmul.f32 %v4717_v44, %v6322_v61  ;;  %v6609_v7 = vpop.permute.xlu0 %4008 }
 0x453   : > { %v6601_v38 = vpop.permute.xlu1 %3939  ;;  %v3449_v44 = vsel %vm1085_vm0, %v6253_v35, %v6330_v4 }
 0x454   : > { %vm2399_vm2 = vcmp.ge.f32.partialorder %v2395_v45, 0.0  ;;  %vm2400_vm3 = vcmp.ge.f32.partialorder %v2396_v17, 0.0  ;;  %vm2401_vm15 = vcmp.ge.f32.partialorder %v2397_v6, 0.0  ;;  %vm2402_vm14 = vcmp.ge.f32.partialorder %v2398_v12, 0.0 }
 0x455   : > { %v2403_v57 = vmul.f32 0.01, %v2395_v45  ;;  %v2404_v29 = vmul.f32 0.01, %v2396_v17  ;;  %v2405_v5 = vmul.f32 0.01, %v2397_v6 }
 0x456   : > { %v2406_v22 = vmul.f32 0.01, %v2398_v12 }
 0x457   : > { %v6603_v59 = vsel %vm2399_vm2, %v2395_v45, %v2403_v57  ;;  %v6605_v14 = vsel %vm2400_vm3, %v2396_v17, %v2404_v29  ;;  %v6607_v26 = vsel %vm2401_vm15, %v2397_v6, %v2405_v5  ;;  %v6617_v61 = vpop.permute.xlu1 %4085  ;;  %v3448_v57 = vsel %vm1085_vm0, %v6316_v54, %v6253_v35  ;;  %v6631_v45 = vpop.permute.xlu0 %4012 }
 0x458   : > { %v6611_v53 = vsel %vm2402_vm14, %v2398_v12, %v2406_v22  ;;  %2411 = vst [vmem:[#allocation2 + $0x10] sm:$0xff] %v6603_v59  ;;  %2412 = vst [vmem:[#allocation2 + $0x8] sm:$0xff] %v6605_v14  ;;  %v3458_v29 = vmul.f32 %v3449_v44, %v6607_v26  ;;  %v3457_v5 = vmul.f32 %v3448_v57, %v6605_v14  ;;  %vm7488_vm2 = vcmask 1039360  }
 0x459   : > { %2413 = vst [vmem:[#allocation2] sm:$0xff] %v6607_v26  ;;  %2414 = vst [vmem:[#allocation2 + $0x18] sm:$0xff] %v6611_v53  ;;  %v3377_v22 = vsel %vm1159_vm1, %v6261_v24, %v6342_v3  ;;  %v3456_v35 = vmul.f32 %v6316_v54, %v6603_v59  ;;  %v3378_v12 = vsel %vm1159_vm1, %v6342_v3, %v6266_v39  ;;  %vm7489_vm3 = vcmask 990208  }
 0x45a   : > { %3470 = vrot.lane.b32.xlu1 %v3458_v29, %s4736_s6  ;;  %3468 = vrot.lane.b32.xlu0 %v3457_v5, %s4736_s6  ;;  %v3386_v6 = vmul.f32 %v3377_v22, %v6605_v14  ;;  %v3385_v44 = vmul.f32 %v6261_v24, %v6603_v59  ;;  %v3387_v29 = vmul.f32 %v3378_v12, %v6607_v26  ;;  %vm7490_vm14 = vmmov %vm7488_vm2 }
 0x45b   : > { %v6634_v17 = vpop.permute.xlu1 %3868  ;;  %v6646_v57 = vpop.permute.xlu0 %3937  ;;  %v3299_v54 = vsel %vm7488_vm2, %v6357_v63, %v6279_v58  ;;  %v3450_v3 = vsel %vm1085_vm0, %v6330_v4, %v6348_v23  ;;  %v3298_v12 = vsel %vm7490_vm14, %v6274_v40, %v6357_v63  ;;  %vm7491_vm15 = vmmov %vm7489_vm3 }
 0x45c   : > { %v3308_v24 = vmul.f32 %v3299_v54, %v6605_v14  ;;  %v3459_v22 = vmul.f32 %v3450_v3, %v6611_v53  ;;  %v3307_v23 = vmul.f32 %v3298_v12, %v6603_v59  ;;  %v3156_v12 = vsel %vm982_vm4, %v6380_v62, %v6300_v41  ;;  %vm7492_vm2 = vmmov %vm7489_vm3 }
 0x45e   : > { %3397 = vrot.lane.b32.xlu1 %v3386_v6, %s4735_s29  ;;  %3466 = vrot.lane.b32.xlu0 %v3456_v35, %s4736_s6  ;;  %v3227_v6 = vsel %vm7489_vm3, %v6287_v18, %v6371_v28  ;;  %v3157_v18 = vsel %vm982_vm4, %v6300_v41, %v6389_v19  ;;  %vm7493_vm3 = vmmov %vm7490_vm14  ;;  %vm7505_vm14 = vcmask 449536  }
 0x45f   : > { %v6649_v5 = vpop.permute.xlu1 %4014  ;;  %v6665_v35 = vpop.permute.xlu0 %3941  ;;  %v3236_v4 = vmul.f32 %v3227_v6, %v6603_v59  ;;  %v3166_v40 = vmul.f32 %v3157_v18, %v6605_v14  ;;  %v3300_v18 = vsel %vm7493_vm3, %v6279_v58, %v6314_v49  ;;  %v3086_v58 = vsel %vm908_vm5, %v6337_v8, %v6409_v27  ;;  %vm7513_vm3 = vmmov %vm7492_vm2 }
 0x462   : > { %3395 = vrot.lane.b32.xlu1 %v3385_v44, %s4735_s29  ;;  %3399 = vrot.lane.b32.xlu0 %v3387_v29, %s4735_s29  ;;  %v3379_v29 = vsel %vm1159_vm1, %v6266_v39, %v6361_v46  ;;  %v3085_v46 = vsel %vm908_vm5, %v6398_v11, %v6337_v8  ;;  %v3229_v11 = vsel %vm7492_vm2, %v6292_v21, %v6346_v15 }
 0x463   : > { %v6671_v44 = vpop.permute.xlu1 %3797  ;;  %v6684_v63 = vpop.permute.xlu0 %3866  ;;  %v3388_v54 = vmul.f32 %v3379_v29, %v6611_v53  ;;  %v3238_v41 = vmul.f32 %v3229_v11, %v6607_v26  ;;  %v3309_v29 = vmul.f32 %v3300_v18, %v6607_v26  ;;  %v2943_v8 = vsel %vm354_vm7, %v6434_v9, %v6378_v52 }
 0x466   : > { %3320 = vrot.lane.b32.xlu1 %v3308_v24, %s4734_s22  ;;  %3472 = vrot.lane.b32.xlu0 %v3459_v22, %s4736_s6  ;;  %v3228_v24 = vsel %vm7491_vm15, %v6371_v28, %v6292_v21  ;;  %v3310_v22 = vmul.f32 %v6314_v49, %v6611_v53  ;;  %v3015_v21 = vsel %vm280_vm6, %v6355_v36, %v6426_v25  ;;  %vm7510_vm15 = vmmov %vm7505_vm14 }
 0x467   : > { %v6687_v3 = vpop.permute.xlu1 %3943  ;;  %v3237_v39 = vmul.f32 %v3228_v24, %v6605_v14  ;;  %v6701_v6 = vpop.permute.xlu0 %3870  ;;  %v3024_v49 = vmul.f32 %v3015_v21, %v6605_v14 }
 0x46a   : > { %3247 = vrot.lane.b32.xlu1 %v3236_v4, %s4733_s21  ;;  %3318 = vrot.lane.b32.xlu0 %v3307_v23, %s4734_s22  ;;  %v3094_v4 = vmul.f32 %v3085_v46, %v6603_v59  ;;  %v3165_v23 = vmul.f32 %v3156_v12, %v6603_v59  ;;  %v3239_v46 = vmul.f32 %v6346_v15, %v6611_v53 }
 0x46b   : > { %v6707_v28 = vpop.permute.xlu1 %3726  ;;  %v6720_v62 = vpop.permute.xlu0 %3795  ;;  %v3014_v12 = vsel %vm280_vm6, %v6415_v0, %v6355_v36  ;;  %v3087_v15 = vsel %vm908_vm5, %v6409_v27, %v6393_v48  ;;  %v3158_v36 = vsel %vm982_vm4, %v6389_v19, %v6365_v34  ;;  %v2944_v27 = vsel %vm354_vm7, %v6378_v52, %v6443_v55 }
 0x46c   : > { %v3023_v11 = vmul.f32 %v3014_v12, %v6603_v59  ;;  %v3096_v0 = vmul.f32 %v3087_v15, %v6607_v26  ;;  %v3167_v9 = vmul.f32 %v3158_v36, %v6607_v26  ;;  %v2953_v19 = vmul.f32 %v2944_v27, %v6605_v14 }
 0x46d   : > { %v2801_v52 = vsel %vm502_vm9, %v6468_v37, %v6432_v20  ;;  %v3016_v37 = vsel %vm280_vm6, %v6426_v25, %v6419_v1  ;;  %v2802_v15 = vsel %vm502_vm9, %v6432_v20, %v6479_v51  ;;  %v2659_v20 = vsel %vm473_vm11, %v6508_v33, %v6485_v2 }
 0x46e   : > { %3178 = vrot.lane.b32.xlu1 %v3166_v40, %s4749_s19  ;;  %3401 = vrot.lane.b32.xlu0 %v3388_v54, %s4735_s29  ;;  %v3095_v54 = vmul.f32 %v3086_v58, %v6605_v14  ;;  %v3026_v58 = vmul.f32 %v6419_v1, %v6611_v53  ;;  %v2811_v36 = vmul.f32 %v2802_v15, %v6605_v14 }
 0x46f   : > { %v6723_v40 = vpop.permute.xlu1 %3872  ;;  %v6736_v24 = vpop.permute.xlu0 %3799 }
 0x472   : > { %3324 = vrot.lane.b32.xlu1 %v3310_v22, %s4734_s22  ;;  %3249 = vrot.lane.b32.xlu0 %v3237_v39, %s4733_s21  ;;  %v3168_v39 = vmul.f32 %v6365_v34, %v6611_v53 }
 0x473   : > { %v6739_v22 = vpop.permute.xlu1 %3655 }
 0x476   : > { %3105 = vrot.lane.b32.xlu1 %v3094_v4, %s4748_s10  ;;  %3176 = vrot.lane.b32.xlu0 %v3165_v23, %s4749_s19  ;;  %v2952_v4 = vmul.f32 %v2943_v8, %v6603_v59  ;;  %v6754_v23 = vpop.permute.xlu0 %3724  ;;  %v2810_v8 = vmul.f32 %v2801_v52, %v6603_v59  ;;  %v2874_v52 = vsel %vm428_vm8, %v6462_v42, %v6472_v43 }
 0x477   : > { %v6757_v18 = vpop.permute.xlu1 %3801 }
 0x47a   : > { %3251 = vrot.lane.b32.xlu1 %v3238_v41, %s4733_s21  ;;  %3322 = vrot.lane.b32.xlu0 %v3309_v29, %s4734_s22  ;;  %v2873_v41 = vsel %vm428_vm8, %v6407_v47, %v6462_v42  ;;  %v6773_v29 = vpop.permute.xlu0 %3728  ;;  %v2589_v42 = vsel %vm399_vm12, %v6510_v50, %v6540_v10 }
 0x47b   : > { %v6779_v21 = vpop.permute.xlu1 %3584  ;;  %v2882_v34 = vmul.f32 %v2873_v41, %v6605_v14  ;;  %v2955_v41 = vmul.f32 %v6447_v13, %v6611_v53 }
 0x47e   : > { %3036 = vrot.lane.b32.xlu1 %v3024_v49, %s4747_s30  ;;  %3107 = vrot.lane.b32.xlu0 %v3095_v54, %s4748_s10  ;;  %v6787_v49 = vpop.permute.xlu0 %3653  ;;  %v3097_v54 = vmul.f32 %v6393_v48, %v6611_v53  ;;  %v2945_v48 = vsel %vm354_vm7, %v6443_v55, %v6447_v13  ;;  %v2731_v55 = vsel %vm547_vm10, %v6460_v30, %v6493_v60 }
 0x47f   : > { %v2740_v1 = vmul.f32 %v2731_v55, %v6605_v14  ;;  %v7497_v55 = vld [vmem:[#allocation9_spill] sm:$0xff] }
 0x480   : > { %v2742_v15 = vmul.f32 %v7497_v55, %v6611_v53 }
 0x482   : > { %3182 = vrot.lane.b32.xlu1 %v3168_v39, %s4749_s19  ;;  %3253 = vrot.lane.b32.xlu0 %v3239_v46, %s4733_s21  ;;  %v6791_v39 = vpop.permute.xlu1 %3730  ;;  %v2872_v46 = vsel %vm428_vm8, %v6451_v32, %v6407_v47  ;;  %v2954_v47 = vmul.f32 %v2945_v48, %v6607_v26  ;;  %v3025_v32 = vmul.f32 %v3016_v37, %v6607_v26  ;;  %v7496_v37 = vld [vmem:[#allocation8_spill] sm:$0xff] }
 0x483   : > { %v2881_v12 = vmul.f32 %v2872_v46, %v6603_v59  ;;  %v2738_v48 = vmul.f32 %v6504_v56, %v6487_v31 }
 0x486   : > { %2963 = vrot.lane.b32.xlu1 %v2952_v4, %s4746_s24  ;;  %3034 = vrot.lane.b32.xlu0 %v3023_v11, %s4747_s30  ;;  %v6807_v4 = vpop.permute.xlu0 %3657  ;;  %v6813_v11 = vpop.permute.xlu1 %3513 }
 0x48a   : > { %3109 = vrot.lane.b32.xlu1 %v3096_v0, %s4748_s10  ;;  %3180 = vrot.lane.b32.xlu0 %v3167_v9, %s4749_s19  ;;  %v6826_v25 = vpop.permute.xlu0 %3582  ;;  %v6829_v0 = vpop.permute.xlu1 %3659  ;;  %v2884_v9 = vmul.f32 %v6472_v43, %v6611_v53 }
 0x48e   : > { %2894 = vrot.lane.b32.xlu1 %v2882_v34, %s4745_s18  ;;  %2965 = vrot.lane.b32.xlu0 %v2953_v19, %s4746_s24  ;;  %v6841_v27 = vpop.permute.xlu0 %3586  ;;  %v2730_v34 = vsel %vm547_vm10, %v6487_v31, %v6460_v30  ;;  %v6847_v19 = vpop.permute.xlu1 %3517 }
 0x48f   : > { %7494 = vst [vmem:[#allocation29_spill] sm:$0xff] %v6847_v19  ;;  %v2739_v13 = vmul.f32 %v2730_v34, %v6603_v59  ;;  %v7501_v34 = vld [vmem:[#allocation10_spill] sm:$0xff] }
 0x492   : > { %3040 = vrot.lane.b32.xlu1 %v3026_v58, %s4747_s30  ;;  %3111 = vrot.lane.b32.xlu0 %v3097_v54, %s4748_s10  ;;  %v2668_v58 = vmul.f32 %v2659_v20, %v6603_v59  ;;  %v2803_v54 = vsel %vm502_vm9, %v6479_v51, %v6497_v16  ;;  %v6860_v46 = vpop.permute.xlu0 %3511  ;;  %v2667_v51 = vmul.f32 %v6504_v56, %v6508_v33 }
 0x493   : > { %v2812_v30 = vmul.f32 %v2803_v54, %v6607_v26  ;;  %v2598_v33 = vmul.f32 %v2589_v42, %v6605_v14 }
 0x496   : > { %2821 = vrot.lane.b32.xlu1 %v2810_v8, %s4744_s11  ;;  %2892 = vrot.lane.b32.xlu0 %v2881_v12, %s4745_s18  ;;  %v2883_v8 = vmul.f32 %v2874_v52, %v6607_v26  ;;  %v6863_v12 = vpop.permute.xlu1 %3474  ;;  %v6875_v43 = vpop.permute.xlu0 %3515 }
 0x497   : > { %7495 = vst [vmem:[#allocation30_spill] sm:$0xff] %v6875_v43 }
 0x49a   : > { %2967 = vrot.lane.b32.xlu1 %v2954_v47, %s4746_s24  ;;  %3038 = vrot.lane.b32.xlu0 %v3025_v32, %s4747_s30  ;;  %v2660_v47 = vsel %vm473_vm11, %v6485_v2, %v7496_v37  ;;  %v6881_v32 = vpop.permute.xlu1 %3403  ;;  %v7499_v2 = vld [vmem:[#allocation11_spill] sm:$0xff] }
 0x49b   : > { %v2669_v31 = vmul.f32 %v2660_v47, %v6605_v14 }
 0x49e   : > { %2752 = vrot.lane.b32.xlu1 %v2740_v1, %s4743_s7  ;;  %2823 = vrot.lane.b32.xlu0 %v2811_v36, %s4744_s11  ;;  %v6889_v1 = vpop.permute.xlu0 %3588  ;;  %v2813_v36 = vmul.f32 %v6497_v16, %v6611_v53  ;;  %v7502_v16 = vld [vmem:[#allocation12_spill] sm:$0xff] }
 0x49f   : > { %7498 = vst [vmem:[#allocation8_spill] sm:$0xff] %v6889_v1  ;;  %v2661_v52 = vsel %vm473_vm11, %v7496_v37, %v7502_v16  ;;  %v2596_v37 = vmul.f32 %v6504_v56, %v7501_v34 }
 0x4a2   : > { %2898 = vrot.lane.b32.xlu1 %v2884_v9, %s4745_s18  ;;  %2969 = vrot.lane.b32.xlu0 %v2955_v41, %s4746_s24  ;;  %v6893_v9 = vpop.permute.xlu1 %3245  ;;  %v7500_v41 = vld [vmem:[#allocation13_spill] sm:$0xff] }
 0x4a3   : > { %v2517_v20 = vsel %vm325_vm13, %v7500_v41, %v7499_v2  ;;  %v2525_v42 = vmul.f32 %v6504_v56, %v7500_v41 }
 0x4a6   : > { %2679 = vrot.lane.b32.xlu1 %v2668_v58, %s4742_s28  ;;  %2750 = vrot.lane.b32.xlu0 %v2739_v13, %s4743_s7  ;;  %v2588_v58 = vsel %vm399_vm12, %v7501_v34, %v6510_v50  ;;  %v2526_v13 = vmul.f32 %v2517_v20, %v6603_v59  ;;  %v2670_v50 = vmul.f32 %v2661_v52, %v6607_v26 }
 0x4a7   : > { %v2597_v54 = vmul.f32 %v2588_v58, %v6603_v59 }
 0x4aa   : > { %2825 = vrot.lane.b32.xlu1 %v2812_v30, %s4744_s11  ;;  %2896 = vrot.lane.b32.xlu0 %v2883_v8, %s4745_s18  ;;  %v6909_v30 = vpop.permute.xlu0 %3316  ;;  %v2732_v8 = vsel %vm547_vm10, %v6493_v60, %v7497_v55  ;;  %v7503_v60 = vld [vmem:[#allocation6_spill] sm:$0xff] }
 0x4ae   : > { %2677 = vrot.lane.b32.xlu1 %v2667_v51, %s4742_s28  ;;  %2748 = vrot.lane.b32.xlu0 %v2738_v48, %s4743_s7  ;;  %v6915_v51 = vpop.permute.xlu1 %3103  ;;  %v2741_v48 = vmul.f32 %v2732_v8, %v6607_v26  ;;  %v6925_v47 = vpop.permute.xlu0 %3174  ;;  %v7508_v8 = vld [vmem:[#allocation4_spill] sm:$0xff] }
 0x4b2   : > { %2610 = vrot.lane.b32.xlu1 %v2598_v33, %s4741_s25  ;;  %2681 = vrot.lane.b32.xlu0 %v2669_v31, %s4742_s28  ;;  %v6927_v33 = vpop.permute.xlu1 %2961  ;;  %v7504_v31 = vld [vmem:[#allocation14_spill] sm:$0xff]  ;;  %v6938_v20 = vpop.permute.xlu0 %3032 }
 0x4b3   : > { %v2447_v55 = vsel %vm7505_vm14, %v7504_v31, %v7503_v60  ;;  %vm7514_vm14 = vcmask 1039360  }
 0x4b4   : > { %v2456_v41 = vmul.f32 %v2447_v55, %v6605_v14 }
 0x4b6   : > { %2756 = vrot.lane.b32.xlu1 %v2742_v15, %s4743_s7  ;;  %2827 = vrot.lane.b32.xlu0 %v2813_v36, %s4744_s11  ;;  %v7506_v15 = vld [vmem:[#allocation16_spill] sm:$0xff]  ;;  %v6943_v58 = vpop.permute.xlu1 %2819  ;;  %v6947_v52 = vpop.permute.xlu0 %2890 }
 0x4b7   : > { %v2518_v36 = vsel %vm325_vm13, %v7499_v2, %v7506_v15  ;;  %v2671_v2 = vmul.f32 %v7502_v16, %v6611_v53 }
 0x4b8   : > { %v2527_v34 = vmul.f32 %v2518_v36, %v6605_v14 }
 0x4ba   : > { %2537 = vrot.lane.b32.xlu1 %v2526_v13, %s4740_s20  ;;  %2608 = vrot.lane.b32.xlu0 %v2597_v54, %s4741_s25  ;;  %v7507_v13 = vld [vmem:[#allocation15_spill] sm:$0xff] }
 0x4bb   : > { %v2600_v54 = vmul.f32 %v7507_v13, %v6611_v53 }
 0x4be   : > { %2683 = vrot.lane.b32.xlu1 %v2670_v50, %s4742_s28  ;;  %2754 = vrot.lane.b32.xlu0 %v2741_v48, %s4743_s7  ;;  %v2519_v50 = vsel %vm325_vm13, %v7506_v15, %v7508_v8  ;;  %v7509_v48 = vld [vmem:[#allocation18_spill] sm:$0xff] }
 0x4bf   : > { %v2528_v55 = vmul.f32 %v2519_v50, %v6607_v26 }
 0x4c2   : > { %2535 = vrot.lane.b32.xlu1 %v2525_v42, %s4740_s20  ;;  %2606 = vrot.lane.b32.xlu0 %v2596_v37, %s4741_s25  ;;  %v2446_v42 = vsel %vm7510_vm15, %v7509_v48, %v7504_v31  ;;  %v2590_v31 = vsel %vm399_vm12, %v6540_v10, %v7507_v13  ;;  %v2454_v10 = vmul.f32 %v6504_v56, %v7509_v48  ;;  %vm7515_vm15 = vmmov %vm7514_vm14 }
 0x4c3   : > { %v2529_v48 = vmul.f32 %v7508_v8, %v6611_v53 }
 0x4c6   : > { %2468 = vrot.lane.b32.xlu1 %v2456_v41, %s4739_s17  ;;  %2539 = vrot.lane.b32.xlu0 %v2527_v34, %s4740_s20  ;;  %v2455_v41 = vmul.f32 %v2446_v42, %v6603_v59  ;;  %v7511_v34 = vld [vmem:[#allocation19_spill] sm:$0xff]  ;;  %v2599_v42 = vmul.f32 %v2590_v31, %v6607_v26 }
 0x4ca   : > { %2614 = vrot.lane.b32.xlu1 %v2600_v54, %s4741_s25  ;;  %2685 = vrot.lane.b32.xlu0 %v2671_v2, %s4742_s28  ;;  %v7512_v54 = vld [vmem:[#allocation17_spill] sm:$0xff] }
 0x4cb   : > { %v4229_v15 = vsel %vm280_vm6, %v7512_v54, %v7511_v34 }
 0x4cc   : > { %v3471_v37 = vpop.permute.xlu1 %3470  ;;  %v3469_v36 = vpop.permute.xlu0 %3468  ;;  %v4238_v50 = vmul.f32 %v4229_v15, %v6605_v14 }
 0x4cd   : > { %v3477_v16 = vsel %vm7492_vm2, %v3469_v36, %v3471_v37 }
 0x4ce   : > { %2541 = vrot.lane.b32.xlu1 %v2528_v55, %s4740_s20  ;;  %2466 = vrot.lane.b32.xlu0 %v2455_v41, %s4739_s17  ;;  %v4237_v41 = vmul.f32 %v7512_v54, %v6603_v59 }
 0x4cf   : > { %4382 = vmatprep.subr.mxu0 %v3477_v16 }
 0x4d0   : > { %v3398_v2 = vpop.permute.xlu1 %3397  ;;  %v3467_v19 = vpop.permute.xlu0 %3466 }
 0x4d1   : > { %v3476_v55 = vsel %vm7513_vm3, %v3467_v19, %v3469_v36  ;;  %v7516_v36 = vld [vmem:[#allocation21_spill] sm:$0xff]  ;;  %vm7517_vm3 = vmmov %vm7492_vm2 }
 0x4d2   : > { %4249 = vrot.lane.b32.xlu1 %v4238_v50, %s4747_s30  ;;  %2612 = vrot.lane.b32.xlu0 %v2599_v42, %s4741_s25  ;;  %v2458_v31 = vmul.f32 %v7516_v36, %v6611_v53  ;;  %v7518_v50 = vld [vmem:[#allocation20_spill] sm:$0xff]  ;;  %v7519_v42 = vld [vmem:[#allocation23_spill] sm:$0xff] }
 0x4d3   : > { %4383 = vmatpush1.msra.mxu0 %v3476_v55  ;;  %v4159_v55 = vsel %vm354_vm7, %v7519_v42, %v7518_v50 }
 0x4d4   : > { %v3396_v1 = vpop.permute.xlu1 %3395  ;;  %v3400_v13 = vpop.permute.xlu0 %3399 }
 0x4d5   : > { %v3405_v16 = vsel %vm7514_vm14, %v3396_v1, %v3398_v2  ;;  %v3406_v15 = vsel %vm7515_vm15, %v3398_v2, %v3400_v13  ;;  %vm7523_vm14 = vcmask 449536  }
 0x4d6   : > { %4247 = vrot.lane.b32.xlu1 %v4237_v41, %s4747_s30  ;;  %2464 = vrot.lane.b32.xlu0 %v2454_v10, %s4739_s17  ;;  %v7520_v41 = vld [vmem:[#allocation5_spill] sm:$0xff] }
 0x4d7   : > { %4384 = vmatprep.subr.mxu0 %v3406_v15  ;;  %v4230_v8 = vsel %vm280_vm6, %v7511_v34, %v7520_v41  ;;  %v7521_v15 = vld [vmem:[#allocation22_spill] sm:$0xff] }
 0x4d8   : > { %4385 = vmatpush1.msra.mxu0 %v3405_v16  ;;  %v6983_v19 = vpop.permute.xlu1 %3320  ;;  %v3473_v54 = vpop.permute.xlu0 %3472  ;;  %v4168_v16 = vmul.f32 %v4159_v55, %v6607_v26 }
 0x4d9   : > { %4386 = vmatprep.subr.mxu0 %v6605_v14  ;;  %v3479_v1 = vsel %vm7492_vm2, %v3473_v54, %v6863_v12  ;;  %v3478_v2 = vsel %vm7517_vm3, %v3471_v37, %v3473_v54  ;;  %v4239_v54 = vmul.f32 %v4230_v8, %v6607_v26  ;;  %vm7524_vm2 = vmmov %vm7515_vm15  ;;  %vm7529_vm3 = vcmask 64512  }
 0x4da   : > { %4387 = vmatpush1.msra.mxu0 %v6603_v59  ;;  %2472 = vrot.lane.b32.xlu1 %v2458_v31, %s4739_s17  ;;  %v7522_v31 = vld [vmem:[#allocation26_spill] sm:$0xff] }
 0x4db   : > { %2543 = vrot.lane.b32.xlu0 %v2529_v48, %s4740_s20  ;;  %4453 = vmatprep.subr.mxu1 %v3479_v1  ;;  %v4087_v12 = vsel %vm428_vm8, %v7522_v31, %v7521_v15  ;;  %v2448_v48 = vsel %vm7523_vm14, %v7503_v60, %v7516_v36  ;;  %vm7530_vm14 = vmmov %vm7529_vm3 }
 0x4dc   : > { %4454 = vmatpush1.msra.mxu1 %v3478_v2  ;;  %v3248_v10 = vpop.permute.xlu1 %3247  ;;  %v3319_v37 = vpop.permute.xlu0 %3318  ;;  %v4096_v2 = vmul.f32 %v4087_v12, %v6605_v14  ;;  %v2457_v43 = vmul.f32 %v2448_v48, %v6607_v26  ;;  %v7526_v12 = vld [vmem:[#allocation7_spill] sm:$0xff] }
 0x4dd   : > { %v3327_v34 = vsel %vm1159_vm1, %v3319_v37, %v6983_v19  ;;  %v3326_v1 = vsel %vm1159_vm1, %v6909_v30, %v3319_v37  ;;  %v4158_v37 = vsel %vm354_vm7, %v7526_v12, %v7519_v42 }
 0x4de   : > { %4180 = vrot.lane.b32.xlu1 %v4168_v16, %s4746_s24  ;;  %4388 = vmatprep.subr.mxu0 %v3327_v34  ;;  %v7525_v16 = vld [vmem:[#allocation24_spill] sm:$0xff] }
 0x4df   : > { %4251 = vrot.lane.b32.xlu0 %v4239_v54, %s4747_s30  ;;  %4389 = vmatpush1.msra.mxu0 %v3326_v1  ;;  %v4231_v30 = vsel %vm280_vm6, %v7520_v41, %v7525_v16  ;;  %v4095_v41 = vmul.f32 %v7522_v31, %v6603_v59  ;;  %v7527_v1 = vld [vmem:[#allocation25_spill] sm:$0xff] }
 0x4e0   : > { %v7017_v55 = vpop.permute.xlu1 %3178  ;;  %v3402_v8 = vpop.permute.xlu0 %3401  ;;  %v4240_v54 = vmul.f32 %v4231_v30, %v6611_v53 }
 0x4e1   : > { %v3408_v60 = vsel %vm7515_vm15, %v3402_v8, %v6881_v32  ;;  %v3407_v36 = vsel %vm7524_vm2, %v3400_v13, %v3402_v8  ;;  %v4167_v32 = vmul.f32 %v4158_v37, %v6605_v14  ;;  %v3255_v13 = vsel %vm1085_vm0, %v6893_v9, %v3248_v10 }
 0x4e2   : > { %4107 = vrot.lane.b32.xlu1 %v4096_v2, %s4745_s18  ;;  %4455 = vmatprep.subr.mxu1 %v3408_v60  ;;  %v4017_v2 = vsel %vm502_vm9, %v7527_v1, %v6631_v45  ;;  %v4166_v60 = vmul.f32 %v7526_v12, %v6603_v59  ;;  %vm7534_vm2 = vcmask 449536  }
 0x4e3   : > { %2470 = vrot.lane.b32.xlu0 %v2457_v43, %s4739_s17  ;;  %4456 = vmatpush1.msra.mxu1 %v3407_v36  ;;  %v7528_v36 = vld [vmem:[#allocation28_spill] sm:$0xff]  ;;  %v4026_v31 = vmul.f32 %v4017_v2, %v6607_v26  ;;  %v3945_v2 = vsel %vm547_vm10, %v6646_v57, %v6601_v38 }
 0x4e4   : > { %v3325_v48 = vpop.permute.xlu1 %3324  ;;  %v3250_v34 = vpop.permute.xlu0 %3249  ;;  %4457 = vmatprep.subr.mxu1 %v6611_v53  ;;  %v4088_v30 = vsel %vm428_vm8, %v7521_v15, %v7528_v36 }
 0x4e5   : > { %4458 = vmatpush1.msra.mxu1 %v6607_v26  ;;  %v3256_v43 = vsel %vm1085_vm0, %v3248_v10, %v3250_v34  ;;  %v4097_v12 = vmul.f32 %v4088_v30, %v6607_v26 }
 0x4e6   : > { %4253 = vrot.lane.b32.xlu1 %v4240_v54, %s4747_s30  ;;  %4390 = vmatprep.subr.mxu0 %v3256_v43 }
 0x4e7   : > { %4178 = vrot.lane.b32.xlu0 %v4167_v32, %s4746_s24  ;;  %4391 = vmatpush1.msra.mxu0 %v3255_v13 }
 0x4e8   : > { %v3106_v42 = vpop.permute.xlu1 %3105  ;;  %v3177_v8 = vpop.permute.xlu0 %3176 }
 0x4e9   : > { %v3185_v9 = vsel %vm7529_vm3, %v3177_v8, %v7017_v55  ;;  %v3184_v10 = vsel %vm7530_vm14, %v6925_v47, %v3177_v8  ;;  %v7531_v47 = vld [vmem:[#allocation27_spill] sm:$0xff]  ;;  %vm7535_vm3 = vmmov %vm7534_vm2 }
 0x4ea   : > { %4105 = vrot.lane.b32.xlu1 %v4095_v41, %s4745_s18  ;;  %4392 = vmatprep.subr.mxu0 %v3185_v9  ;;  %v4170_v43 = vmul.f32 %v6504_v56, %v7531_v47  ;;  %v4241_v41 = vmul.f32 %v6504_v56, %v7525_v16  ;;  %v3954_v16 = vmul.f32 %v3945_v2, %v6605_v14 }
 0x4eb   : > { %4176 = vrot.lane.b32.xlu0 %v4166_v60, %s4746_s24  ;;  %4393 = vmatpush1.msra.mxu0 %v3184_v10 }
 0x4ec   : > { %v3252_v37 = vpop.permute.xlu1 %3251  ;;  %v3323_v54 = vpop.permute.xlu0 %3322 }
 0x4ed   : > { %v3329_v15 = vsel %vm1159_vm1, %v3323_v54, %v3325_v48  ;;  %v3328_v32 = vsel %vm1159_vm1, %v6983_v19, %v3323_v54  ;;  %v4016_v19 = vsel %vm502_vm9, %v6609_v7, %v7527_v1  ;;  %vm7532_vm1 = vcmask 72704  }
 0x4ee   : > { %4038 = vrot.lane.b32.xlu1 %v4026_v31, %s4744_s11  ;;  %4459 = vmatprep.subr.mxu1 %v3329_v15  ;;  %vm7533_vm15 = vmmov %vm7532_vm1  ;;  %v4025_v9 = vmul.f32 %v4016_v19, %v6605_v14  ;;  %v4089_v1 = vsel %vm428_vm8, %v7528_v36, %v6617_v61 }
 0x4ef   : > { %4109 = vrot.lane.b32.xlu0 %v4097_v12, %s4745_s18  ;;  %4460 = vmatpush1.msra.mxu1 %v3328_v32  ;;  %v3113_v60 = vsel %vm7533_vm15, %v6915_v51, %v3106_v42  ;;  %v3257_v51 = vsel %vm1085_vm0, %v3250_v34, %v3252_v37  ;;  %v4098_v12 = vmul.f32 %v4089_v1, %v6611_v53  ;;  %vm7538_vm15 = vmmov %vm7532_vm1 }
 0x4f0   : > { %v7065_v13 = vpop.permute.xlu1 %3036  ;;  %v3108_v48 = vpop.permute.xlu0 %3107  ;;  %v3803_v1 = vsel %vm399_vm12, %v6720_v62, %v6671_v44 }
 0x4f1   : > { %v3114_v8 = vsel %vm7532_vm1, %v3106_v42, %v3108_v48  ;;  %v4160_v42 = vsel %vm354_vm7, %v7518_v50, %v7531_v47  ;;  %v3953_v50 = vmul.f32 %v6646_v57, %v6603_v59 }
 0x4f2   : > { %4184 = vrot.lane.b32.xlu1 %v4170_v43, %s4746_s24  ;;  %4394 = vmatprep.subr.mxu0 %v3114_v8  ;;  %v4169_v36 = vmul.f32 %v4160_v42, %v6611_v53 }
 0x4f3   : > { %4255 = vrot.lane.b32.xlu0 %v4241_v41, %s4747_s30  ;;  %4395 = vmatpush1.msra.mxu0 %v3113_v60  ;;  %v4024_v41 = vmul.f32 %v6609_v7, %v6603_v59 }
 0x4f4   : > { %v3183_v30 = vpop.permute.xlu1 %3182  ;;  %v3254_v10 = vpop.permute.xlu0 %3253 }
 0x4f5   : > { %v3258_v31 = vsel %vm1085_vm0, %v3252_v37, %v3254_v10  ;;  %v3875_v37 = vsel %vm473_vm11, %v6634_v17, %v6701_v6  ;;  %vm7536_vm0 = vmmov %vm7530_vm14 }
 0x4f6   : > { %3965 = vrot.lane.b32.xlu1 %v3954_v16, %s4743_s7  ;;  %4461 = vmatprep.subr.mxu1 %v3258_v31  ;;  %vm7537_vm14 = vmmov %vm7536_vm0  ;;  %v3884_v19 = vmul.f32 %v3875_v37, %v6607_v26  ;;  %v3882_v37 = vmul.f32 %v6684_v63, %v6603_v59 }
 0x4f7   : > { %4036 = vrot.lane.b32.xlu0 %v4025_v9, %s4744_s11  ;;  %4462 = vmatpush1.msra.mxu1 %v3257_v51  ;;  %v4099_v9 = vmul.f32 %v6504_v56, %v6617_v61  ;;  %v3812_v61 = vmul.f32 %v3803_v1, %v6605_v14 }
 0x4f8   : > { %v2964_v54 = vpop.permute.xlu1 %2963  ;;  %v3035_v15 = vpop.permute.xlu0 %3034 }
 0x4f9   : > { %v3043_v32 = vsel %vm7534_vm2, %v3035_v15, %v7065_v13  ;;  %v3042_v43 = vsel %vm7535_vm3, %v6938_v20, %v3035_v15  ;;  %v3946_v20 = vsel %vm547_vm10, %v6601_v38, %v6665_v35  ;;  %v2971_v16 = vsel %vm325_vm13, %v6927_v33, %v2964_v54  ;;  %vm7539_vm3 = vmmov %vm7534_vm2 }
 0x4fa   : > { %4111 = vrot.lane.b32.xlu1 %v4098_v12, %s4745_s18  ;;  %4396 = vmatprep.subr.mxu0 %v3043_v32  ;;  %v3955_v7 = vmul.f32 %v3946_v20, %v6607_v26  ;;  %v3874_v33 = vsel %vm473_vm11, %v6684_v63, %v6634_v17 }
 0x4fb   : > { %4182 = vrot.lane.b32.xlu0 %v4169_v36, %s4746_s24  ;;  %4397 = vmatpush1.msra.mxu0 %v3042_v43  ;;  %v3883_v12 = vmul.f32 %v3874_v33, %v6605_v14  ;;  %v4018_v36 = vsel %vm502_vm9, %v6631_v45, %v6649_v5 }
 0x4fc   : > { %v3110_v34 = vpop.permute.xlu1 %3109  ;;  %v3181_v47 = vpop.permute.xlu0 %3180  ;;  %v4027_v43 = vmul.f32 %v4018_v36, %v6611_v53 }
 0x4fd   : > { %v3187_v2 = vsel %vm7536_vm0, %v3181_v47, %v3183_v30  ;;  %v3186_v57 = vsel %vm7537_vm14, %v7017_v55, %v3181_v47  ;;  %v4028_v55 = vmul.f32 %v6504_v56, %v6649_v5  ;;  %v3115_v51 = vsel %vm7538_vm15, %v3108_v48, %v3110_v34  ;;  %vm7540_vm0 = vmmov %vm7534_vm2 }
 0x4fe   : > { %3963 = vrot.lane.b32.xlu1 %v3953_v50, %s4743_s7  ;;  %4463 = vmatprep.subr.mxu1 %v3187_v2  ;;  %vm7541_vm14 = vmmov %vm7532_vm1  ;;  %vm7543_vm15 = vcmask 64512  }
 0x4ff   : > { %4034 = vrot.lane.b32.xlu0 %v4024_v41, %s4744_s11  ;;  %4464 = vmatpush1.msra.mxu1 %v3186_v57  ;;  %v3804_v41 = vsel %vm399_vm12, %v6671_v44, %v6736_v24 }
 0x500   : > { %v7116_v8 = vpop.permute.xlu1 %2894  ;;  %v2966_v60 = vpop.permute.xlu0 %2965  ;;  %v3813_v57 = vmul.f32 %v3804_v41, %v6607_v26 }
 0x501   : > { %v2972_v38 = vsel %vm325_vm13, %v2964_v54, %v2966_v60  ;;  %v3947_v54 = vsel %vm547_vm10, %v6665_v35, %v6687_v3 }
 0x502   : > { %3896 = vrot.lane.b32.xlu1 %v3884_v19, %s4742_s28  ;;  %4398 = vmatprep.subr.mxu0 %v2972_v38  ;;  %v3956_v32 = vmul.f32 %v3947_v54, %v6611_v53 }
 0x503   : > { %3967 = vrot.lane.b32.xlu0 %v3955_v7, %s4743_s7  ;;  %4399 = vmatpush1.msra.mxu0 %v2971_v16  ;;  %v3957_v16 = vmul.f32 %v6504_v56, %v6687_v3 }
 0x504   : > { %v3041_v30 = vpop.permute.xlu1 %3040  ;;  %v3112_v10 = vpop.permute.xlu0 %3111 }
 0x505   : > { %v3116_v31 = vsel %vm7532_vm1, %v3110_v34, %v3112_v10  ;;  %v3805_v10 = vsel %vm399_vm12, %v6736_v24, %v6757_v18  ;;  %vm7542_vm1 = vmmov %vm7540_vm0 }
 0x506   : > { %4042 = vrot.lane.b32.xlu1 %v4028_v55, %s4744_s11  ;;  %4465 = vmatprep.subr.mxu1 %v3116_v31  ;;  %v3661_v55 = vsel %vm7540_vm0, %v6787_v49, %v6739_v22 }
 0x507   : > { %4113 = vrot.lane.b32.xlu0 %v4099_v9, %s4745_s18  ;;  %4466 = vmatpush1.msra.mxu1 %v3115_v51  ;;  %v3670_v1 = vmul.f32 %v3661_v55, %v6605_v14  ;;  %v7546_v55 = vld [vmem:[#allocation30_spill] sm:$0xff] }
 0x508   : > { %v2822_v42 = vpop.permute.xlu1 %2821  ;;  %v2893_v17 = vpop.permute.xlu0 %2892 }
 0x509   : > { %v2900_v48 = vsel %vm399_vm12, %v6947_v52, %v2893_v17  ;;  %v2901_v15 = vsel %vm399_vm12, %v2893_v17, %v7116_v8  ;;  %v3811_v52 = vmul.f32 %v6720_v62, %v6603_v59  ;;  %v2829_v20 = vsel %vm473_vm11, %v6943_v58, %v2822_v42 }
 0x50a   : > { %3823 = vrot.lane.b32.xlu1 %v3812_v61, %s4741_s25  ;;  %4400 = vmatprep.subr.mxu0 %v2901_v15  ;;  %v3886_v58 = vmul.f32 %v6504_v56, %v6723_v40  ;;  %v3814_v61 = vmul.f32 %v3805_v10, %v6611_v53  ;;  %v3591_v17 = vsel %vm7541_vm14, %v6779_v21, %v6841_v27  ;;  %v7551_v10 = vld [vmem:[#allocation29_spill] sm:$0xff] }
 0x50b   : > { %3894 = vrot.lane.b32.xlu0 %v3883_v12, %s4742_s28  ;;  %4401 = vmatpush1.msra.mxu0 %v2900_v48  ;;  %v3662_v48 = vsel %vm7542_vm1, %v6739_v22, %v6807_v4 }
 0x50c   : > { %v2968_v35 = vpop.permute.xlu1 %2967  ;;  %v3039_v50 = vpop.permute.xlu0 %3038 }
 0x50d   : > { %v3044_v45 = vsel %vm7534_vm2, %v7065_v13, %v3039_v50  ;;  %v3045_v5 = vsel %vm7539_vm3, %v3039_v50, %v3041_v30  ;;  %v3733_v13 = vsel %vm325_vm13, %v6707_v28, %v6773_v29  ;;  %v2973_v7 = vsel %vm325_vm13, %v2966_v60, %v2968_v35  ;;  %vm7544_vm2 = vmmov %vm7541_vm14 }
 0x50e   : > { %3969 = vrot.lane.b32.xlu1 %v3956_v32, %s4743_s7  ;;  %4467 = vmatprep.subr.mxu1 %v3045_v5  ;;  %v3742_v63 = vmul.f32 %v3733_v13, %v6607_v26  ;;  %v3732_v60 = vsel %vm325_vm13, %v6754_v23, %v6707_v28  ;;  %v3876_v28 = vsel %vm473_vm11, %v6701_v6, %v6723_v40  ;;  %vm7545_vm3 = vmmov %vm7540_vm0  ;;  %vm7549_vm14 = vcmask 719872  }
 0x50f   : > { %4040 = vrot.lane.b32.xlu0 %v4027_v43, %s4744_s11  ;;  %4468 = vmatpush1.msra.mxu1 %v3044_v45  ;;  %v3741_v3 = vmul.f32 %v3732_v60, %v6605_v14  ;;  %v3885_v24 = vmul.f32 %v3876_v28, %v6611_v53  ;;  %v3669_v6 = vmul.f32 %v6787_v49, %v6603_v59  ;;  %v4722_v45 = vld [vmem:[#allocation2 + $0x28] sm:$0xff]  ;;  %vm7547_vm0 = vmmov %vm7543_vm15 }
 0x510   : > { %v7161_v34 = vpop.permute.xlu1 %2752  ;;  %v7168_v47 = vpop.permute.xlu0 %2823  ;;  %v3744_v5 = vmul.f32 %v4722_v45, %v6791_v39  ;;  %v3519_v13 = vsel %vm7543_vm15, %v6860_v46, %v6813_v11  ;;  %v4270_v60 = vld [vmem:[%s7378_s3 + $0x8] sm:$0xff]  ;;  %vm7550_vm1 = vmmov %vm7549_vm14 }
 0x511   : > { %v2830_v62 = vsel %vm473_vm11, %v2822_v42, %v7168_v47  ;;  %4682 = vmatprep.mubr.msk.f32.mxu0 %vm7549_vm14, %v4270_v60  ;;  %4683 = vmatprep.mubr.msk.f32.mxu1 %vm7550_vm1, %v4270_v60  ;;  %vm7552_vm15 = vmmov %vm7544_vm2 }
 0x512   : > { %3821 = vrot.lane.b32.xlu1 %v3811_v52, %s4741_s25  ;;  %4402 = vmatprep.subr.mxu0 %v2830_v62  ;;  %v3590_v62 = vsel %vm7544_vm2, %v6826_v25, %v6779_v21  ;;  %v3734_v21 = vsel %vm325_vm13, %v6773_v29, %v6791_v39  ;;  %v3527_v29 = vmul.f32 %v6860_v46, %v6603_v59  ;;  %vm7553_vm2 = vmmov %vm7547_vm0 }
 0x513   : > { %3892 = vrot.lane.b32.xlu0 %v3882_v37, %s4742_s28  ;;  %4403 = vmatpush1.msra.mxu0 %v2829_v20  ;;  %v3815_v37 = vmul.f32 %v4722_v45, %v6757_v18  ;;  %v3528_v20 = vmul.f32 %v3519_v13, %v6605_v14 }
 0x514   : > { %v2899_v2 = vpop.permute.xlu1 %2898  ;;  %v2970_v19 = vpop.permute.xlu0 %2969 }
 0x515   : > { %v2974_v44 = vsel %vm325_vm13, %v2968_v35, %v2970_v19  ;;  %v3671_v35 = vmul.f32 %v3662_v48, %v6607_v26 }
 0x516   : > { %3754 = vrot.lane.b32.xlu1 %v3742_v63, %s4740_s20  ;;  %4469 = vmatprep.subr.mxu1 %v2974_v44  ;;  %v3599_v63 = vmul.f32 %v3590_v62, %v6605_v14 }
 0x517   : > { %3825 = vrot.lane.b32.xlu0 %v3813_v57, %s4741_s25  ;;  %4470 = vmatpush1.msra.mxu1 %v2973_v7 }
 0x518   : > { %v2680_v38 = vpop.permute.xlu1 %2679  ;;  %v2751_v30 = vpop.permute.xlu0 %2750 }
 0x519   : > { %v2759_v9 = vsel %vm547_vm10, %v2751_v30, %v7161_v34 }
 0x51a   : > { %3900 = vrot.lane.b32.xlu1 %v3886_v58, %s4742_s28  ;;  %4404 = vmatprep.subr.mxu0 %v2759_v9  ;;  %v7548_v9 = vld [vmem:[#allocation8_spill] sm:$0xff] }
 0x51b   : > { %3971 = vrot.lane.b32.xlu0 %v3957_v16, %s4743_s7 }
 0x51c   : > { %v2826_v56 = vpop.permute.xlu1 %2825  ;;  %v2897_v33 = vpop.permute.xlu0 %2896 }
 0x51d   : > { %v2902_v31 = vsel %vm399_vm12, %v7116_v8, %v2897_v33  ;;  %v2903_v51 = vsel %vm399_vm12, %v2897_v33, %v2899_v2  ;;  %v3740_v8 = vmul.f32 %v6754_v23, %v6603_v59  ;;  %v3600_v23 = vmul.f32 %v3591_v17, %v6607_v26 }
 0x51e   : > { %3681 = vrot.lane.b32.xlu1 %v3670_v1, %s4739_s17  ;;  %4471 = vmatprep.subr.mxu1 %v2903_v51  ;;  %v2831_v50 = vsel %vm473_vm11, %v7168_v47, %v2826_v56  ;;  %v3663_v2 = vsel %vm7545_vm3, %v6807_v4, %v6829_v0  ;;  %v3743_v4 = vmul.f32 %v3734_v21, %v6611_v53 }
 0x51f   : > { %3752 = vrot.lane.b32.xlu0 %v3741_v3, %s4740_s20  ;;  %4472 = vmatpush1.msra.mxu1 %v2902_v31  ;;  %v3672_v14 = vmul.f32 %v3663_v2, %v6611_v53  ;;  %v3520_v53 = vsel %vm7547_vm0, %v6813_v11, %v7546_v55  ;;  %v3531_v33 = vmul.f32 %v4722_v45, %v7551_v10  ;;  %vm7554_vm0 = vmmov %vm7545_vm3 }
 0x520   : > { %v2678_v42 = vpop.permute.xlu1 %2677  ;;  %v2749_v12 = vpop.permute.xlu0 %2748  ;;  %v3529_v11 = vmul.f32 %v3520_v53, %v6607_v26  ;;  %v3673_v31 = vmul.f32 %v4722_v45, %v6829_v0  ;;  %v3592_v51 = vsel %vm7552_vm15, %v6841_v27, %v7548_v9  ;;  %v3521_v0 = vsel %vm7553_vm2, %v7546_v55, %v7551_v10  ;;  %vm7555_vm14 = vmmov %vm7554_vm0 }
 0x521   : > { %v2758_v54 = vsel %vm547_vm10, %v2749_v12, %v2751_v30  ;;  %v2687_v15 = vsel %vm502_vm9, %v2678_v42, %v2680_v38  ;;  %vm7556_vm1 = vmmov %vm7554_vm0 }
 0x522   : > { %3827 = vrot.lane.b32.xlu1 %v3814_v61, %s4741_s25  ;;  %4405 = vmatpush1.msra.mxu0 %v2758_v54 }
 0x523   : > { %3898 = vrot.lane.b32.xlu0 %v3885_v24, %s4742_s28  ;;  %v4723_v24 = vld [vmem:[#allocation2 + $0x18] sm:$0xff] }
 0x524   : > { %v7219_v40 = vpop.permute.xlu1 %2610  ;;  %v7226_v36 = vpop.permute.xlu0 %2681  ;;  %v3601_v12 = vmul.f32 %v4723_v24, %v3592_v51  ;;  %v3530_v17 = vmul.f32 %v4723_v24, %v3521_v0 }
 0x525   : > { %v2688_v49 = vsel %vm502_vm9, %v2680_v38, %v7226_v36 }
 0x526   : > { %3679 = vrot.lane.b32.xlu1 %v3669_v6, %s4739_s17  ;;  %4406 = vmatprep.subr.mxu0 %v2688_v49 }
 0x527   : > { %3750 = vrot.lane.b32.xlu0 %v3740_v8, %s4740_s20  ;;  %4407 = vmatpush1.msra.mxu0 %v2687_v15 }
 0x528   : > { %v2757_v32 = vpop.permute.xlu1 %2756  ;;  %v2828_v43 = vpop.permute.xlu0 %2827 }
 0x529   : > { %v2832_v22 = vsel %vm473_vm11, %v2826_v56, %v2828_v43 }
 0x52a   : > { %3612 = vrot.lane.b32.xlu1 %v3600_v23, %s4738_s12  ;;  %4473 = vmatprep.subr.mxu1 %v2832_v22 }
 0x52b   : > { %3683 = vrot.lane.b32.xlu0 %v3671_v35, %s4739_s17  ;;  %4474 = vmatpush1.msra.mxu1 %v2831_v50 }
 0x52c   : > { %v2538_v52 = vpop.permute.xlu1 %2537  ;;  %v2609_v41 = vpop.permute.xlu0 %2608 }
 0x52d   : > { %v2617_v47 = vsel %vm428_vm8, %v2609_v41, %v7219_v40 }
 0x52e   : > { %3758 = vrot.lane.b32.xlu1 %v3744_v5, %s4740_s20  ;;  %4408 = vmatprep.subr.mxu0 %v2617_v47 }
 0x52f   : > { %3829 = vrot.lane.b32.xlu0 %v3815_v37, %s4741_s25 }
 0x530   : > { %v2684_v18 = vpop.permute.xlu1 %2683  ;;  %v2755_v57 = vpop.permute.xlu0 %2754 }
 0x531   : > { %v2760_v19 = vsel %vm547_vm10, %v7161_v34, %v2755_v57  ;;  %v2761_v44 = vsel %vm547_vm10, %v2755_v57, %v2757_v32  ;;  %v3598_v34 = vmul.f32 %v6826_v25, %v6603_v59  ;;  %v3602_v59 = vmul.f32 %v4722_v45, %v7548_v9 }
 0x532   : > { %3539 = vrot.lane.b32.xlu1 %v3528_v20, %s4737_s9  ;;  %4475 = vmatprep.subr.mxu1 %v2761_v44  ;;  %v2689_v3 = vsel %vm502_vm9, %v7226_v36, %v2684_v18 }
 0x533   : > { %3610 = vrot.lane.b32.xlu0 %v3599_v63, %s4738_s12  ;;  %4476 = vmatpush1.msra.mxu1 %v2760_v19 }
 0x534   : > { %v2536_v7 = vpop.permute.xlu1 %2535  ;;  %v2607_v58 = vpop.permute.xlu0 %2606 }
 0x535   : > { %v2616_v38 = vsel %vm428_vm8, %v2607_v58, %v2609_v41  ;;  %v2545_v46 = vsel %vm354_vm7, %v2536_v7, %v2538_v52 }
 0x536   : > { %3685 = vrot.lane.b32.xlu1 %v3672_v14, %s4739_s17  ;;  %4409 = vmatpush1.msra.mxu0 %v2616_v38 }
 0x537   : > { %3756 = vrot.lane.b32.xlu0 %v3743_v4, %s4740_s20 }
 0x538   : > { %v7275_v39 = vpop.permute.xlu1 %2468  ;;  %v2540_v16 = vpop.permute.xlu0 %2539 }
 0x539   : > { %v2546_v30 = vsel %vm354_vm7, %v2538_v52, %v2540_v16 }
 0x53a   : > { %3537 = vrot.lane.b32.xlu1 %v3527_v29, %s4737_s9  ;;  %4410 = vmatprep.subr.mxu0 %v2546_v30 }
 0x53b   : > { %3608 = vrot.lane.b32.xlu0 %v3598_v34, %s4738_s12  ;;  %4411 = vmatpush1.msra.mxu0 %v2545_v46 }
 0x53c   : > { %v2615_v25 = vpop.permute.xlu1 %2614  ;;  %v2686_v1 = vpop.permute.xlu0 %2685 }
 0x53d   : > { %v2690_v56 = vsel %vm502_vm9, %v2684_v18, %v2686_v1 }
 0x53e   : > { %3616 = vrot.lane.b32.xlu1 %v3602_v59, %s4738_s12  ;;  %4477 = vmatprep.subr.mxu1 %v2690_v56 }
 0x53f   : > { %3541 = vrot.lane.b32.xlu0 %v3529_v11, %s4737_s9  ;;  %4478 = vmatpush1.msra.mxu1 %v2689_v3 }
 0x540   : > { %v2542_v28 = vpop.permute.xlu1 %2541  ;;  %v2467_v26 = vpop.permute.xlu0 %2466 }
 0x541   : > { %v2475_v61 = vsel %vm280_vm6, %v2467_v26, %v7275_v39 }
 0x542   : > { %3545 = vrot.lane.b32.xlu1 %v3531_v33, %s4737_s9  ;;  %4412 = vmatprep.subr.mxu0 %v2475_v61 }
 0x543   : > { %3687 = vrot.lane.b32.xlu0 %v3673_v31, %s4739_s17 }
 0x544   : > { %v4250_v42 = vpop.permute.xlu1 %4249  ;;  %v2613_v54 = vpop.permute.xlu0 %2612 }
 0x545   : > { %v2618_v6 = vsel %vm428_vm8, %v7219_v40, %v2613_v54  ;;  %v2619_v27 = vsel %vm428_vm8, %v2613_v54, %v2615_v25  ;;  %v2547_v40 = vsel %vm354_vm7, %v2540_v16, %v2542_v28 }
 0x546   : > { %4479 = vmatprep.subr.mxu1 %v2619_v27 }
 0x547   : > { %3614 = vrot.lane.b32.xlu0 %v3601_v12, %s4738_s12  ;;  %4480 = vmatpush1.msra.mxu1 %v2618_v6 }
 0x548   : > { %v4248_v8 = vpop.permute.xlu1 %4247  ;;  %v2465_v36 = vpop.permute.xlu0 %2464 }
 0x549   : > { %v2474_v48 = vsel %vm280_vm6, %v2465_v36, %v2467_v26  ;;  %v4257_v22 = vsel %vm7554_vm0, %v4248_v8, %v4250_v42 }
 0x54a   : > { %4413 = vmatpush1.msra.mxu0 %v2474_v48 }
 0x54b   : > { %3543 = vrot.lane.b32.xlu0 %v3530_v17, %s4737_s9  ;;  %s4687_s9 = sshll.u32 %s7558_s16, 5 }
 0x54c   : > { %v2473_v49 = vpop.permute.xlu1 %2472  ;;  %s197_s20 = scalar_lea.vmem %s7379_s4, %s4687_s9 }
 0x54d   : > { %v2544_v15 = vpop.permute.xlu0 %2543 }
 0x54e   : > { %v2548_v23 = vsel %vm354_vm7, %v2542_v28, %v2544_v15 }
 0x54f   : > { %4481 = vmatprep.subr.mxu1 %v2548_v23 }
 0x550   : > { %4482 = vmatpush1.msra.mxu1 %v2547_v40  ;;  %v4181_v32 = vpop.permute.xlu1 %4180 }
 0x551   : > { %v4252_v35 = vpop.permute.xlu0 %4251 }
 0x552   : > { %v4258_v43 = vsel %vm7545_vm3, %v4250_v42, %v4252_v35 }
 0x553   : > { %4424 = vmatprep.subr.mxu0 %v4258_v43 }
 0x554   : > { %4425 = vmatpush2.msra.mxu0 %v4257_v22  ;;  %v4108_v50 = vpop.permute.xlu1 %4107 }
 0x555   : > { %v2471_v45 = vpop.permute.xlu0 %2470 }
 0x556   : > { %v2476_v5 = vsel %vm280_vm6, %v7275_v39, %v2471_v45  ;;  %v2477_v52 = vsel %vm280_vm6, %v2471_v45, %v2473_v49 }
 0x557   : > { %4483 = vmatprep.subr.mxu1 %v2477_v52 }
 0x558   : > { %4484 = vmatpush1.msra.mxu1 %v2476_v5  ;;  %v4254_v37 = vpop.permute.xlu1 %4253 }
 0x559   : > { %v4179_v13 = vpop.permute.xlu0 %4178  ;;  %v4259_v14 = vsel %vm7556_vm1, %v4252_v35, %v4254_v37 }
 0x55a   : > { %v4187_v41 = vsel %vm325_vm13, %v4179_v13, %v4181_v32 }
 0x55b   : > { %4426 = vmatprep.subr.mxu0 %v4187_v41 }
 0x55c   : > { %v4106_v62 = vpop.permute.xlu1 %4105 }
 0x55d   : > { %v4177_v47 = vpop.permute.xlu0 %4176  ;;  %v4115_v57 = vsel %vm399_vm12, %v4106_v62, %v4108_v50 }
 0x55e   : > { %v4186_v20 = vsel %vm325_vm13, %v4177_v47, %v4179_v13 }
 0x55f   : > { %4427 = vmatpush2.msra.mxu0 %v4186_v20 }
 0x560   : > { %v4039_v18 = vpop.permute.xlu1 %4038 }
 0x561   : > { %v4110_v63 = vpop.permute.xlu0 %4109 }
 0x562   : > { %v4116_v2 = vsel %vm399_vm12, %v4108_v50, %v4110_v63 }
 0x563   : > { %4428 = vmatprep.subr.mxu0 %v4116_v2 }
 0x564   : > { %4429 = vmatpush2.msra.mxu0 %v4115_v57  ;;  %v4185_v21 = vpop.permute.xlu1 %4184 }
 0x565   : > { %v4256_v19 = vpop.permute.xlu0 %4255 }
 0x566   : > { %v4260_v44 = vsel %vm7555_vm14, %v4254_v37, %v4256_v19 }
 0x567   : > { %4495 = vmatprep.subr.mxu1 %v4260_v44 }
 0x568   : > { %4496 = vmatpush2.msra.mxu1 %v4259_v14  ;;  %v3966_v7 = vpop.permute.xlu1 %3965 }
 0x569   : > { %v4037_v4 = vpop.permute.xlu0 %4036 }
 0x56a   : > { %v4045_v58 = vsel %vm473_vm11, %v4037_v4, %v4039_v18 }
 0x56b   : > { %4430 = vmatprep.subr.mxu0 %v4045_v58  ;;  %v4269_v58 = vld [vmem:[%s7378_s3] sm:$0xff] }
 0x56c   : > { %v4112_v38 = vpop.permute.xlu1 %4111 }
 0x56d   : > { %v4183_v29 = vpop.permute.xlu0 %4182  ;;  %v4117_v1 = vsel %vm399_vm12, %v4110_v63, %v4112_v38 }
 0x56e   : > { %v4188_v39 = vsel %vm325_vm13, %v4181_v32, %v4183_v29  ;;  %v4189_v34 = vsel %vm325_vm13, %v4183_v29, %v4185_v21 }
 0x56f   : > { %4497 = vmatprep.subr.mxu1 %v4189_v34 }
 0x570   : > { %4498 = vmatpush2.msra.mxu1 %v4188_v39  ;;  %v3964_v16 = vpop.permute.xlu1 %3963 }
 0x571   : > { %v4035_v55 = vpop.permute.xlu0 %4034  ;;  %v3973_v9 = vsel %vm547_vm10, %v3964_v16, %v3966_v7 }
 0x572   : > { %v4044_v53 = vsel %vm473_vm11, %v4035_v55, %v4037_v4 }
 0x573   : > { %4431 = vmatpush2.msra.mxu0 %v4044_v53 }
 0x574   : > { %v3897_v30 = vpop.permute.xlu1 %3896 }
 0x575   : > { %v3968_v60 = vpop.permute.xlu0 %3967 }
 0x576   : > { %v3974_v46 = vsel %vm547_vm10, %v3966_v7, %v3968_v60 }
 0x577   : > { %4432 = vmatprep.subr.mxu0 %v3974_v46 }
 0x578   : > { %4433 = vmatpush2.msra.mxu0 %v3973_v9  ;;  %v4043_v59 = vpop.permute.xlu1 %4042 }
 0x579   : > { %v4114_v25 = vpop.permute.xlu0 %4113 }
 0x57a   : > { %v4118_v11 = vsel %vm399_vm12, %v4112_v38, %v4114_v25 }
 0x57b   : > { %4499 = vmatprep.subr.mxu1 %v4118_v11 }
 0x57c   : > { %4500 = vmatpush2.msra.mxu1 %v4117_v1  ;;  %v3824_v56 = vpop.permute.xlu1 %3823 }
 0x57d   : > { %v3895_v3 = vpop.permute.xlu0 %3894 }
 0x57e   : > { %v3903_v10 = vsel %vm502_vm9, %v3895_v3, %v3897_v30 }
 0x57f   : > { %4434 = vmatprep.subr.mxu0 %v3903_v10 }
 0x580   : > { %v3970_v33 = vpop.permute.xlu1 %3969 }
 0x581   : > { %v4041_v28 = vpop.permute.xlu0 %4040  ;;  %v3975_v17 = vsel %vm547_vm10, %v3968_v60, %v3970_v33 }
 0x582   : > { %v4046_v31 = vsel %vm473_vm11, %v4039_v18, %v4041_v28  ;;  %v4047_v26 = vsel %vm473_vm11, %v4041_v28, %v4043_v59 }
 0x583   : > { %4501 = vmatprep.subr.mxu1 %v4047_v26 }
 0x584   : > { %4502 = vmatpush2.msra.mxu1 %v4046_v31  ;;  %v3822_v51 = vpop.permute.xlu1 %3821 }
 0x585   : > { %v3893_v61 = vpop.permute.xlu0 %3892  ;;  %v3831_v0 = vsel %vm428_vm8, %v3822_v51, %v3824_v56 }
 0x586   : > { %v3902_v42 = vsel %vm502_vm9, %v3893_v61, %v3895_v3 }
 0x587   : > { %4435 = vmatpush2.msra.mxu0 %v3902_v42 }
 0x588   : > { %v3755_v24 = vpop.permute.xlu1 %3754 }
 0x589   : > { %v3826_v12 = vpop.permute.xlu0 %3825 }
 0x58a   : > { %v3832_v54 = vsel %vm428_vm8, %v3824_v56, %v3826_v12 }
 0x58b   : > { %4436 = vmatprep.subr.mxu0 %v3832_v54 }
 0x58c   : > { %4437 = vmatpush2.msra.mxu0 %v3831_v0  ;;  %v3901_v6 = vpop.permute.xlu1 %3900 }
 0x58d   : > { %v3972_v27 = vpop.permute.xlu0 %3971 }
 0x58e   : > { %v3976_v8 = vsel %vm547_vm10, %v3970_v33, %v3972_v27 }
 0x58f   : > { %4503 = vmatprep.subr.mxu1 %v3976_v8 }
 0x590   : > { %4504 = vmatpush2.msra.mxu1 %v3975_v17  ;;  %v3682_v36 = vpop.permute.xlu1 %3681 }
 0x591   : > { %v3753_v48 = vpop.permute.xlu0 %3752 }
 0x592   : > { %v3761_v49 = vsel %vm354_vm7, %v3753_v48, %v3755_v24 }
 0x593   : > { %4438 = vmatprep.subr.mxu0 %v3761_v49 }
 0x594   : > { %v3828_v15 = vpop.permute.xlu1 %3827 }
 0x595   : > { %v3899_v23 = vpop.permute.xlu0 %3898  ;;  %v3833_v62 = vsel %vm428_vm8, %v3826_v12, %v3828_v15 }
 0x596   : > { %v3904_v40 = vsel %vm502_vm9, %v3897_v30, %v3899_v23  ;;  %v3905_v32 = vsel %vm502_vm9, %v3899_v23, %v3901_v6 }
 0x597   : > { %4505 = vmatprep.subr.mxu1 %v3905_v32 }
 0x598   : > { %4506 = vmatpush2.msra.mxu1 %v3904_v40  ;;  %v3680_v35 = vpop.permute.xlu1 %3679 }
 0x599   : > { %v3751_v43 = vpop.permute.xlu0 %3750  ;;  %v3689_v52 = vsel %vm280_vm6, %v3680_v35, %v3682_v36 }
 0x59a   : > { %v3760_v22 = vsel %vm354_vm7, %v3751_v43, %v3753_v48 }
 0x59b   : > { %4439 = vmatpush2.msra.mxu0 %v3760_v22 }
 0x59c   : > { %v3613_v50 = vpop.permute.xlu1 %3612 }
 0x59d   : > { %v3684_v45 = vpop.permute.xlu0 %3683 }
 0x59e   : > { %v3690_v5 = vsel %vm280_vm6, %v3682_v36, %v3684_v45 }
 0x59f   : > { %4440 = vmatprep.subr.mxu0 %v3690_v5 }
 0x5a0   : > { %4441 = vmatpush2.msra.mxu0 %v3689_v52  ;;  %v3759_v37 = vpop.permute.xlu1 %3758 }
 0x5a1   : > { %v3830_v13 = vpop.permute.xlu0 %3829 }
 0x5a2   : > { %v3834_v41 = vsel %vm428_vm8, %v3828_v15, %v3830_v13 }
 0x5a3   : > { %4507 = vmatprep.subr.mxu1 %v3834_v41 }
 0x5a4   : > { %4508 = vmatpush2.msra.mxu1 %v3833_v62  ;;  %v3540_v47 = vpop.permute.xlu1 %3539 }
 0x5a5   : > { %v3611_v20 = vpop.permute.xlu0 %3610 }
 0x5a6   : > { %v3619_v18 = vsel %vm908_vm5, %v3611_v20, %v3613_v50 }
 0x5a7   : > { %4442 = vmatprep.subr.mxu0 %v3619_v18 }
 0x5a8   : > { %v3686_v57 = vpop.permute.xlu1 %3685 }
 0x5a9   : > { %v3757_v63 = vpop.permute.xlu0 %3756  ;;  %v3691_v34 = vsel %vm280_vm6, %v3684_v45, %v3686_v57 }
 0x5aa   : > { %v3762_v2 = vsel %vm354_vm7, %v3755_v24, %v3757_v63  ;;  %v3763_v21 = vsel %vm354_vm7, %v3757_v63, %v3759_v37 }
 0x5ab   : > { %4509 = vmatprep.subr.mxu1 %v3763_v21 }
 0x5ac   : > { %4510 = vmatpush2.msra.mxu1 %v3762_v2  ;;  %v3538_v14 = vpop.permute.xlu1 %3537 }
 0x5ad   : > { %v3609_v19 = vpop.permute.xlu0 %3608  ;;  %v3547_v38 = vsel %vm982_vm4, %v3538_v14, %v3540_v47 }
 0x5ae   : > { %v3618_v44 = vsel %vm908_vm5, %v3609_v19, %v3611_v20 }
 0x5af   : > { %4443 = vmatpush2.msra.mxu0 %v3618_v44 }
 0x5b0   : > { %v3617_v16 = vpop.permute.xlu1 %3616 }
 0x5b1   : > { %v3542_v7 = vpop.permute.xlu0 %3541 }
 0x5b2   : > { %v3548_v4 = vsel %vm982_vm4, %v3540_v47, %v3542_v7 }
 0x5b3   : > { %4444 = vmatprep.subr.mxu0 %v3548_v4 }
 0x5b4   : > { %4445 = vmatpush2.msra.mxu0 %v3547_v38  ;;  %v3546_v60 = vpop.permute.xlu1 %3545 }
 0x5b5   : > { %v3688_v29 = vpop.permute.xlu0 %3687  ;;  %4447 = vmatmul.mubr.f32.vlgmr.msra.gmra.mxu0 %v4269_v58 }
 0x5b6   : > { %v3692_v39 = vsel %vm280_vm6, %v3686_v57, %v3688_v29 }
 0x5b7   : > { %4511 = vmatprep.subr.mxu1 %v3692_v39 }
 0x5b8   : > { %4512 = vmatpush2.msra.mxu1 %v3691_v34 }
 0x5b9   : > { %v3615_v55 = vpop.permute.xlu0 %3614 }
 0x5ba   : > { %v3620_v53 = vsel %vm908_vm5, %v3613_v50, %v3615_v55  ;;  %v3621_v30 = vsel %vm908_vm5, %v3615_v55, %v3617_v16 }
 0x5bb   : > { %4513 = vmatprep.subr.mxu1 %v3621_v30 }
 0x5bc   : > { %4514 = vmatpush2.msra.mxu1 %v3620_v53 }
 0x5bd   : > { %v3544_v46 = vpop.permute.xlu0 %3543 }
 0x5be   : > { %v3549_v9 = vsel %vm982_vm4, %v3542_v7, %v3544_v46  ;;  %v3550_v59 = vsel %vm982_vm4, %v3544_v46, %v3546_v60 }
 0x5bf   : > { %4515 = vmatprep.subr.mxu1 %v3550_v59 }
 0x5c0   : > { %4516 = vmatpush2.msra.mxu1 %v3549_v9 }
 0x5c1   : > { %4518 = vmatmul.mubr.f32.vlgmr.msra.gmra.mxu1 %v4269_v58 }
 0x675   : > { %v4448_v25 = vpop.f32.mrf.mxu0 }
 0x677   : > { %v4450_v11 = vpop.f32.mrf.mxu0 }
 0x678   : > { %v4524_v1 = vadd.f32 %v4450_v11, %v4448_v25 }
 0x681   : > { %v4519_v56 = vpop.f32.mrf.mxu1 }
 0x682   : > { %v4525_v3 = vadd.f32 %v4524_v1, %v4519_v56 }
 0x683   : > { %v4521_v10 = vpop.f32.mrf.mxu1 }
 0x684   : > { %v4526_v33 = vadd.f32 %v4525_v3, %v4521_v10 }
 0x686   : > { %4527 = vadd.xlane.f32.xlu0 %v4526_v33 }
 0x70f   : > { %v4528_v28 = vpop.xlane.xlu0 %4527 }
 0x710   : > { %v4529_v31 = vmul.f32 0.001953125, %v4528_v28 }
 0x712   : > { %v4530_v26 = vsub.f32 %v4448_v25, %v4529_v31  ;;  %v4531_v51 = vsub.f32 %v4450_v11, %v4529_v31  ;;  %v4532_v61 = vsub.f32 %v4519_v56, %v4529_v31  ;;  %v4533_v42 = vsub.f32 %v4521_v10, %v4529_v31 }
 0x714   : > { %v4534_v24 = vmul.f32 %v4530_v26, %v4530_v26  ;;  %v4535_v12 = vmul.f32 %v4531_v51, %v4531_v51  ;;  %v4536_v54 = vmul.f32 %v4532_v61, %v4532_v61  ;;  %v4537_v6 = vmul.f32 %v4533_v42, %v4533_v42 }
 0x716   : > { %v4538_v0 = vadd.f32 %v4535_v12, %v4534_v24 }
 0x718   : > { %v4539_v27 = vadd.f32 %v4538_v0, %v4536_v54 }
 0x71a   : > { %v4540_v8 = vadd.f32 %v4539_v27, %v4537_v6 }
 0x71c   : > { %4541 = vadd.xlane.f32.xlu1 %v4540_v8 }
 0x7a5   : > { %v4542_v17 = vpop.xlane.xlu1 %4541 }
 0x7a6   : > { %v4543_v36 = vmul.f32 0.001953125, %v4542_v17 }
 0x7a8   : > { %v4544_v48 = vadd.f32 1e-05, %v4543_v36 }
 0x7aa   : > { %4718 = vrsqrt.f32 %v4544_v48 }
 0x7b7   : > { %v4719_v49 = vpop.eup %4718 }
 0x7b8   : > { %v4546_v15 = vmul.f32 %v4719_v49, %v4530_v26  ;;  %v4547_v23 = vmul.f32 %v4719_v49, %v4531_v51  ;;  %v4548_v40 = vmul.f32 %v4719_v49, %v4532_v61  ;;  %v4549_v32 = vmul.f32 %v4719_v49, %v4533_v42 }
 0x7ba   : > { %vm4550_vm4 = vcmp.ge.f32.partialorder %v4546_v15, 0.0  ;;  %vm4551_vm5 = vcmp.ge.f32.partialorder %v4547_v23, 0.0  ;;  %vm4552_vm6 = vcmp.ge.f32.partialorder %v4548_v40, 0.0  ;;  %vm4553_vm7 = vcmp.ge.f32.partialorder %v4549_v32, 0.0 }
 0x7bb   : > { %v4554_v35 = vmul.f32 0.01, %v4546_v15  ;;  %v4555_v43 = vmul.f32 0.01, %v4547_v23  ;;  %v4556_v22 = vmul.f32 0.01, %v4548_v40 }
 0x7bc   : > { %v4557_v50 = vmul.f32 0.01, %v4549_v32 }
 0x7bd   : > { %v4558_v45 = vsel %vm4550_vm4, %v4546_v15, %v4554_v35  ;;  %v4559_v5 = vsel %vm4551_vm5, %v4547_v23, %v4555_v43  ;;  %v4560_v52 = vsel %vm4552_vm6, %v4548_v40, %v4556_v22 }
 0x7be   : > { %v4561_v37 = vsel %vm4553_vm7, %v4549_v32, %v4557_v50  ;;  %4562 = vst [vmem:[%s197_s20] sm:$0xff] %v4558_v45  ;;  %4563 = vst [vmem:[%s197_s20 + $0x8] sm:$0xff] %v4559_v5 }
 0x7bf   : > { %4564 = vst [vmem:[%s197_s20 + $0x10] sm:$0xff] %v4560_v52  ;;  %4565 = vst [vmem:[%s197_s20 + $0x18] sm:$0xff] %v4561_v37 }
 0x7c0 PF: > { %s14_s15 = sadd.s32 1, %s4730_s15  }
 0x7c1   : > { %p11_p4 = scmp.ge.s32.totalorder %s14_s15, 4  }
 0x7c3   :  { %13 = sbr.rel (!%p11_p4) target bundleno = 1 (0x1), region = 91 }

</bundles_post_ra>
